<compile_context>
chip_gen: v7x
topology: tpu7x:2x2x1
jax: 0.10.0
libtpu: 0.0.40
codegen_flags: <defaults>
</compile_context>

<pallas_src>
import math
from functools import partial

import jax
import jax.numpy as jnp
from jax.experimental import pallas as pl
from jax.experimental.pallas import tpu as pltpu


# ----------------------------------------------------------------------------
# Hardware-aware knobs
# ----------------------------------------------------------------------------
def _default_vmem_limit():
    # Generation-aware scoped VMEM budget: ~70% of physical, capped.
    # v7x: ~45 MiB (of 64), v5e/v6e: ~90 MiB (of 128). Safe fallback: 48 MiB.
    try:
        cap = int(pltpu.get_tpu_info().vmem_capacity_bytes)
        return max(32 * 1024 * 1024, min(int(cap * 0.7), 110 * 1024 * 1024))
    except Exception:
        return 48 * 1024 * 1024


_VMEM_LIMIT = _default_vmem_limit()


def _sublane_align(dtype):
    """Sublane alignment for the second-minor tile dim: 8/f32, 16/bf16, 32/int8."""
    itemsize = jnp.dtype(dtype).itemsize
    return max(8, 32 // max(itemsize, 1))


def _pick_tile(dim, desired, align):
    """Largest `align`-multiple divisor of `dim` that is <= desired, else full dim."""
    if dim <= desired:
        return dim
    t = (desired // align) * align
    while t >= align:
        if dim % t == 0:
            return t
        t -= align
    return dim


def _pad_axis(a, axis, mult):
    size = a.shape[axis]
    pad = (-size) % mult
    if pad == 0:
        return a
    widths = [(0, 0)] * a.ndim
    widths[axis] = (0, pad)
    return jnp.pad(a, widths)


def _buffered_spec(shape, index_map, nbuf):
    # pl.Buffered is documented for this JAX version; fall back gracefully if
    # the BlockSpec constructor does not accept pipeline_mode.
    try:
        return pl.BlockSpec(shape, index_map, pipeline_mode=pl.Buffered(nbuf))
    except Exception:
        return pl.BlockSpec(shape, index_map)


# ----------------------------------------------------------------------------
# Fused matmul kernel:
#   out_t = activation( x @ W_t + b_t [+ adds...] ) [-> LayerNorm(gamma,beta)]
# Supports multiple outputs (shared LHS, e.g. fused Q/K/V projection).
# ----------------------------------------------------------------------------
def _matmul_kernel(*refs, n_out, n_add, activation, ln_eps):
    it = iter(refs)
    x_ref = next(it)
    w_refs = [next(it) for _ in range(n_out)]
    b_refs = [next(it) for _ in range(n_out)]
    add_refs = [next(it) for _ in range(n_add)]
    if ln_eps is not None:
        g_ref = next(it)
        b2_ref = next(it)
    o_refs = [next(it) for _ in range(n_out)]
    acc_ref = next(it)

    kk = pl.program_id(2)

    @pl.when(kk == 0)
    def _init():
        acc_ref[...] = jnp.zeros_like(acc_ref)

    xv = x_ref[...]
    for t in range(n_out):
        acc_ref[t] += jnp.dot(xv, w_refs[t][...],
                              preferred_element_type=jnp.float32)

    @pl.when(kk == pl.num_programs(2) - 1)
    def _finalize():
        for t in range(n_out):
            y = acc_ref[t] + b_refs[t][...].astype(jnp.float32)
            for a_ref in add_refs:                 # residual / positional enc (f32)
                y = y + a_ref[...].astype(jnp.float32)
            if activation == "relu":
                y = jnp.maximum(y, 0.0)
            if ln_eps is not None:                 # fused residual + LayerNorm
                mu = jnp.mean(y, axis=-1, keepdims=True)
                var = jnp.mean(jnp.square(y - mu), axis=-1, keepdims=True)
                y = (y - mu) * jax.lax.rsqrt(var + ln_eps)
                y = y * g_ref[...].astype(jnp.float32) + b2_ref[...].astype(jnp.float32)
            o_refs[t][...] = y.astype(o_refs[t].dtype)


def _fused_matmul(x, ws, bs, *, activation=None, extra=None, ln=None,
                  pe=None, pe_len=None):
    """(M,K) @ [(K,N)]*n + bias, with optional fused add / ReLU / LayerNorm."""
    n_out = len(ws)
    if n_out > 1:
        assert activation is None and extra is None and ln is None and pe is None
    M0, K0 = x.shape
    N = ws[0].shape[1]
    out_dtype = x.dtype
    sub = _sublane_align(x.dtype)

    # MXU-friendly tiles; pad big irregular M/K instead of one giant block.
    tm = _pick_tile(M0, 256, sub)
    if tm == M0 and M0 > 1024:
        tm = 256
    tk = _pick_tile(K0, 512, 128)
    if tk == K0 and K0 > 2048:
        tk = 512
    # Fused LayerNorm needs the full row in one (lane-dense) output block.
    tn = N if ln is not None else _pick_tile(N, 512, 128)

    x = _pad_axis(_pad_axis(x, 0, tm), 1, tk)
    ws = [_pad_axis(w, 0, tk) for w in ws]
    if extra is not None:
        extra = _pad_axis(extra, 0, tm)
    M, K = x.shape
    grid = (M // tm, N // tn, K // tk)

    in_specs = [pl.BlockSpec((tm, tk), lambda i, j, k: (i, k))]
    args = [x]
    for w in ws:
        in_specs.append(pl.BlockSpec((tk, tn), lambda i, j, k: (k, j)))
        args.append(w)
    for b in bs:
        in_specs.append(pl.BlockSpec((1, tn), lambda i, j, k: (0, j)))
        args.append(b.reshape(1, N))

    n_add = 0
    if extra is not None:                                       # residual add
        in_specs.append(pl.BlockSpec((tm, tn), lambda i, j, k: (i, j)))
        args.append(extra)
        n_add += 1
    if pe is not None:                                          # positional enc
        pe = pe.astype(jnp.float32)                             # keep PE add in f32
        L = pe_len
        if tm <= L and L % tm == 0:
            nlb = L // tm
            in_specs.append(pl.BlockSpec((tm, tn), lambda i, j, k: (i % nlb, j)))
            args.append(pe)
        elif tm % L == 0:
            in_specs.append(pl.BlockSpec((tm, tn), lambda i, j, k: (0, j)))
            args.append(jnp.tile(pe, (tm // L, 1)))
        else:
            # TODO(synk): irregular L vs tm -> fall back to materialized rows.
            rows = _pad_axis(jnp.tile(pe, (M0 // L, 1)), 0, tm)
            in_specs.append(pl.BlockSpec((tm, tn), lambda i, j, k: (i, j)))
            args.append(rows)
        n_add += 1

    ln_eps = None
    if ln is not None:
        g, b2, ln_eps = ln
        for p in (g, b2):
            in_specs.append(pl.BlockSpec((1, tn), lambda i, j, k: (0, j)))
            args.append(p.reshape(1, N).astype(jnp.float32))

    out_shape = tuple(jax.ShapeDtypeStruct((M, N), out_dtype) for _ in range(n_out))
    out_specs = [pl.BlockSpec((tm, tn), lambda i, j, k: (i, j)) for _ in range(n_out)]

    flops = 2 * M * K * N * n_out
    bytes_accessed = (x.size * x.dtype.itemsize
                      + sum(w.size * w.dtype.itemsize for w in ws)
                      + n_out * M * N * jnp.dtype(out_dtype).itemsize)

    outs = pl.pallas_call(
        partial(_matmul_kernel, n_out=n_out, n_add=n_add,
                activation=activation, ln_eps=ln_eps),
        out_shape=out_shape,
        grid_spec=pltpu.PrefetchScalarGridSpec(
            num_scalar_prefetch=0,
            grid=grid,
            in_specs=in_specs,
            out_specs=out_specs,
            scratch_shapes=[pltpu.VMEM((n_out, tm, tn), jnp.float32)],
        ),
        compiler_params=pltpu.CompilerParams(
            dimension_semantics=("parallel", "parallel", "arbitrary"),
            vmem_limit_bytes=_VMEM_LIMIT,
        ),
        cost_estimate=pl.CostEstimate(flops=int(flops), transcendentals=0,
                                      bytes_accessed=int(bytes_accessed)),
    )(*args)

    if not isinstance(outs, (list, tuple)):
        outs = (outs,)
    if M != M0:
        outs = tuple(o[:M0] for o in outs)
    return outs


def matmul_bias(x, w, b, activation=None, extra=None, ln=None, pe=None, pe_len=None):
    return _fused_matmul(x, [w], [b], activation=activation, extra=extra,
                         ln=ln, pe=pe, pe_len=pe_len)[0]


def matmul_qkv(x, wq, wk, wv, bq, bk, bv):
    """Q/K/V projections in one pass over x (three outputs, one kernel)."""
    return _fused_matmul(x, [wq, wk, wv], [bq, bk, bv])


# ----------------------------------------------------------------------------
# Standalone row-tiled LayerNorm (only used for the final LN)
# ----------------------------------------------------------------------------
def _layer_norm_kernel(x_ref, g_ref, b_ref, o_ref, *, eps):
    xv = x_ref[...].astype(jnp.float32)
    mu = jnp.mean(xv, axis=-1, keepdims=True)
    var = jnp.mean(jnp.square(xv - mu), axis=-1, keepdims=True)
    y = (xv - mu) * jax.lax.rsqrt(var + eps)
    o_ref[...] = (y * g_ref[...] + b_ref[...]).astype(o_ref.dtype)


def layer_norm(x2d, gamma, beta, eps):
    M, D = x2d.shape
    tm = _pick_tile(M, 512, _sublane_align(x2d.dtype))
    x2d = _pad_axis(x2d, 0, tm) if M % tm else x2d
    Mp = x2d.shape[0]
    out = pl.pallas_call(
        partial(_layer_norm_kernel, eps=eps),
        out_shape=jax.ShapeDtypeStruct((Mp, D), x2d.dtype),
        grid_spec=pltpu.PrefetchScalarGridSpec(
            num_scalar_prefetch=0,
            grid=(Mp // tm,),
            in_specs=[pl.BlockSpec((tm, D), lambda i: (i, 0)),
                      pl.BlockSpec((1, D), lambda i: (0, 0)),
                      pl.BlockSpec((1, D), lambda i: (0, 0))],
            out_specs=pl.BlockSpec((tm, D), lambda i: (i, 0)),
        ),
        compiler_params=pltpu.CompilerParams(
            dimension_semantics=("parallel",),
            vmem_limit_bytes=_VMEM_LIMIT,
        ),
    )(x2d, gamma.reshape(1, D).astype(jnp.float32),
      beta.reshape(1, D).astype(jnp.float32))
    return out[:M] if Mp != M else out


# ----------------------------------------------------------------------------
# Flash-style multi-head attention, all heads per grid step, (B, L, E) layout
# (no split/merge-head transposes, no per-head mask replication).
# ----------------------------------------------------------------------------
def _flash_attn_kernel(q_ref, k_ref, v_ref, bias_ref, o_ref,
                       m_sc, l_sc, acc_sc, *, scale, heads, head_dim):
    kv = pl.program_id(2)

    @pl.when(kv == 0)
    def _init():
        m_sc[...] = jnp.full_like(m_sc, -jnp.inf)
        l_sc[...] = jnp.zeros_like(l_sc)
        acc_sc[...] = jnp.zeros_like(acc_sc)

    q = q_ref[0]                                  # (tq, E)
    k = k_ref[0]                                  # (tkv, E)
    v = v_ref[0]                                  # (tkv, E)
    b = bias_ref[0].astype(jnp.float32)           # (1, tkv), shared by all heads

    for h in range(heads):
        lo = h * head_dim
        qh = q[:, lo:lo + head_dim]
        kh = k[:, lo:lo + head_dim]
        vh = v[:, lo:lo + head_dim]
        # Contract dim 1 of both operands -> the K "transpose" is absorbed by
        # the MXU op (no explicit XLU transpose of the K tile).
        s = jax.lax.dot_general(qh, kh, (((1,), (1,)), ((), ())),
                                preferred_element_type=jnp.float32) * scale + b
        m_prev = m_sc[h]
        m_new = jnp.maximum(m_prev, jnp.max(s, axis=-1, keepdims=True))
        alpha = jnp.exp(m_prev - m_new)
        p = jnp.exp(s - m_new)
        l_sc[h] = alpha * l_sc[h] + jnp.sum(p, axis=-1, keepdims=True)
        acc_sc[h] = alpha * acc_sc[h] + jnp.dot(
            p.astype(vh.dtype), vh, preferred_element_type=jnp.float32)
        m_sc[h] = m_new

    @pl.when(kv == pl.num_programs(2) - 1)
    def _finalize():
        # Exact normalization (no approx reciprocal), lane-dense single store.
        pieces = [acc_sc[h] / l_sc[h] for h in range(heads)]
        o_ref[0] = jnp.concatenate(pieces, axis=-1).astype(o_ref.dtype)


def mha_attention(q, k, v, bias, *, heads):
    """q, k, v: (B, L, E); bias: (B, 1, L) additive mask bias (f32)."""
    B, L, E = q.shape
    Dh = E // heads
    scale = 1.0 / math.sqrt(Dh)
    sub = _sublane_align(q.dtype)
    tq = _pick_tile(L, 256, sub)
    tkv = _pick_tile(L, 128, 128)
    n_kv = L // tkv
    grid = (B, L // tq, n_kv)

    def kv_spec():
        idx = lambda b, qi, ki: (b, ki, 0)
        if n_kv > 2:   # 3-deep buffering only pays off with a real kv loop
            return _buffered_spec((1, tkv, E), idx, 3)
        return pl.BlockSpec((1, tkv, E), idx)

    flops = 4 * B * L * L * E
    transcend = B * heads * L * L
    bytes_acc = 4 * q.size * q.dtype.itemsize + bias.size * 4

    return pl.pallas_call(
        partial(_flash_attn_kernel, scale=scale, heads=heads, head_dim=Dh),
        out_shape=jax.ShapeDtypeStruct((B, L, E), q.dtype),
        grid_spec=pltpu.PrefetchScalarGridSpec(
            num_scalar_prefetch=0,
            grid=grid,
            in_specs=[
                pl.BlockSpec((1, tq, E), lambda b, qi, ki: (b, qi, 0)),
                kv_spec(),
                kv_spec(),
                pl.BlockSpec((1, 1, tkv), lambda b, qi, ki: (b, 0, ki)),
            ],
            out_specs=pl.BlockSpec((1, tq, E), lambda b, qi, ki: (b, qi, 0)),
            scratch_shapes=[
                pltpu.VMEM((heads, tq, 1), jnp.float32),    # running max
                pltpu.VMEM((heads, tq, 1), jnp.float32),    # running denom
                pltpu.VMEM((heads, tq, Dh), jnp.float32),   # running numerator
            ],
        ),
        compiler_params=pltpu.CompilerParams(
            dimension_semantics=("parallel", "parallel", "arbitrary"),
            vmem_limit_bytes=_VMEM_LIMIT,
        ),
        cost_estimate=pl.CostEstimate(flops=int(flops),
                                      transcendentals=int(transcend),
                                      bytes_accessed=int(bytes_acc)),
    )(q, k, v, bias)


# ----------------------------------------------------------------------------
# Conv2d (k=3, stride=2, pad=1) + ReLU via channels-last im2col + tiled matmul
# ----------------------------------------------------------------------------
def _im2col_nhwc(x, k=3, stride=2, pad=1):
    B, H, W, C = x.shape
    xp = jnp.pad(x, ((0, 0), (pad, pad), (pad, pad), (0, 0)))
    Ho = (H + 2 * pad - k) // stride + 1
    Wo = (W + 2 * pad - k) // stride + 1
    cols = []
    for i in range(k):
        for j in range(k):
            cols.append(xp[:, i:i + stride * Ho:stride,
                           j:j + stride * Wo:stride, :])
    cols = jnp.concatenate(cols, axis=-1)                 # (B, Ho, Wo, k*k*C)
    return cols.reshape(B * Ho * Wo, k * k * C), Ho, Wo


def conv2d_s2_relu_nhwc(x_nhwc, w, b):
    """PyTorch Conv2d(Cin, Cout, 3, stride=2, pad=1) + ReLU; w is (Cout,Cin,3,3)."""
    B, _, _, Cin = x_nhwc.shape
    Cout = w.shape[0]
    cols, Ho, Wo = _im2col_nhwc(x_nhwc)
    w2d = w.transpose(2, 3, 1, 0).reshape(9 * Cin, Cout)
    y2d = matmul_bias(cols, w2d, b, activation="relu")
    return y2d.reshape(B, Ho, Wo, Cout)


# ----------------------------------------------------------------------------
# Encoder forward
# ----------------------------------------------------------------------------
def positional_encoding(length, dim):
    pos = jnp.arange(length, dtype=jnp.float32)[:, None]
    i = jnp.arange(dim // 2, dtype=jnp.float32)[None, :]
    angle = pos / jnp.power(10000.0, 2.0 * i / dim)
    pe = jnp.stack([jnp.sin(angle), jnp.cos(angle)], axis=-1).reshape(length, dim)
    return pe                                              # (L, E) f32


def encoder_forward(params, x, mask, *, heads, eps, training=False,
                    compute_dtype=None):
    # training=False -> dropout is identity.
    B = x.shape[0]

    def cst(a):
        return a if compute_dtype is None else a.astype(compute_dtype)

    # conv front-end (conv -> relu -> conv -> relu), channels-last throughout.
    x_nhwc = jnp.transpose(x, (0, 2, 3, 1))                 # NCHW -> NHWC (once)
    x_nhwc = conv2d_s2_relu_nhwc(x_nhwc, params["conv1_w"], params["conv1_b"])
    x_nhwc = conv2d_s2_relu_nhwc(x_nhwc, params["conv2_w"], params["conv2_b"])

    # TODO(synk): `PreNet(m, channels)` source was not provided; treated as identity.
    # TODO(synk): `Linear` source not provided; assumes flatten order (freq, channel)
    #             per time frame before the projection to embedding_dim.
    B_, H4, W4, C = x_nhwc.shape
    L = W4
    xs = cst(x_nhwc.transpose(0, 2, 1, 3).reshape(B * L, H4 * C))   # (B*L, F)

    # linear projection with the positional encoding added (f32) in the epilogue.
    E = params["linear_w"].shape[1]
    pe = positional_encoding(L, E)
    x2d = matmul_bias(xs, cst(params["linear_w"]), params["linear_b"],
                      pe=pe, pe_len=L)

    # additive attention bias from mask (B, 1, 1, L), 1 = keep; NOT per-head.
    bias = ((1.0 - mask.reshape(B, 1, L)) * -1e9).astype(jnp.float32)

    for lp in params["layers"]:
        # fused Q/K/V projection: one pass over x2d, three (B*L, E) outputs.
        q2d, k2d, v2d = matmul_qkv(x2d, cst(lp["wq"]), cst(lp["wk"]), cst(lp["wv"]),
                                   lp["bq"], lp["bk"], lp["bv"])
        attn = mha_attention(q2d.reshape(B, L, E), k2d.reshape(B, L, E),
                             v2d.reshape(B, L, E), bias, heads=heads)
        # output projection with residual + LayerNorm fused into the epilogue.
        x2d = matmul_bias(attn.reshape(B * L, E), cst(lp["wo"]), lp["bo"],
                          extra=x2d, ln=(lp["ln1_g"], lp["ln1_b"], eps))

        # position-wise feed-forward; residual + LayerNorm fused into ff2.
        f = matmul_bias(x2d, cst(lp["ff1_w"]), lp["ff1_b"], activation="relu")
        x2d = matmul_bias(f, cst(lp["ff2_w"]), lp["ff2_b"],
                          extra=x2d, ln=(lp["ln2_g"], lp["ln2_b"], eps))

    # final LayerNorm
    x2d = layer_norm(x2d, params["ln_f_g"], params["ln_f_b"], eps)
    return x2d.reshape(B, L, E)


# ----------------------------------------------------------------------------
# Deterministic parameter construction
# ----------------------------------------------------------------------------
def make_params(key, *, n, channels, conv_feat_dim, embedding_dim, d_ff):
    keys = iter(jax.random.split(key, 8 + 8 * n))

    def w(shape, scale=0.02):
        return (scale * jax.random.normal(next(keys), shape)).astype(jnp.float32)

    def zeros(shape):
        return jnp.zeros(shape, jnp.float32)

    def ones(shape):
        return jnp.ones(shape, jnp.float32)

    params = {
        "conv1_w": w((channels, 1, 3, 3)), "conv1_b": zeros((channels,)),
        "conv2_w": w((channels, channels, 3, 3)), "conv2_b": zeros((channels,)),
        "linear_w": w((conv_feat_dim, embedding_dim)),
        "linear_b": zeros((embedding_dim,)),
        "ln_f_g": ones((embedding_dim,)), "ln_f_b": zeros((embedding_dim,)),
        "layers": [],
    }
    for _ in range(n):
        params["layers"].append({
            "wq": w((embedding_dim, embedding_dim)), "bq": zeros((embedding_dim,)),
            "wk": w((embedding_dim, embedding_dim)), "bk": zeros((embedding_dim,)),
            "wv": w((embedding_dim, embedding_dim)), "bv": zeros((embedding_dim,)),
            "wo": w((embedding_dim, embedding_dim)), "bo": zeros((embedding_dim,)),
            "ln1_g": ones((embedding_dim,)), "ln1_b": zeros((embedding_dim,)),
            "ff1_w": w((embedding_dim, d_ff)), "ff1_b": zeros((d_ff,)),
            "ff2_w": w((d_ff, embedding_dim)), "ff2_b": zeros((embedding_dim,)),
            "ln2_g": ones((embedding_dim,)), "ln2_b": zeros((embedding_dim,)),
        })
    return params


# ----------------------------------------------------------------------------
if __name__ == "__main__":
    # small config: n=2 layers, channels=4, spectrogram 16x16, E=32, heads=4
    B, Cin, H, W = 2, 1, 16, 16
    channels = 4
    embedding_dim = 32
    heads = 4
    d_ff = 64
    n_layers = 2
    eps = 1e-6

    H4, W4 = H // 4, W // 4              # after two stride-2 convs
    length = W4                          # time frames -> sequence length
    conv_feat_dim = channels * H4        # flattened (freq, channel) features

    key = jax.random.PRNGKey(0)
    k_x, k_p = jax.random.split(key)
    x = jax.random.normal(k_x, (B, Cin, H, W), dtype=jnp.float32)
    mask = jnp.ones((B, 1, 1, length), dtype=jnp.float32)

    params = make_params(
        k_p, n=n_layers, channels=channels,
        conv_feat_dim=conv_feat_dim, embedding_dim=embedding_dim, d_ff=d_ff,
    )

    fwd = jax.jit(partial(encoder_forward, heads=heads, eps=eps, training=False))
    out = fwd(params, x, mask)
    out = jax.block_until_ready(out)

    assert out.shape == (B, length, embedding_dim), out.shape
    assert bool(jnp.all(jnp.isfinite(out)))
    print("KERNEL_OK")
</pallas_src>

<mosaic_0001>
module attributes {stable_mosaic.version = 11 : i64} {
  func.func @_matmul_kernel(%arg0: i32, %arg1: i32, %arg2: i32, %arg3: memref<128x9xf32, #tpu.memory_space<vmem>>, %arg4: memref<9x4xf32, #tpu.memory_space<vmem>>, %arg5: memref<1x4xf32, #tpu.memory_space<vmem>>, %arg6: memref<128x4xf32, #tpu.memory_space<vmem>>, %arg7: memref<1x128x4xf32, #tpu.memory_space<vmem>>) attributes {dimension_semantics = [#tpu.dimension_semantics<parallel>, #tpu.dimension_semantics<parallel>, #tpu.dimension_semantics<arbitrary>], iteration_bounds = array<i64: 1, 1, 1>, scalar_prefetch = 0 : i64, scratch_operands = 1 : i64, tpu.core_type = #tpu.core_type<tc>, window_params = [{transform_indices = @transform_0, window_bounds = array<i64: 128, 9>}, {transform_indices = @transform_1, window_bounds = array<i64: 9, 4>}, {transform_indices = @transform_2, window_bounds = array<i64: 1, 4>}, {transform_indices = @transform_3, window_bounds = array<i64: 128, 4>}]} {
    %c0_i32 = arith.constant 0 : i32
    %0 = arith.cmpi eq, %arg2, %c0_i32 : i32
    %1 = arith.extui %0 : i1 to i32
    %c0_i32_0 = arith.constant 0 : i32
    %2 = arith.cmpi ne, %1, %c0_i32_0 : i32
    scf.if %2 {
      %cst_12 = arith.constant 0.000000e+00 : f32
      %15 = vector.broadcast %cst_12 : f32 to vector<1x128x4xf32>
      %c0_13 = arith.constant 0 : index
      %c0_14 = arith.constant 0 : index
      %c0_15 = arith.constant 0 : index
      %16 = vector.load %arg7[%c0_13, %c0_14, %c0_15] : memref<1x128x4xf32, #tpu.memory_space<vmem>>, vector<1x128x4xf32>
      tpu.vector_store %arg7[%c0_13, %c0_14, %c0_15], %15 {strides = array<i32>} : memref<1x128x4xf32, #tpu.memory_space<vmem>>, vector<1x128x4xf32>,
    } else {
    }
    %c0 = arith.constant 0 : index
    %c0_1 = arith.constant 0 : index
    %3 = vector.load %arg3[%c0, %c0_1] : memref<128x9xf32, #tpu.memory_space<vmem>>, vector<128x9xf32>
    %c0_2 = arith.constant 0 : index
    %c0_3 = arith.constant 0 : index
    %c0_4 = arith.constant 0 : index
    %4 = vector.load %arg7[%c0_2, %c0_3, %c0_4] : memref<1x128x4xf32, #tpu.memory_space<vmem>>, vector<1x128x4xf32>
    %5 = vector.shape_cast %4 : vector<1x128x4xf32> to vector<128x4xf32>
    %c0_5 = arith.constant 0 : index
    %c0_6 = arith.constant 0 : index
    %6 = vector.load %arg4[%c0_5, %c0_6] : memref<9x4xf32, #tpu.memory_space<vmem>>, vector<9x4xf32>
    %cst = arith.constant dense<0.000000e+00> : vector<128x4xf32>
    %7 = tpu.matmul %3, %6, %cst {dimension_numbers = #tpu.dot_dimension_numbers<[1], [0], [0], [1], [0, 0, 1, 1], [], []>} : vector<128x9xf32>, vector<9x4xf32>, vector<128x4xf32> -> vector<128x4xf32>
    %8 = arith.addf %5, %7 : vector<128x4xf32>
    %c0_7 = arith.constant 0 : index
    %c0_8 = arith.constant 0 : index
    %c0_9 = arith.constant 0 : index
    %9 = vector.load %arg7[%c0_7, %c0_8, %c0_9] : memref<1x128x4xf32, #tpu.memory_space<vmem>>, vector<1x128x4xf32>
    %10 = vector.shape_cast %9 : vector<1x128x4xf32> to vector<128x4xf32>
    %11 = vector.shape_cast %8 : vector<128x4xf32> to vector<1x128x4xf32>
    tpu.vector_store %arg7[%c0_7, %c0_8, %c0_9], %11 {strides = array<i32>} : memref<1x128x4xf32, #tpu.memory_space<vmem>>, vector<1x128x4xf32>,
    %c0_i32_10 = arith.constant 0 : i32
    %12 = arith.cmpi eq, %arg2, %c0_i32_10 : i32
    %13 = arith.extui %12 : i1 to i32
    %c0_i32_11 = arith.constant 0 : i32
    %14 = arith.cmpi ne, %13, %c0_i32_11 : i32
    scf.if %14 {
      %c0_12 = arith.constant 0 : index
      %c0_13 = arith.constant 0 : index
      %c0_14 = arith.constant 0 : index
      %15 = vector.load %arg7[%c0_12, %c0_13, %c0_14] : memref<1x128x4xf32, #tpu.memory_space<vmem>>, vector<1x128x4xf32>
      %16 = vector.shape_cast %15 : vector<1x128x4xf32> to vector<128x4xf32>
      %c0_15 = arith.constant 0 : index
      %c0_16 = arith.constant 0 : index
      %17 = vector.load %arg5[%c0_15, %c0_16] : memref<1x4xf32, #tpu.memory_space<vmem>>, vector<1x4xf32>
      %18 = vector.broadcast %17 : vector<1x4xf32> to vector<128x4xf32>
      %19 = arith.addf %16, %18 : vector<128x4xf32>
      %cst_17 = arith.constant 0.000000e+00 : f32
      %20 = vector.broadcast %cst_17 : f32 to vector<128x4xf32>
      %21 = arith.maximumf %19, %20 : vector<128x4xf32>
      %c0_18 = arith.constant 0 : index
      %c0_19 = arith.constant 0 : index
      %22 = vector.load %arg6[%c0_18, %c0_19] : memref<128x4xf32, #tpu.memory_space<vmem>>, vector<128x4xf32>
      tpu.vector_store %arg6[%c0_18, %c0_19], %21 {strides = array<i32>} : memref<128x4xf32, #tpu.memory_space<vmem>>, vector<128x4xf32>,
    } else {
    }
    return
  }
  func.func @transform_0(%arg0: i32, %arg1: i32, %arg2: i32) -> (i32, i32) {
    %c0_i32 = arith.constant 0 : i32
    return %arg0, %arg2 : i32, i32
  }
  func.func @transform_1(%arg0: i32, %arg1: i32, %arg2: i32) -> (i32, i32) {
    %c0_i32 = arith.constant 0 : i32
    return %arg2, %arg1 : i32, i32
  }
  func.func @transform_2(%arg0: i32, %arg1: i32, %arg2: i32) -> (i32, i32) {
    %c0_i32 = arith.constant 0 : i32
    %c0_i32_0 = arith.constant 0 : i32
    return %c0_i32, %arg1 : i32, i32
  }
  func.func @transform_3(%arg0: i32, %arg1: i32, %arg2: i32) -> (i32, i32) {
    %c0_i32 = arith.constant 0 : i32
    return %arg0, %arg1 : i32, i32
  }
}

module attributes {stable_mosaic.version = 11 : i64} {
  func.func @_matmul_kernel(%arg0: i32, %arg1: i32, %arg2: i32, %arg3: memref<32x36xf32, #tpu.memory_space<vmem>>, %arg4: memref<36x4xf32, #tpu.memory_space<vmem>>, %arg5: memref<1x4xf32, #tpu.memory_space<vmem>>, %arg6: memref<32x4xf32, #tpu.memory_space<vmem>>, %arg7: memref<1x32x4xf32, #tpu.memory_space<vmem>>) attributes {dimension_semantics = [#tpu.dimension_semantics<parallel>, #tpu.dimension_semantics<parallel>, #tpu.dimension_semantics<arbitrary>], iteration_bounds = array<i64: 1, 1, 1>, scalar_prefetch = 0 : i64, scratch_operands = 1 : i64, tpu.core_type = #tpu.core_type<tc>, window_params = [{transform_indices = @transform_0, window_bounds = array<i64: 32, 36>}, {transform_indices = @transform_1, window_bounds = array<i64: 36, 4>}, {transform_indices = @transform_2, window_bounds = array<i64: 1, 4>}, {transform_indices = @transform_3, window_bounds = array<i64: 32, 4>}]} {
    %c0_i32 = arith.constant 0 : i32
    %0 = arith.cmpi eq, %arg2, %c0_i32 : i32
    %1 = arith.extui %0 : i1 to i32
    %c0_i32_0 = arith.constant 0 : i32
    %2 = arith.cmpi ne, %1, %c0_i32_0 : i32
    scf.if %2 {
      %cst_12 = arith.constant 0.000000e+00 : f32
      %15 = vector.broadcast %cst_12 : f32 to vector<1x32x4xf32>
      %c0_13 = arith.constant 0 : index
      %c0_14 = arith.constant 0 : index
      %c0_15 = arith.constant 0 : index
      %16 = vector.load %arg7[%c0_13, %c0_14, %c0_15] : memref<1x32x4xf32, #tpu.memory_space<vmem>>, vector<1x32x4xf32>
      tpu.vector_store %arg7[%c0_13, %c0_14, %c0_15], %15 {strides = array<i32>} : memref<1x32x4xf32, #tpu.memory_space<vmem>>, vector<1x32x4xf32>,
    } else {
    }
    %c0 = arith.constant 0 : index
    %c0_1 = arith.constant 0 : index
    %3 = vector.load %arg3[%c0, %c0_1] : memref<32x36xf32, #tpu.memory_space<vmem>>, vector<32x36xf32>
    %c0_2 = arith.constant 0 : index
    %c0_3 = arith.constant 0 : index
    %c0_4 = arith.constant 0 : index
    %4 = vector.load %arg7[%c0_2, %c0_3, %c0_4] : memref<1x32x4xf32, #tpu.memory_space<vmem>>, vector<1x32x4xf32>
    %5 = vector.shape_cast %4 : vector<1x32x4xf32> to vector<32x4xf32>
    %c0_5 = arith.constant 0 : index
    %c0_6 = arith.constant 0 : index
    %6 = vector.load %arg4[%c0_5, %c0_6] : memref<36x4xf32, #tpu.memory_space<vmem>>, vector<36x4xf32>
    %cst = arith.constant dense<0.000000e+00> : vector<32x4xf32>
    %7 = tpu.matmul %3, %6, %cst {dimension_numbers = #tpu.dot_dimension_numbers<[1], [0], [0], [1], [0, 0, 1, 1], [], []>} : vector<32x36xf32>, vector<36x4xf32>, vector<32x4xf32> -> vector<32x4xf32>
    %8 = arith.addf %5, %7 : vector<32x4xf32>
    %c0_7 = arith.constant 0 : index
    %c0_8 = arith.constant 0 : index
    %c0_9 = arith.constant 0 : index
    %9 = vector.load %arg7[%c0_7, %c0_8, %c0_9] : memref<1x32x4xf32, #tpu.memory_space<vmem>>, vector<1x32x4xf32>
    %10 = vector.shape_cast %9 : vector<1x32x4xf32> to vector<32x4xf32>
    %11 = vector.shape_cast %8 : vector<32x4xf32> to vector<1x32x4xf32>
    tpu.vector_store %arg7[%c0_7, %c0_8, %c0_9], %11 {strides = array<i32>} : memref<1x32x4xf32, #tpu.memory_space<vmem>>, vector<1x32x4xf32>,
    %c0_i32_10 = arith.constant 0 : i32
    %12 = arith.cmpi eq, %arg2, %c0_i32_10 : i32
    %13 = arith.extui %12 : i1 to i32
    %c0_i32_11 = arith.constant 0 : i32
    %14 = arith.cmpi ne, %13, %c0_i32_11 : i32
    scf.if %14 {
      %c0_12 = arith.constant 0 : index
      %c0_13 = arith.constant 0 : index
      %c0_14 = arith.constant 0 : index
      %15 = vector.load %arg7[%c0_12, %c0_13, %c0_14] : memref<1x32x4xf32, #tpu.memory_space<vmem>>, vector<1x32x4xf32>
      %16 = vector.shape_cast %15 : vector<1x32x4xf32> to vector<32x4xf32>
      %c0_15 = arith.constant 0 : index
      %c0_16 = arith.constant 0 : index
      %17 = vector.load %arg5[%c0_15, %c0_16] : memref<1x4xf32, #tpu.memory_space<vmem>>, vector<1x4xf32>
      %18 = vector.broadcast %17 : vector<1x4xf32> to vector<32x4xf32>
      %19 = arith.addf %16, %18 : vector<32x4xf32>
      %cst_17 = arith.constant 0.000000e+00 : f32
      %20 = vector.broadcast %cst_17 : f32 to vector<32x4xf32>
      %21 = arith.maximumf %19, %20 : vector<32x4xf32>
      %c0_18 = arith.constant 0 : index
      %c0_19 = arith.constant 0 : index
      %22 = vector.load %arg6[%c0_18, %c0_19] : memref<32x4xf32, #tpu.memory_space<vmem>>, vector<32x4xf32>
      tpu.vector_store %arg6[%c0_18, %c0_19], %21 {strides = array<i32>} : memref<32x4xf32, #tpu.memory_space<vmem>>, vector<32x4xf32>,
    } else {
    }
    return
  }
  func.func @transform_0(%arg0: i32, %arg1: i32, %arg2: i32) -> (i32, i32) {
    %c0_i32 = arith.constant 0 : i32
    return %arg0, %arg2 : i32, i32
  }
  func.func @transform_1(%arg0: i32, %arg1: i32, %arg2: i32) -> (i32, i32) {
    %c0_i32 = arith.constant 0 : i32
    return %arg2, %arg1 : i32, i32
  }
  func.func @transform_2(%arg0: i32, %arg1: i32, %arg2: i32) -> (i32, i32) {
    %c0_i32 = arith.constant 0 : i32
    %c0_i32_0 = arith.constant 0 : i32
    return %c0_i32, %arg1 : i32, i32
  }
  func.func @transform_3(%arg0: i32, %arg1: i32, %arg2: i32) -> (i32, i32) {
    %c0_i32 = arith.constant 0 : i32
    return %arg0, %arg1 : i32, i32
  }
}

module attributes {stable_mosaic.version = 11 : i64} {
  func.func @_matmul_kernel(%arg0: i32, %arg1: i32, %arg2: i32, %arg3: memref<8x16xf32, #tpu.memory_space<vmem>>, %arg4: memref<16x32xf32, #tpu.memory_space<vmem>>, %arg5: memref<1x32xf32, #tpu.memory_space<vmem>>, %arg6: memref<8x32xf32, #tpu.memory_space<vmem>>, %arg7: memref<8x32xf32, #tpu.memory_space<vmem>>, %arg8: memref<1x8x32xf32, #tpu.memory_space<vmem>>) attributes {dimension_semantics = [#tpu.dimension_semantics<parallel>, #tpu.dimension_semantics<parallel>, #tpu.dimension_semantics<arbitrary>], iteration_bounds = array<i64: 1, 1, 1>, scalar_prefetch = 0 : i64, scratch_operands = 1 : i64, tpu.core_type = #tpu.core_type<tc>, window_params = [{transform_indices = @transform_0, window_bounds = array<i64: 8, 16>}, {transform_indices = @transform_1, window_bounds = array<i64: 16, 32>}, {transform_indices = @transform_2, window_bounds = array<i64: 1, 32>}, {transform_indices = @transform_3, window_bounds = array<i64: 8, 32>}, {transform_indices = @transform_4, window_bounds = array<i64: 8, 32>}]} {
    %c0_i32 = arith.constant 0 : i32
    %0 = arith.cmpi eq, %arg2, %c0_i32 : i32
    %1 = arith.extui %0 : i1 to i32
    %c0_i32_0 = arith.constant 0 : i32
    %2 = arith.cmpi ne, %1, %c0_i32_0 : i32
    scf.if %2 {
      %cst_12 = arith.constant 0.000000e+00 : f32
      %15 = vector.broadcast %cst_12 : f32 to vector<1x8x32xf32>
      %c0_13 = arith.constant 0 : index
      %c0_14 = arith.constant 0 : index
      %c0_15 = arith.constant 0 : index
      %16 = vector.load %arg8[%c0_13, %c0_14, %c0_15] : memref<1x8x32xf32, #tpu.memory_space<vmem>>, vector<1x8x32xf32>
      tpu.vector_store %arg8[%c0_13, %c0_14, %c0_15], %15 {strides = array<i32>} : memref<1x8x32xf32, #tpu.memory_space<vmem>>, vector<1x8x32xf32>,
    } else {
    }
    %c0 = arith.constant 0 : index
    %c0_1 = arith.constant 0 : index
    %3 = vector.load %arg3[%c0, %c0_1] : memref<8x16xf32, #tpu.memory_space<vmem>>, vector<8x16xf32>
    %c0_2 = arith.constant 0 : index
    %c0_3 = arith.constant 0 : index
    %c0_4 = arith.constant 0 : index
    %4 = vector.load %arg8[%c0_2, %c0_3, %c0_4] : memref<1x8x32xf32, #tpu.memory_space<vmem>>, vector<1x8x32xf32>
    %5 = vector.shape_cast %4 : vector<1x8x32xf32> to vector<8x32xf32>
    %c0_5 = arith.constant 0 : index
    %c0_6 = arith.constant 0 : index
    %6 = vector.load %arg4[%c0_5, %c0_6] : memref<16x32xf32, #tpu.memory_space<vmem>>, vector<16x32xf32>
    %cst = arith.constant dense<0.000000e+00> : vector<8x32xf32>
    %7 = tpu.matmul %3, %6, %cst {dimension_numbers = #tpu.dot_dimension_numbers<[1], [0], [0], [1], [0, 0, 1, 1], [], []>} : vector<8x16xf32>, vector<16x32xf32>, vector<8x32xf32> -> vector<8x32xf32>
    %8 = arith.addf %5, %7 : vector<8x32xf32>
    %c0_7 = arith.constant 0 : index
    %c0_8 = arith.constant 0 : index
    %c0_9 = arith.constant 0 : index
    %9 = vector.load %arg8[%c0_7, %c0_8, %c0_9] : memref<1x8x32xf32, #tpu.memory_space<vmem>>, vector<1x8x32xf32>
    %10 = vector.shape_cast %9 : vector<1x8x32xf32> to vector<8x32xf32>
    %11 = vector.shape_cast %8 : vector<8x32xf32> to vector<1x8x32xf32>
    tpu.vector_store %arg8[%c0_7, %c0_8, %c0_9], %11 {strides = array<i32>} : memref<1x8x32xf32, #tpu.memory_space<vmem>>, vector<1x8x32xf32>,
    %c0_i32_10 = arith.constant 0 : i32
    %12 = arith.cmpi eq, %arg2, %c0_i32_10 : i32
    %13 = arith.extui %12 : i1 to i32
    %c0_i32_11 = arith.constant 0 : i32
    %14 = arith.cmpi ne, %13, %c0_i32_11 : i32
    scf.if %14 {
      %c0_12 = arith.constant 0 : index
      %c0_13 = arith.constant 0 : index
      %c0_14 = arith.constant 0 : index
      %15 = vector.load %arg8[%c0_12, %c0_13, %c0_14] : memref<1x8x32xf32, #tpu.memory_space<vmem>>, vector<1x8x32xf32>
      %16 = vector.shape_cast %15 : vector<1x8x32xf32> to vector<8x32xf32>
      %c0_15 = arith.constant 0 : index
      %c0_16 = arith.constant 0 : index
      %17 = vector.load %arg5[%c0_15, %c0_16] : memref<1x32xf32, #tpu.memory_space<vmem>>, vector<1x32xf32>
      %18 = vector.broadcast %17 : vector<1x32xf32> to vector<8x32xf32>
      %19 = arith.addf %16, %18 : vector<8x32xf32>
      %c0_17 = arith.constant 0 : index
      %c0_18 = arith.constant 0 : index
      %20 = vector.load %arg6[%c0_17, %c0_18] : memref<8x32xf32, #tpu.memory_space<vmem>>, vector<8x32xf32>
      %21 = arith.addf %19, %20 : vector<8x32xf32>
      %c0_19 = arith.constant 0 : index
      %c0_20 = arith.constant 0 : index
      %22 = vector.load %arg7[%c0_19, %c0_20] : memref<8x32xf32, #tpu.memory_space<vmem>>, vector<8x32xf32>
      tpu.vector_store %arg7[%c0_19, %c0_20], %21 {strides = array<i32>} : memref<8x32xf32, #tpu.memory_space<vmem>>, vector<8x32xf32>,
    } else {
    }
    return
  }
  func.func @transform_0(%arg0: i32, %arg1: i32, %arg2: i32) -> (i32, i32) {
    %c0_i32 = arith.constant 0 : i32
    return %arg0, %arg2 : i32, i32
  }
  func.func @transform_1(%arg0: i32, %arg1: i32, %arg2: i32) -> (i32, i32) {
    %c0_i32 = arith.constant 0 : i32
    return %arg2, %arg1 : i32, i32
  }
  func.func @transform_2(%arg0: i32, %arg1: i32, %arg2: i32) -> (i32, i32) {
    %c0_i32 = arith.constant 0 : i32
    %c0_i32_0 = arith.constant 0 : i32
    return %c0_i32, %arg1 : i32, i32
  }
  func.func @transform_3(%arg0: i32, %arg1: i32, %arg2: i32) -> (i32, i32) {
    %c0_i32 = arith.constant 0 : i32
    %c0_i32_0 = arith.constant 0 : i32
    return %c0_i32, %arg1 : i32, i32
  }
  func.func @transform_4(%arg0: i32, %arg1: i32, %arg2: i32) -> (i32, i32) {
    %c0_i32 = arith.constant 0 : i32
    return %arg0, %arg1 : i32, i32
  }
}

module attributes {stable_mosaic.version = 11 : i64} {
  func.func @_matmul_kernel(%arg0: i32, %arg1: i32, %arg2: i32, %arg3: memref<8x32xf32, #tpu.memory_space<vmem>>, %arg4: memref<32x32xf32, #tpu.memory_space<vmem>>, %arg5: memref<32x32xf32, #tpu.memory_space<vmem>>, %arg6: memref<32x32xf32, #tpu.memory_space<vmem>>, %arg7: memref<1x32xf32, #tpu.memory_space<vmem>>, %arg8: memref<1x32xf32, #tpu.memory_space<vmem>>, %arg9: memref<1x32xf32, #tpu.memory_space<vmem>>, %arg10: memref<8x32xf32, #tpu.memory_space<vmem>>, %arg11: memref<8x32xf32, #tpu.memory_space<vmem>>, %arg12: memref<8x32xf32, #tpu.memory_space<vmem>>, %arg13: memref<3x8x32xf32, #tpu.memory_space<vmem>>) attributes {dimension_semantics = [#tpu.dimension_semantics<parallel>, #tpu.dimension_semantics<parallel>, #tpu.dimension_semantics<arbitrary>], iteration_bounds = array<i64: 1, 1, 1>, scalar_prefetch = 0 : i64, scratch_operands = 1 : i64, tpu.core_type = #tpu.core_type<tc>, window_params = [{transform_indices = @transform_0, window_bounds = array<i64: 8, 32>}, {transform_indices = @transform_1, window_bounds = array<i64: 32, 32>}, {transform_indices = @transform_2, window_bounds = array<i64: 32, 32>}, {transform_indices = @transform_3, window_bounds = array<i64: 32, 32>}, {transform_indices = @transform_4, window_bounds = array<i64: 1, 32>}, {transform_indices = @transform_5, window_bounds = array<i64: 1, 32>}, {transform_indices = @transform_6, window_bounds = array<i64: 1, 32>}, {transform_indices = @transform_7, window_bounds = array<i64: 8, 32>}, {transform_indices = @transform_8, window_bounds = array<i64: 8, 32>}, {transform_indices = @transform_9, window_bounds = array<i64: 8, 32>}]} {
    %c0_i32 = arith.constant 0 : i32
    %0 = arith.cmpi eq, %arg2, %c0_i32 : i32
    %1 = arith.extui %0 : i1 to i32
    %c0_i32_0 = arith.constant 0 : i32
    %2 = arith.cmpi ne, %1, %c0_i32_0 : i32
    scf.if %2 {
      %cst_28 = arith.constant 0.000000e+00 : f32
      %31 = vector.broadcast %cst_28 : f32 to vector<3x8x32xf32>
      %c0_29 = arith.constant 0 : index
      %c0_30 = arith.constant 0 : index
      %c0_31 = arith.constant 0 : index
      %32 = vector.load %arg13[%c0_29, %c0_30, %c0_31] : memref<3x8x32xf32, #tpu.memory_space<vmem>>, vector<3x8x32xf32>
      tpu.vector_store %arg13[%c0_29, %c0_30, %c0_31], %31 {strides = array<i32>} : memref<3x8x32xf32, #tpu.memory_space<vmem>>, vector<3x8x32xf32>,
    } else {
    }
    %c0 = arith.constant 0 : index
    %c0_1 = arith.constant 0 : index
    %3 = vector.load %arg3[%c0, %c0_1] : memref<8x32xf32, #tpu.memory_space<vmem>>, vector<8x32xf32>
    %c0_2 = arith.constant 0 : index
    %c0_3 = arith.constant 0 : index
    %c0_4 = arith.constant 0 : index
    %4 = vector.load %arg13[%c0_2, %c0_3, %c0_4] : memref<3x8x32xf32, #tpu.memory_space<vmem>>, vector<1x8x32xf32>
    %5 = vector.shape_cast %4 : vector<1x8x32xf32> to vector<8x32xf32>
    %c0_5 = arith.constant 0 : index
    %c0_6 = arith.constant 0 : index
    %6 = vector.load %arg4[%c0_5, %c0_6] : memref<32x32xf32, #tpu.memory_space<vmem>>, vector<32x32xf32>
    %cst = arith.constant dense<0.000000e+00> : vector<8x32xf32>
    %7 = tpu.matmul %3, %6, %cst {dimension_numbers = #tpu.dot_dimension_numbers<[1], [0], [0], [1], [0, 0, 1, 1], [], []>} : vector<8x32xf32>, vector<32x32xf32>, vector<8x32xf32> -> vector<8x32xf32>
    %8 = arith.addf %5, %7 : vector<8x32xf32>
    %c0_7 = arith.constant 0 : index
    %c0_8 = arith.constant 0 : index
    %c0_9 = arith.constant 0 : index
    %9 = vector.load %arg13[%c0_7, %c0_8, %c0_9] : memref<3x8x32xf32, #tpu.memory_space<vmem>>, vector<1x8x32xf32>
    %10 = vector.shape_cast %9 : vector<1x8x32xf32> to vector<8x32xf32>
    %11 = vector.shape_cast %8 : vector<8x32xf32> to vector<1x8x32xf32>
    tpu.vector_store %arg13[%c0_7, %c0_8, %c0_9], %11 {strides = array<i32>} : memref<3x8x32xf32, #tpu.memory_space<vmem>>, vector<1x8x32xf32>,
    %c1 = arith.constant 1 : index
    %c0_10 = arith.constant 0 : index
    %c0_11 = arith.constant 0 : index
    %12 = vector.load %arg13[%c1, %c0_10, %c0_11] : memref<3x8x32xf32, #tpu.memory_space<vmem>>, vector<1x8x32xf32>
    %13 = vector.shape_cast %12 : vector<1x8x32xf32> to vector<8x32xf32>
    %c0_12 = arith.constant 0 : index
    %c0_13 = arith.constant 0 : index
    %14 = vector.load %arg5[%c0_12, %c0_13] : memref<32x32xf32, #tpu.memory_space<vmem>>, vector<32x32xf32>
    %cst_14 = arith.constant dense<0.000000e+00> : vector<8x32xf32>
    %15 = tpu.matmul %3, %14, %cst_14 {dimension_numbers = #tpu.dot_dimension_numbers<[1], [0], [0], [1], [0, 0, 1, 1], [], []>} : vector<8x32xf32>, vector<32x32xf32>, vector<8x32xf32> -> vector<8x32xf32>
    %16 = arith.addf %13, %15 : vector<8x32xf32>
    %c1_15 = arith.constant 1 : index
    %c0_16 = arith.constant 0 : index
    %c0_17 = arith.constant 0 : index
    %17 = vector.load %arg13[%c1_15, %c0_16, %c0_17] : memref<3x8x32xf32, #tpu.memory_space<vmem>>, vector<1x8x32xf32>
    %18 = vector.shape_cast %17 : vector<1x8x32xf32> to vector<8x32xf32>
    %19 = vector.shape_cast %16 : vector<8x32xf32> to vector<1x8x32xf32>
    tpu.vector_store %arg13[%c1_15, %c0_16, %c0_17], %19 {strides = array<i32>} : memref<3x8x32xf32, #tpu.memory_space<vmem>>, vector<1x8x32xf32>,
    %c2 = arith.constant 2 : index
    %c0_18 = arith.constant 0 : index
    %c0_19 = arith.constant 0 : index
    %20 = vector.load %arg13[%c2, %c0_18, %c0_19] : memref<3x8x32xf32, #tpu.memory_space<vmem>>, vector<1x8x32xf32>
    %21 = vector.shape_cast %20 : vector<1x8x32xf32> to vector<8x32xf32>
    %c0_20 = arith.constant 0 : index
    %c0_21 = arith.constant 0 : index
    %22 = vector.load %arg6[%c0_20, %c0_21] : memref<32x32xf32, #tpu.memory_space<vmem>>, vector<32x32xf32>
    %cst_22 = arith.constant dense<0.000000e+00> : vector<8x32xf32>
    %23 = tpu.matmul %3, %22, %cst_22 {dimension_numbers = #tpu.dot_dimension_numbers<[1], [0], [0], [1], [0, 0, 1, 1], [], []>} : vector<8x32xf32>, vector<32x32xf32>, vector<8x32xf32> -> vector<8x32xf32>
    %24 = arith.addf %21, %23 : vector<8x32xf32>
    %c2_23 = arith.constant 2 : index
    %c0_24 = arith.constant 0 : index
    %c0_25 = arith.constant 0 : index
    %25 = vector.load %arg13[%c2_23, %c0_24, %c0_25] : memref<3x8x32xf32, #tpu.memory_space<vmem>>, vector<1x8x32xf32>
    %26 = vector.shape_cast %25 : vector<1x8x32xf32> to vector<8x32xf32>
    %27 = vector.shape_cast %24 : vector<8x32xf32> to vector<1x8x32xf32>
    tpu.vector_store %arg13[%c2_23, %c0_24, %c0_25], %27 {strides = array<i32>} : memref<3x8x32xf32, #tpu.memory_space<vmem>>, vector<1x8x32xf32>,
    %c0_i32_26 = arith.constant 0 : i32
    %28 = arith.cmpi eq, %arg2, %c0_i32_26 : i32
    %29 = arith.extui %28 : i1 to i32
    %c0_i32_27 = arith.constant 0 : i32
    %30 = arith.cmpi ne, %29, %c0_i32_27 : i32
    scf.if %30 {
      %c0_28 = arith.constant 0 : index
      %c0_29 = arith.constant 0 : index
      %c0_30 = arith.constant 0 : index
      %31 = vector.load %arg13[%c0_28, %c0_29, %c0_30] : memref<3x8x32xf32, #tpu.memory_space<vmem>>, vector<1x8x32xf32>
      %32 = vector.shape_cast %31 : vector<1x8x32xf32> to vector<8x32xf32>
      %c0_31 = arith.constant 0 : index
      %c0_32 = arith.constant 0 : index
      %33 = vector.load %arg7[%c0_31, %c0_32] : memref<1x32xf32, #tpu.memory_space<vmem>>, vector<1x32xf32>
      %34 = vector.broadcast %33 : vector<1x32xf32> to vector<8x32xf32>
      %35 = arith.addf %32, %34 : vector<8x32xf32>
      %c0_33 = arith.constant 0 : index
      %c0_34 = arith.constant 0 : index
      %36 = vector.load %arg10[%c0_33, %c0_34] : memref<8x32xf32, #tpu.memory_space<vmem>>, vector<8x32xf32>
      tpu.vector_store %arg10[%c0_33, %c0_34], %35 {strides = array<i32>} : memref<8x32xf32, #tpu.memory_space<vmem>>, vector<8x32xf32>,
      %c1_35 = arith.constant 1 : index
      %c0_36 = arith.constant 0 : index
      %c0_37 = arith.constant 0 : index
      %37 = vector.load %arg13[%c1_35, %c0_36, %c0_37] : memref<3x8x32xf32, #tpu.memory_space<vmem>>, vector<1x8x32xf32>
      %38 = vector.shape_cast %37 : vector<1x8x32xf32> to vector<8x32xf32>
      %c0_38 = arith.constant 0 : index
      %c0_39 = arith.constant 0 : index
      %39 = vector.load %arg8[%c0_38, %c0_39] : memref<1x32xf32, #tpu.memory_space<vmem>>, vector<1x32xf32>
      %40 = vector.broadcast %39 : vector<1x32xf32> to vector<8x32xf32>
      %41 = arith.addf %38, %40 : vector<8x32xf32>
      %c0_40 = arith.constant 0 : index
      %c0_41 = arith.constant 0 : index
      %42 = vector.load %arg11[%c0_40, %c0_41] : memref<8x32xf32, #tpu.memory_space<vmem>>, vector<8x32xf32>
      tpu.vector_store %arg11[%c0_40, %c0_41], %41 {strides = array<i32>} : memref<8x32xf32, #tpu.memory_space<vmem>>, vector<8x32xf32>,
      %c2_42 = arith.constant 2 : index
      %c0_43 = arith.constant 0 : index
      %c0_44 = arith.constant 0 : index
      %43 = vector.load %arg13[%c2_42, %c0_43, %c0_44] : memref<3x8x32xf32, #tpu.memory_space<vmem>>, vector<1x8x32xf32>
      %44 = vector.shape_cast %43 : vector<1x8x32xf32> to vector<8x32xf32>
      %c0_45 = arith.constant 0 : index
      %c0_46 = arith.constant 0 : index
      %45 = vector.load %arg9[%c0_45, %c0_46] : memref<1x32xf32, #tpu.memory_space<vmem>>, vector<1x32xf32>
      %46 = vector.broadcast %45 : vector<1x32xf32> to vector<8x32xf32>
      %47 = arith.addf %44, %46 : vector<8x32xf32>
      %c0_47 = arith.constant 0 : index
      %c0_48 = arith.constant 0 : index
      %48 = vector.load %arg12[%c0_47, %c0_48] : memref<8x32xf32, #tpu.memory_space<vmem>>, vector<8x32xf32>
      tpu.vector_store %arg12[%c0_47, %c0_48], %47 {strides = array<i32>} : memref<8x32xf32, #tpu.memory_space<vmem>>, vector<8x32xf32>,
    } else {
    }
    return
  }
  func.func @transform_0(%arg0: i32, %arg1: i32, %arg2: i32) -> (i32, i32) {
    %c0_i32 = arith.constant 0 : i32
    return %arg0, %arg2 : i32, i32
  }
  func.func @transform_1(%arg0: i32, %arg1: i32, %arg2: i32) -> (i32, i32) {
    %c0_i32 = arith.constant 0 : i32
    return %arg2, %arg1 : i32, i32
  }
  func.func @transform_2(%arg0: i32, %arg1: i32, %arg2: i32) -> (i32, i32) {
    %c0_i32 = arith.constant 0 : i32
    return %arg2, %arg1 : i32, i32
  }
  func.func @transform_3(%arg0: i32, %arg1: i32, %arg2: i32) -> (i32, i32) {
    %c0_i32 = arith.constant 0 : i32
    return %arg2, %arg1 : i32, i32
  }
  func.func @transform_4(%arg0: i32, %arg1: i32, %arg2: i32) -> (i32, i32) {
    %c0_i32 = arith.constant 0 : i32
    %c0_i32_0 = arith.constant 0 : i32
    return %c0_i32, %arg1 : i32, i32
  }
  func.func @transform_5(%arg0: i32, %arg1: i32, %arg2: i32) -> (i32, i32) {
    %c0_i32 = arith.constant 0 : i32
    %c0_i32_0 = arith.constant 0 : i32
    return %c0_i32, %arg1 : i32, i32
  }
  func.func @transform_6(%arg0: i32, %arg1: i32, %arg2: i32) -> (i32, i32) {
    %c0_i32 = arith.constant 0 : i32
    %c0_i32_0 = arith.constant 0 : i32
    return %c0_i32, %arg1 : i32, i32
  }
  func.func @transform_7(%arg0: i32, %arg1: i32, %arg2: i32) -> (i32, i32) {
    %c0_i32 = arith.constant 0 : i32
    return %arg0, %arg1 : i32, i32
  }
  func.func @transform_8(%arg0: i32, %arg1: i32, %arg2: i32) -> (i32, i32) {
    %c0_i32 = arith.constant 0 : i32
    return %arg0, %arg1 : i32, i32
  }
  func.func @transform_9(%arg0: i32, %arg1: i32, %arg2: i32) -> (i32, i32) {
    %c0_i32 = arith.constant 0 : i32
    return %arg0, %arg1 : i32, i32
  }
}

module attributes {stable_mosaic.version = 11 : i64} {
  func.func @_matmul_kernel(%arg0: i32, %arg1: i32, %arg2: i32, %arg3: memref<8x32xf32, #tpu.memory_space<vmem>>, %arg4: memref<32x32xf32, #tpu.memory_space<vmem>>, %arg5: memref<1x32xf32, #tpu.memory_space<vmem>>, %arg6: memref<8x32xf32, #tpu.memory_space<vmem>>, %arg7: memref<1x32xf32, #tpu.memory_space<vmem>>, %arg8: memref<1x32xf32, #tpu.memory_space<vmem>>, %arg9: memref<8x32xf32, #tpu.memory_space<vmem>>, %arg10: memref<1x8x32xf32, #tpu.memory_space<vmem>>) attributes {dimension_semantics = [#tpu.dimension_semantics<parallel>, #tpu.dimension_semantics<parallel>, #tpu.dimension_semantics<arbitrary>], iteration_bounds = array<i64: 1, 1, 1>, scalar_prefetch = 0 : i64, scratch_operands = 1 : i64, tpu.core_type = #tpu.core_type<tc>, window_params = [{transform_indices = @transform_0, window_bounds = array<i64: 8, 32>}, {transform_indices = @transform_1, window_bounds = array<i64: 32, 32>}, {transform_indices = @transform_2, window_bounds = array<i64: 1, 32>}, {transform_indices = @transform_3, window_bounds = array<i64: 8, 32>}, {transform_indices = @transform_4, window_bounds = array<i64: 1, 32>}, {transform_indices = @transform_5, window_bounds = array<i64: 1, 32>}, {transform_indices = @transform_6, window_bounds = array<i64: 8, 32>}]} {
    %c0_i32 = arith.constant 0 : i32
    %0 = arith.cmpi eq, %arg2, %c0_i32 : i32
    %1 = arith.extui %0 : i1 to i32
    %c0_i32_0 = arith.constant 0 : i32
    %2 = arith.cmpi ne, %1, %c0_i32_0 : i32
    scf.if %2 {
      %cst_12 = arith.constant 0.000000e+00 : f32
      %15 = vector.broadcast %cst_12 : f32 to vector<1x8x32xf32>
      %c0_13 = arith.constant 0 : index
      %c0_14 = arith.constant 0 : index
      %c0_15 = arith.constant 0 : index
      %16 = vector.load %arg10[%c0_13, %c0_14, %c0_15] : memref<1x8x32xf32, #tpu.memory_space<vmem>>, vector<1x8x32xf32>
      tpu.vector_store %arg10[%c0_13, %c0_14, %c0_15], %15 {strides = array<i32>} : memref<1x8x32xf32, #tpu.memory_space<vmem>>, vector<1x8x32xf32>,
    } else {
    }
    %c0 = arith.constant 0 : index
    %c0_1 = arith.constant 0 : index
    %3 = vector.load %arg3[%c0, %c0_1] : memref<8x32xf32, #tpu.memory_space<vmem>>, vector<8x32xf32>
    %c0_2 = arith.constant 0 : index
    %c0_3 = arith.constant 0 : index
    %c0_4 = arith.constant 0 : index
    %4 = vector.load %arg10[%c0_2, %c0_3, %c0_4] : memref<1x8x32xf32, #tpu.memory_space<vmem>>, vector<1x8x32xf32>
    %5 = vector.shape_cast %4 : vector<1x8x32xf32> to vector<8x32xf32>
    %c0_5 = arith.constant 0 : index
    %c0_6 = arith.constant 0 : index
    %6 = vector.load %arg4[%c0_5, %c0_6] : memref<32x32xf32, #tpu.memory_space<vmem>>, vector<32x32xf32>
    %cst = arith.constant dense<0.000000e+00> : vector<8x32xf32>
    %7 = tpu.matmul %3, %6, %cst {dimension_numbers = #tpu.dot_dimension_numbers<[1], [0], [0], [1], [0, 0, 1, 1], [], []>} : vector<8x32xf32>, vector<32x32xf32>, vector<8x32xf32> -> vector<8x32xf32>
    %8 = arith.addf %5, %7 : vector<8x32xf32>
    %c0_7 = arith.constant 0 : index
    %c0_8 = arith.constant 0 : index
    %c0_9 = arith.constant 0 : index
    %9 = vector.load %arg10[%c0_7, %c0_8, %c0_9] : memref<1x8x32xf32, #tpu.memory_space<vmem>>, vector<1x8x32xf32>
    %10 = vector.shape_cast %9 : vector<1x8x32xf32> to vector<8x32xf32>
    %11 = vector.shape_cast %8 : vector<8x32xf32> to vector<1x8x32xf32>
    tpu.vector_store %arg10[%c0_7, %c0_8, %c0_9], %11 {strides = array<i32>} : memref<1x8x32xf32, #tpu.memory_space<vmem>>, vector<1x8x32xf32>,
    %c0_i32_10 = arith.constant 0 : i32
    %12 = arith.cmpi eq, %arg2, %c0_i32_10 : i32
    %13 = arith.extui %12 : i1 to i32
    %c0_i32_11 = arith.constant 0 : i32
    %14 = arith.cmpi ne, %13, %c0_i32_11 : i32
    scf.if %14 {
      %c0_12 = arith.constant 0 : index
      %c0_13 = arith.constant 0 : index
      %c0_14 = arith.constant 0 : index
      %15 = vector.load %arg10[%c0_12, %c0_13, %c0_14] : memref<1x8x32xf32, #tpu.memory_space<vmem>>, vector<1x8x32xf32>
      %16 = vector.shape_cast %15 : vector<1x8x32xf32> to vector<8x32xf32>
      %c0_15 = arith.constant 0 : index
      %c0_16 = arith.constant 0 : index
      %17 = vector.load %arg5[%c0_15, %c0_16] : memref<1x32xf32, #tpu.memory_space<vmem>>, vector<1x32xf32>
      %18 = vector.broadcast %17 : vector<1x32xf32> to vector<8x32xf32>
      %19 = arith.addf %16, %18 : vector<8x32xf32>
      %c0_17 = arith.constant 0 : index
      %c0_18 = arith.constant 0 : index
      %20 = vector.load %arg6[%c0_17, %c0_18] : memref<8x32xf32, #tpu.memory_space<vmem>>, vector<8x32xf32>
      %21 = arith.addf %19, %20 : vector<8x32xf32>
      %cst_19 = arith.constant dense<0.000000e+00> : vector<8xf32>
      %22 = vector.multi_reduction <add>, %21, %cst_19 [1] : vector<8x32xf32> to vector<8xf32>
      %23 = vector.shape_cast %22 : vector<8xf32> to vector<8x1xf32>
      %cst_20 = arith.constant 3.200000e+01 : f32
      %24 = vector.broadcast %cst_20 : f32 to vector<8x1xf32>
      %25 = arith.divf %23, %24 : vector<8x1xf32>
      %26 = vector.broadcast %25 : vector<8x1xf32> to vector<8x32xf32>
      %27 = arith.subf %21, %26 : vector<8x32xf32>
      %28 = arith.mulf %27, %27 : vector<8x32xf32>
      %cst_21 = arith.constant dense<0.000000e+00> : vector<8xf32>
      %29 = vector.multi_reduction <add>, %28, %cst_21 [1] : vector<8x32xf32> to vector<8xf32>
      %30 = vector.shape_cast %29 : vector<8xf32> to vector<8x1xf32>
      %cst_22 = arith.constant 3.200000e+01 : f32
      %31 = vector.broadcast %cst_22 : f32 to vector<8x1xf32>
      %32 = arith.divf %30, %31 : vector<8x1xf32>
      %33 = vector.broadcast %25 : vector<8x1xf32> to vector<8x32xf32>
      %34 = arith.subf %21, %33 : vector<8x32xf32>
      %cst_23 = arith.constant 9.99999997E-7 : f32
      %35 = vector.broadcast %cst_23 : f32 to vector<8x1xf32>
      %36 = arith.addf %32, %35 : vector<8x1xf32>
      %37 = math.rsqrt %36 : vector<8x1xf32>
      %38 = vector.broadcast %37 : vector<8x1xf32> to vector<8x32xf32>
      %39 = arith.mulf %34, %38 : vector<8x32xf32>
      %c0_24 = arith.constant 0 : index
      %c0_25 = arith.constant 0 : index
      %40 = vector.load %arg7[%c0_24, %c0_25] : memref<1x32xf32, #tpu.memory_space<vmem>>, vector<1x32xf32>
      %41 = vector.broadcast %40 : vector<1x32xf32> to vector<8x32xf32>
      %42 = arith.mulf %39, %41 : vector<8x32xf32>
      %c0_26 = arith.constant 0 : index
      %c0_27 = arith.constant 0 : index
      %43 = vector.load %arg8[%c0_26, %c0_27] : memref<1x32xf32, #tpu.memory_space<vmem>>, vector<1x32xf32>
      %44 = vector.broadcast %43 : vector<1x32xf32> to vector<8x32xf32>
      %45 = arith.addf %42, %44 : vector<8x32xf32>
      %c0_28 = arith.constant 0 : index
      %c0_29 = arith.constant 0 : index
      %46 = vector.load %arg9[%c0_28, %c0_29] : memref<8x32xf32, #tpu.memory_space<vmem>>, vector<8x32xf32>
      tpu.vector_store %arg9[%c0_28, %c0_29], %45 {strides = array<i32>} : memref<8x32xf32, #tpu.memory_space<vmem>>, vector<8x32xf32>,
    } else {
    }
    return
  }
  func.func @transform_0(%arg0: i32, %arg1: i32, %arg2: i32) -> (i32, i32) {
    %c0_i32 = arith.constant 0 : i32
    return %arg0, %arg2 : i32, i32
  }
  func.func @transform_1(%arg0: i32, %arg1: i32, %arg2: i32) -> (i32, i32) {
    %c0_i32 = arith.constant 0 : i32
    return %arg2, %arg1 : i32, i32
  }
  func.func @transform_2(%arg0: i32, %arg1: i32, %arg2: i32) -> (i32, i32) {
    %c0_i32 = arith.constant 0 : i32
    %c0_i32_0 = arith.constant 0 : i32
    return %c0_i32, %arg1 : i32, i32
  }
  func.func @transform_3(%arg0: i32, %arg1: i32, %arg2: i32) -> (i32, i32) {
    %c0_i32 = arith.constant 0 : i32
    return %arg0, %arg1 : i32, i32
  }
  func.func @transform_4(%arg0: i32, %arg1: i32, %arg2: i32) -> (i32, i32) {
    %c0_i32 = arith.constant 0 : i32
    %c0_i32_0 = arith.constant 0 : i32
    return %c0_i32, %arg1 : i32, i32
  }
  func.func @transform_5(%arg0: i32, %arg1: i32, %arg2: i32) -> (i32, i32) {
    %c0_i32 = arith.constant 0 : i32
    %c0_i32_0 = arith.constant 0 : i32
    return %c0_i32, %arg1 : i32, i32
  }
  func.func @transform_6(%arg0: i32, %arg1: i32, %arg2: i32) -> (i32, i32) {
    %c0_i32 = arith.constant 0 : i32
    return %arg0, %arg1 : i32, i32
  }
}

module attributes {stable_mosaic.version = 11 : i64} {
  func.func @_flash_attn_kernel(%arg0: i32, %arg1: i32, %arg2: i32, %arg3: memref<1x4x32xf32, #tpu.memory_space<vmem>>, %arg4: memref<1x4x32xf32, #tpu.memory_space<vmem>>, %arg5: memref<1x4x32xf32, #tpu.memory_space<vmem>>, %arg6: memref<1x1x4xf32, #tpu.memory_space<vmem>>, %arg7: memref<1x4x32xf32, #tpu.memory_space<vmem>>, %arg8: memref<4x4x1xf32, #tpu.memory_space<vmem>>, %arg9: memref<4x4x1xf32, #tpu.memory_space<vmem>>, %arg10: memref<4x4x8xf32, #tpu.memory_space<vmem>>) attributes {dimension_semantics = [#tpu.dimension_semantics<parallel>, #tpu.dimension_semantics<parallel>, #tpu.dimension_semantics<arbitrary>], iteration_bounds = array<i64: 2, 1, 1>, scalar_prefetch = 0 : i64, scratch_operands = 3 : i64, tpu.core_type = #tpu.core_type<tc>, window_params = [{transform_indices = @transform_0, window_bounds = array<i64: 1, 4, 32>}, {transform_indices = @transform_1, window_bounds = array<i64: 1, 4, 32>}, {transform_indices = @transform_2, window_bounds = array<i64: 1, 4, 32>}, {transform_indices = @transform_3, window_bounds = array<i64: 1, 1, 4>}, {transform_indices = @transform_4, window_bounds = array<i64: 1, 4, 32>}]} {
    %c0_i32 = arith.constant 0 : i32
    %0 = arith.cmpi eq, %arg2, %c0_i32 : i32
    %1 = arith.extui %0 : i1 to i32
    %c0_i32_0 = arith.constant 0 : i32
    %2 = arith.cmpi ne, %1, %c0_i32_0 : i32
    scf.if %2 {
      %cst_102 = arith.constant 0xFF800000 : f32
      %170 = vector.broadcast %cst_102 : f32 to vector<4x4x1xf32>
      %c0_103 = arith.constant 0 : index
      %c0_104 = arith.constant 0 : index
      %c0_105 = arith.constant 0 : index
      %171 = vector.load %arg8[%c0_103, %c0_104, %c0_105] : memref<4x4x1xf32, #tpu.memory_space<vmem>>, vector<4x4x1xf32>
      tpu.vector_store %arg8[%c0_103, %c0_104, %c0_105], %170 {strides = array<i32>} : memref<4x4x1xf32, #tpu.memory_space<vmem>>, vector<4x4x1xf32>,
      %cst_106 = arith.constant 0.000000e+00 : f32
      %172 = vector.broadcast %cst_106 : f32 to vector<4x4x1xf32>
      %c0_107 = arith.constant 0 : index
      %c0_108 = arith.constant 0 : index
      %c0_109 = arith.constant 0 : index
      %173 = vector.load %arg9[%c0_107, %c0_108, %c0_109] : memref<4x4x1xf32, #tpu.memory_space<vmem>>, vector<4x4x1xf32>
      tpu.vector_store %arg9[%c0_107, %c0_108, %c0_109], %172 {strides = array<i32>} : memref<4x4x1xf32, #tpu.memory_space<vmem>>, vector<4x4x1xf32>,
      %cst_110 = arith.constant 0.000000e+00 : f32
      %174 = vector.broadcast %cst_110 : f32 to vector<4x4x8xf32>
      %c0_111 = arith.constant 0 : index
      %c0_112 = arith.constant 0 : index
      %c0_113 = arith.constant 0 : index
      %175 = vector.load %arg10[%c0_111, %c0_112, %c0_113] : memref<4x4x8xf32, #tpu.memory_space<vmem>>, vector<4x4x8xf32>
      tpu.vector_store %arg10[%c0_111, %c0_112, %c0_113], %174 {strides = array<i32>} : memref<4x4x8xf32, #tpu.memory_space<vmem>>, vector<4x4x8xf32>,
    } else {
    }
    %c0 = arith.constant 0 : index
    %c0_1 = arith.constant 0 : index
    %c0_2 = arith.constant 0 : index
    %3 = vector.load %arg3[%c0, %c0_1, %c0_2] : memref<1x4x32xf32, #tpu.memory_space<vmem>>, vector<1x4x32xf32>
    %4 = vector.shape_cast %3 : vector<1x4x32xf32> to vector<4x32xf32>
    %c0_3 = arith.constant 0 : index
    %c0_4 = arith.constant 0 : index
    %c0_5 = arith.constant 0 : index
    %5 = vector.load %arg4[%c0_3, %c0_4, %c0_5] : memref<1x4x32xf32, #tpu.memory_space<vmem>>, vector<1x4x32xf32>
    %6 = vector.shape_cast %5 : vector<1x4x32xf32> to vector<4x32xf32>
    %c0_6 = arith.constant 0 : index
    %c0_7 = arith.constant 0 : index
    %c0_8 = arith.constant 0 : index
    %7 = vector.load %arg5[%c0_6, %c0_7, %c0_8] : memref<1x4x32xf32, #tpu.memory_space<vmem>>, vector<1x4x32xf32>
    %8 = vector.shape_cast %7 : vector<1x4x32xf32> to vector<4x32xf32>
    %c0_9 = arith.constant 0 : index
    %c0_10 = arith.constant 0 : index
    %c0_11 = arith.constant 0 : index
    %9 = vector.load %arg6[%c0_9, %c0_10, %c0_11] : memref<1x1x4xf32, #tpu.memory_space<vmem>>, vector<1x1x4xf32>
    %10 = vector.shape_cast %9 : vector<1x1x4xf32> to vector<1x4xf32>
    %11 = vector.extract_strided_slice %4 {offsets = [0, 0], sizes = [4, 8], strides = [1, 1]} : vector<4x32xf32> to vector<4x8xf32>
    %12 = vector.extract_strided_slice %6 {offsets = [0, 0], sizes = [4, 8], strides = [1, 1]} : vector<4x32xf32> to vector<4x8xf32>
    %13 = vector.extract_strided_slice %8 {offsets = [0, 0], sizes = [4, 8], strides = [1, 1]} : vector<4x32xf32> to vector<4x8xf32>
    %cst = arith.constant dense<0.000000e+00> : vector<4x4xf32>
    %14 = tpu.matmul %11, %12, %cst {dimension_numbers = #tpu.dot_dimension_numbers<[1], [1], [0], [0], [0, 0, 1, 0], [], []>} : vector<4x8xf32>, vector<4x8xf32>, vector<4x4xf32> -> vector<4x4xf32>
    %cst_12 = arith.constant 0.353553385 : f32
    %15 = vector.broadcast %cst_12 : f32 to vector<4x4xf32>
    %16 = arith.mulf %14, %15 : vector<4x4xf32>
    %17 = vector.broadcast %10 : vector<1x4xf32> to vector<4x4xf32>
    %18 = arith.addf %16, %17 : vector<4x4xf32>
    %c0_13 = arith.constant 0 : index
    %c0_14 = arith.constant 0 : index
    %c0_15 = arith.constant 0 : index
    %19 = vector.load %arg8[%c0_13, %c0_14, %c0_15] : memref<4x4x1xf32, #tpu.memory_space<vmem>>, vector<1x4x1xf32>
    %20 = vector.shape_cast %19 : vector<1x4x1xf32> to vector<4x1xf32>
    %cst_16 = arith.constant dense<0xFF800000> : vector<4xf32>
    %21 = vector.multi_reduction <maximumf>, %18, %cst_16 [1] : vector<4x4xf32> to vector<4xf32>
    %22 = vector.shape_cast %21 : vector<4xf32> to vector<4x1xf32>
    %23 = arith.maximumf %20, %22 : vector<4x1xf32>
    %24 = arith.subf %20, %23 : vector<4x1xf32>
    %25 = math.exp %24 : vector<4x1xf32>
    %26 = vector.broadcast %23 : vector<4x1xf32> to vector<4x4xf32>
    %27 = arith.subf %18, %26 : vector<4x4xf32>
    %28 = math.exp %27 : vector<4x4xf32>
    %c0_17 = arith.constant 0 : index
    %c0_18 = arith.constant 0 : index
    %c0_19 = arith.constant 0 : index
    %29 = vector.load %arg9[%c0_17, %c0_18, %c0_19] : memref<4x4x1xf32, #tpu.memory_space<vmem>>, vector<1x4x1xf32>
    %30 = vector.shape_cast %29 : vector<1x4x1xf32> to vector<4x1xf32>
    %31 = arith.mulf %25, %30 : vector<4x1xf32>
    %cst_20 = arith.constant dense<0.000000e+00> : vector<4xf32>
    %32 = vector.multi_reduction <add>, %28, %cst_20 [1] : vector<4x4xf32> to vector<4xf32>
    %33 = vector.shape_cast %32 : vector<4xf32> to vector<4x1xf32>
    %34 = arith.addf %31, %33 : vector<4x1xf32>
    %c0_21 = arith.constant 0 : index
    %c0_22 = arith.constant 0 : index
    %c0_23 = arith.constant 0 : index
    %35 = vector.load %arg9[%c0_21, %c0_22, %c0_23] : memref<4x4x1xf32, #tpu.memory_space<vmem>>, vector<1x4x1xf32>
    %36 = vector.shape_cast %35 : vector<1x4x1xf32> to vector<4x1xf32>
    %37 = vector.shape_cast %34 : vector<4x1xf32> to vector<1x4x1xf32>
    tpu.vector_store %arg9[%c0_21, %c0_22, %c0_23], %37 {strides = array<i32>} : memref<4x4x1xf32, #tpu.memory_space<vmem>>, vector<1x4x1xf32>,
    %c0_24 = arith.constant 0 : index
    %c0_25 = arith.constant 0 : index
    %c0_26 = arith.constant 0 : index
    %38 = vector.load %arg10[%c0_24, %c0_25, %c0_26] : memref<4x4x8xf32, #tpu.memory_space<vmem>>, vector<1x4x8xf32>
    %39 = vector.shape_cast %38 : vector<1x4x8xf32> to vector<4x8xf32>
    %40 = vector.broadcast %25 : vector<4x1xf32> to vector<4x8xf32>
    %41 = arith.mulf %40, %39 : vector<4x8xf32>
    %cst_27 = arith.constant dense<0.000000e+00> : vector<4x8xf32>
    %42 = tpu.matmul %28, %13, %cst_27 {dimension_numbers = #tpu.dot_dimension_numbers<[1], [0], [0], [1], [0, 0, 1, 1], [], []>} : vector<4x4xf32>, vector<4x8xf32>, vector<4x8xf32> -> vector<4x8xf32>
    %43 = arith.addf %41, %42 : vector<4x8xf32>
    %c0_28 = arith.constant 0 : index
    %c0_29 = arith.constant 0 : index
    %c0_30 = arith.constant 0 : index
    %44 = vector.load %arg10[%c0_28, %c0_29, %c0_30] : memref<4x4x8xf32, #tpu.memory_space<vmem>>, vector<1x4x8xf32>
    %45 = vector.shape_cast %44 : vector<1x4x8xf32> to vector<4x8xf32>
    %46 = vector.shape_cast %43 : vector<4x8xf32> to vector<1x4x8xf32>
    tpu.vector_store %arg10[%c0_28, %c0_29, %c0_30], %46 {strides = array<i32>} : memref<4x4x8xf32, #tpu.memory_space<vmem>>, vector<1x4x8xf32>,
    %c0_31 = arith.constant 0 : index
    %c0_32 = arith.constant 0 : index
    %c0_33 = arith.constant 0 : index
    %47 = vector.load %arg8[%c0_31, %c0_32, %c0_33] : memref<4x4x1xf32, #tpu.memory_space<vmem>>, vector<1x4x1xf32>
    %48 = vector.shape_cast %47 : vector<1x4x1xf32> to vector<4x1xf32>
    %49 = vector.shape_cast %23 : vector<4x1xf32> to vector<1x4x1xf32>
    tpu.vector_store %arg8[%c0_31, %c0_32, %c0_33], %49 {strides = array<i32>} : memref<4x4x1xf32, #tpu.memory_space<vmem>>, vector<1x4x1xf32>,
    %50 = vector.extract_strided_slice %4 {offsets = [0, 8], sizes = [4, 8], strides = [1, 1]} : vector<4x32xf32> to vector<4x8xf32>
    %51 = vector.extract_strided_slice %6 {offsets = [0, 8], sizes = [4, 8], strides = [1, 1]} : vector<4x32xf32> to vector<4x8xf32>
    %52 = vector.extract_strided_slice %8 {offsets = [0, 8], sizes = [4, 8], strides = [1, 1]} : vector<4x32xf32> to vector<4x8xf32>
    %cst_34 = arith.constant dense<0.000000e+00> : vector<4x4xf32>
    %53 = tpu.matmul %50, %51, %cst_34 {dimension_numbers = #tpu.dot_dimension_numbers<[1], [1], [0], [0], [0, 0, 1, 0], [], []>} : vector<4x8xf32>, vector<4x8xf32>, vector<4x4xf32> -> vector<4x4xf32>
    %cst_35 = arith.constant 0.353553385 : f32
    %54 = vector.broadcast %cst_35 : f32 to vector<4x4xf32>
    %55 = arith.mulf %53, %54 : vector<4x4xf32>
    %56 = vector.broadcast %10 : vector<1x4xf32> to vector<4x4xf32>
    %57 = arith.addf %55, %56 : vector<4x4xf32>
    %c1 = arith.constant 1 : index
    %c0_36 = arith.constant 0 : index
    %c0_37 = arith.constant 0 : index
    %58 = vector.load %arg8[%c1, %c0_36, %c0_37] : memref<4x4x1xf32, #tpu.memory_space<vmem>>, vector<1x4x1xf32>
    %59 = vector.shape_cast %58 : vector<1x4x1xf32> to vector<4x1xf32>
    %cst_38 = arith.constant dense<0xFF800000> : vector<4xf32>
    %60 = vector.multi_reduction <maximumf>, %57, %cst_38 [1] : vector<4x4xf32> to vector<4xf32>
    %61 = vector.shape_cast %60 : vector<4xf32> to vector<4x1xf32>
    %62 = arith.maximumf %59, %61 : vector<4x1xf32>
    %63 = arith.subf %59, %62 : vector<4x1xf32>
    %64 = math.exp %63 : vector<4x1xf32>
    %65 = vector.broadcast %62 : vector<4x1xf32> to vector<4x4xf32>
    %66 = arith.subf %57, %65 : vector<4x4xf32>
    %67 = math.exp %66 : vector<4x4xf32>
    %c1_39 = arith.constant 1 : index
    %c0_40 = arith.constant 0 : index
    %c0_41 = arith.constant 0 : index
    %68 = vector.load %arg9[%c1_39, %c0_40, %c0_41] : memref<4x4x1xf32, #tpu.memory_space<vmem>>, vector<1x4x1xf32>
    %69 = vector.shape_cast %68 : vector<1x4x1xf32> to vector<4x1xf32>
    %70 = arith.mulf %64, %69 : vector<4x1xf32>
    %cst_42 = arith.constant dense<0.000000e+00> : vector<4xf32>
    %71 = vector.multi_reduction <add>, %67, %cst_42 [1] : vector<4x4xf32> to vector<4xf32>
    %72 = vector.shape_cast %71 : vector<4xf32> to vector<4x1xf32>
    %73 = arith.addf %70, %72 : vector<4x1xf32>
    %c1_43 = arith.constant 1 : index
    %c0_44 = arith.constant 0 : index
    %c0_45 = arith.constant 0 : index
    %74 = vector.load %arg9[%c1_43, %c0_44, %c0_45] : memref<4x4x1xf32, #tpu.memory_space<vmem>>, vector<1x4x1xf32>
    %75 = vector.shape_cast %74 : vector<1x4x1xf32> to vector<4x1xf32>
    %76 = vector.shape_cast %73 : vector<4x1xf32> to vector<1x4x1xf32>
    tpu.vector_store %arg9[%c1_43, %c0_44, %c0_45], %76 {strides = array<i32>} : memref<4x4x1xf32, #tpu.memory_space<vmem>>, vector<1x4x1xf32>,
    %c1_46 = arith.constant 1 : index
    %c0_47 = arith.constant 0 : index
    %c0_48 = arith.constant 0 : index
    %77 = vector.load %arg10[%c1_46, %c0_47, %c0_48] : memref<4x4x8xf32, #tpu.memory_space<vmem>>, vector<1x4x8xf32>
    %78 = vector.shape_cast %77 : vector<1x4x8xf32> to vector<4x8xf32>
    %79 = vector.broadcast %64 : vector<4x1xf32> to vector<4x8xf32>
    %80 = arith.mulf %79, %78 : vector<4x8xf32>
    %cst_49 = arith.constant dense<0.000000e+00> : vector<4x8xf32>
    %81 = tpu.matmul %67, %52, %cst_49 {dimension_numbers = #tpu.dot_dimension_numbers<[1], [0], [0], [1], [0, 0, 1, 1], [], []>} : vector<4x4xf32>, vector<4x8xf32>, vector<4x8xf32> -> vector<4x8xf32>
    %82 = arith.addf %80, %81 : vector<4x8xf32>
    %c1_50 = arith.constant 1 : index
    %c0_51 = arith.constant 0 : index
    %c0_52 = arith.constant 0 : index
    %83 = vector.load %arg10[%c1_50, %c0_51, %c0_52] : memref<4x4x8xf32, #tpu.memory_space<vmem>>, vector<1x4x8xf32>
    %84 = vector.shape_cast %83 : vector<1x4x8xf32> to vector<4x8xf32>
    %85 = vector.shape_cast %82 : vector<4x8xf32> to vector<1x4x8xf32>
    tpu.vector_store %arg10[%c1_50, %c0_51, %c0_52], %85 {strides = array<i32>} : memref<4x4x8xf32, #tpu.memory_space<vmem>>, vector<1x4x8xf32>,
    %c1_53 = arith.constant 1 : index
    %c0_54 = arith.constant 0 : index
    %c0_55 = arith.constant 0 : index
    %86 = vector.load %arg8[%c1_53, %c0_54, %c0_55] : memref<4x4x1xf32, #tpu.memory_space<vmem>>, vector<1x4x1xf32>
    %87 = vector.shape_cast %86 : vector<1x4x1xf32> to vector<4x1xf32>
    %88 = vector.shape_cast %62 : vector<4x1xf32> to vector<1x4x1xf32>
    tpu.vector_store %arg8[%c1_53, %c0_54, %c0_55], %88 {strides = array<i32>} : memref<4x4x1xf32, #tpu.memory_space<vmem>>, vector<1x4x1xf32>,
    %89 = vector.extract_strided_slice %4 {offsets = [0, 16], sizes = [4, 8], strides = [1, 1]} : vector<4x32xf32> to vector<4x8xf32>
    %90 = vector.extract_strided_slice %6 {offsets = [0, 16], sizes = [4, 8], strides = [1, 1]} : vector<4x32xf32> to vector<4x8xf32>
    %91 = vector.extract_strided_slice %8 {offsets = [0, 16], sizes = [4, 8], strides = [1, 1]} : vector<4x32xf32> to vector<4x8xf32>
    %cst_56 = arith.constant dense<0.000000e+00> : vector<4x4xf32>
    %92 = tpu.matmul %89, %90, %cst_56 {dimension_numbers = #tpu.dot_dimension_numbers<[1], [1], [0], [0], [0, 0, 1, 0], [], []>} : vector<4x8xf32>, vector<4x8xf32>, vector<4x4xf32> -> vector<4x4xf32>
    %cst_57 = arith.constant 0.353553385 : f32
    %93 = vector.broadcast %cst_57 : f32 to vector<4x4xf32>
    %94 = arith.mulf %92, %93 : vector<4x4xf32>
    %95 = vector.broadcast %10 : vector<1x4xf32> to vector<4x4xf32>
    %96 = arith.addf %94, %95 : vector<4x4xf32>
    %c2 = arith.constant 2 : index
    %c0_58 = arith.constant 0 : index
    %c0_59 = arith.constant 0 : index
    %97 = vector.load %arg8[%c2, %c0_58, %c0_59] : memref<4x4x1xf32, #tpu.memory_space<vmem>>, vector<1x4x1xf32>
    %98 = vector.shape_cast %97 : vector<1x4x1xf32> to vector<4x1xf32>
    %cst_60 = arith.constant dense<0xFF800000> : vector<4xf32>
    %99 = vector.multi_reduction <maximumf>, %96, %cst_60 [1] : vector<4x4xf32> to vector<4xf32>
    %100 = vector.shape_cast %99 : vector<4xf32> to vector<4x1xf32>
    %101 = arith.maximumf %98, %100 : vector<4x1xf32>
    %102 = arith.subf %98, %101 : vector<4x1xf32>
    %103 = math.exp %102 : vector<4x1xf32>
    %104 = vector.broadcast %101 : vector<4x1xf32> to vector<4x4xf32>
    %105 = arith.subf %96, %104 : vector<4x4xf32>
    %106 = math.exp %105 : vector<4x4xf32>
    %c2_61 = arith.constant 2 : index
    %c0_62 = arith.constant 0 : index
    %c0_63 = arith.constant 0 : index
    %107 = vector.load %arg9[%c2_61, %c0_62, %c0_63] : memref<4x4x1xf32, #tpu.memory_space<vmem>>, vector<1x4x1xf32>
    %108 = vector.shape_cast %107 : vector<1x4x1xf32> to vector<4x1xf32>
    %109 = arith.mulf %103, %108 : vector<4x1xf32>
    %cst_64 = arith.constant dense<0.000000e+00> : vector<4xf32>
    %110 = vector.multi_reduction <add>, %106, %cst_64 [1] : vector<4x4xf32> to vector<4xf32>
    %111 = vector.shape_cast %110 : vector<4xf32> to vector<4x1xf32>
    %112 = arith.addf %109, %111 : vector<4x1xf32>
    %c2_65 = arith.constant 2 : index
    %c0_66 = arith.constant 0 : index
    %c0_67 = arith.constant 0 : index
    %113 = vector.load %arg9[%c2_65, %c0_66, %c0_67] : memref<4x4x1xf32, #tpu.memory_space<vmem>>, vector<1x4x1xf32>
    %114 = vector.shape_cast %113 : vector<1x4x1xf32> to vector<4x1xf32>
    %115 = vector.shape_cast %112 : vector<4x1xf32> to vector<1x4x1xf32>
    tpu.vector_store %arg9[%c2_65, %c0_66, %c0_67], %115 {strides = array<i32>} : memref<4x4x1xf32, #tpu.memory_space<vmem>>, vector<1x4x1xf32>,
    %c2_68 = arith.constant 2 : index
    %c0_69 = arith.constant 0 : index
    %c0_70 = arith.constant 0 : index
    %116 = vector.load %arg10[%c2_68, %c0_69, %c0_70] : memref<4x4x8xf32, #tpu.memory_space<vmem>>, vector<1x4x8xf32>
    %117 = vector.shape_cast %116 : vector<1x4x8xf32> to vector<4x8xf32>
    %118 = vector.broadcast %103 : vector<4x1xf32> to vector<4x8xf32>
    %119 = arith.mulf %118, %117 : vector<4x8xf32>
    %cst_71 = arith.constant dense<0.000000e+00> : vector<4x8xf32>
    %120 = tpu.matmul %106, %91, %cst_71 {dimension_numbers = #tpu.dot_dimension_numbers<[1], [0], [0], [1], [0, 0, 1, 1], [], []>} : vector<4x4xf32>, vector<4x8xf32>, vector<4x8xf32> -> vector<4x8xf32>
    %121 = arith.addf %119, %120 : vector<4x8xf32>
    %c2_72 = arith.constant 2 : index
    %c0_73 = arith.constant 0 : index
    %c0_74 = arith.constant 0 : index
    %122 = vector.load %arg10[%c2_72, %c0_73, %c0_74] : memref<4x4x8xf32, #tpu.memory_space<vmem>>, vector<1x4x8xf32>
    %123 = vector.shape_cast %122 : vector<1x4x8xf32> to vector<4x8xf32>
    %124 = vector.shape_cast %121 : vector<4x8xf32> to vector<1x4x8xf32>
    tpu.vector_store %arg10[%c2_72, %c0_73, %c0_74], %124 {strides = array<i32>} : memref<4x4x8xf32, #tpu.memory_space<vmem>>, vector<1x4x8xf32>,
    %c2_75 = arith.constant 2 : index
    %c0_76 = arith.constant 0 : index
    %c0_77 = arith.constant 0 : index
    %125 = vector.load %arg8[%c2_75, %c0_76, %c0_77] : memref<4x4x1xf32, #tpu.memory_space<vmem>>, vector<1x4x1xf32>
    %126 = vector.shape_cast %125 : vector<1x4x1xf32> to vector<4x1xf32>
    %127 = vector.shape_cast %101 : vector<4x1xf32> to vector<1x4x1xf32>
    tpu.vector_store %arg8[%c2_75, %c0_76, %c0_77], %127 {strides = array<i32>} : memref<4x4x1xf32, #tpu.memory_space<vmem>>, vector<1x4x1xf32>,
    %128 = vector.extract_strided_slice %4 {offsets = [0, 24], sizes = [4, 8], strides = [1, 1]} : vector<4x32xf32> to vector<4x8xf32>
    %129 = vector.extract_strided_slice %6 {offsets = [0, 24], sizes = [4, 8], strides = [1, 1]} : vector<4x32xf32> to vector<4x8xf32>
    %130 = vector.extract_strided_slice %8 {offsets = [0, 24], sizes = [4, 8], strides = [1, 1]} : vector<4x32xf32> to vector<4x8xf32>
    %cst_78 = arith.constant dense<0.000000e+00> : vector<4x4xf32>
    %131 = tpu.matmul %128, %129, %cst_78 {dimension_numbers = #tpu.dot_dimension_numbers<[1], [1], [0], [0], [0, 0, 1, 0], [], []>} : vector<4x8xf32>, vector<4x8xf32>, vector<4x4xf32> -> vector<4x4xf32>
    %cst_79 = arith.constant 0.353553385 : f32
    %132 = vector.broadcast %cst_79 : f32 to vector<4x4xf32>
    %133 = arith.mulf %131, %132 : vector<4x4xf32>
    %134 = vector.broadcast %10 : vector<1x4xf32> to vector<4x4xf32>
    %135 = arith.addf %133, %134 : vector<4x4xf32>
    %c3 = arith.constant 3 : index
    %c0_80 = arith.constant 0 : index
    %c0_81 = arith.constant 0 : index
    %136 = vector.load %arg8[%c3, %c0_80, %c0_81] : memref<4x4x1xf32, #tpu.memory_space<vmem>>, vector<1x4x1xf32>
    %137 = vector.shape_cast %136 : vector<1x4x1xf32> to vector<4x1xf32>
    %cst_82 = arith.constant dense<0xFF800000> : vector<4xf32>
    %138 = vector.multi_reduction <maximumf>, %135, %cst_82 [1] : vector<4x4xf32> to vector<4xf32>
    %139 = vector.shape_cast %138 : vector<4xf32> to vector<4x1xf32>
    %140 = arith.maximumf %137, %139 : vector<4x1xf32>
    %141 = arith.subf %137, %140 : vector<4x1xf32>
    %142 = math.exp %141 : vector<4x1xf32>
    %143 = vector.broadcast %140 : vector<4x1xf32> to vector<4x4xf32>
    %144 = arith.subf %135, %143 : vector<4x4xf32>
    %145 = math.exp %144 : vector<4x4xf32>
    %c3_83 = arith.constant 3 : index
    %c0_84 = arith.constant 0 : index
    %c0_85 = arith.constant 0 : index
    %146 = vector.load %arg9[%c3_83, %c0_84, %c0_85] : memref<4x4x1xf32, #tpu.memory_space<vmem>>, vector<1x4x1xf32>
    %147 = vector.shape_cast %146 : vector<1x4x1xf32> to vector<4x1xf32>
    %148 = arith.mulf %142, %147 : vector<4x1xf32>
    %cst_86 = arith.constant dense<0.000000e+00> : vector<4xf32>
    %149 = vector.multi_reduction <add>, %145, %cst_86 [1] : vector<4x4xf32> to vector<4xf32>
    %150 = vector.shape_cast %149 : vector<4xf32> to vector<4x1xf32>
    %151 = arith.addf %148, %150 : vector<4x1xf32>
    %c3_87 = arith.constant 3 : index
    %c0_88 = arith.constant 0 : index
    %c0_89 = arith.constant 0 : index
    %152 = vector.load %arg9[%c3_87, %c0_88, %c0_89] : memref<4x4x1xf32, #tpu.memory_space<vmem>>, vector<1x4x1xf32>
    %153 = vector.shape_cast %152 : vector<1x4x1xf32> to vector<4x1xf32>
    %154 = vector.shape_cast %151 : vector<4x1xf32> to vector<1x4x1xf32>
    tpu.vector_store %arg9[%c3_87, %c0_88, %c0_89], %154 {strides = array<i32>} : memref<4x4x1xf32, #tpu.memory_space<vmem>>, vector<1x4x1xf32>,
    %c3_90 = arith.constant 3 : index
    %c0_91 = arith.constant 0 : index
    %c0_92 = arith.constant 0 : index
    %155 = vector.load %arg10[%c3_90, %c0_91, %c0_92] : memref<4x4x8xf32, #tpu.memory_space<vmem>>, vector<1x4x8xf32>
    %156 = vector.shape_cast %155 : vector<1x4x8xf32> to vector<4x8xf32>
    %157 = vector.broadcast %142 : vector<4x1xf32> to vector<4x8xf32>
    %158 = arith.mulf %157, %156 : vector<4x8xf32>
    %cst_93 = arith.constant dense<0.000000e+00> : vector<4x8xf32>
    %159 = tpu.matmul %145, %130, %cst_93 {dimension_numbers = #tpu.dot_dimension_numbers<[1], [0], [0], [1], [0, 0, 1, 1], [], []>} : vector<4x4xf32>, vector<4x8xf32>, vector<4x8xf32> -> vector<4x8xf32>
    %160 = arith.addf %158, %159 : vector<4x8xf32>
    %c3_94 = arith.constant 3 : index
    %c0_95 = arith.constant 0 : index
    %c0_96 = arith.constant 0 : index
    %161 = vector.load %arg10[%c3_94, %c0_95, %c0_96] : memref<4x4x8xf32, #tpu.memory_space<vmem>>, vector<1x4x8xf32>
    %162 = vector.shape_cast %161 : vector<1x4x8xf32> to vector<4x8xf32>
    %163 = vector.shape_cast %160 : vector<4x8xf32> to vector<1x4x8xf32>
    tpu.vector_store %arg10[%c3_94, %c0_95, %c0_96], %163 {strides = array<i32>} : memref<4x4x8xf32, #tpu.memory_space<vmem>>, vector<1x4x8xf32>,
    %c3_97 = arith.constant 3 : index
    %c0_98 = arith.constant 0 : index
    %c0_99 = arith.constant 0 : index
    %164 = vector.load %arg8[%c3_97, %c0_98, %c0_99] : memref<4x4x1xf32, #tpu.memory_space<vmem>>, vector<1x4x1xf32>
    %165 = vector.shape_cast %164 : vector<1x4x1xf32> to vector<4x1xf32>
    %166 = vector.shape_cast %140 : vector<4x1xf32> to vector<1x4x1xf32>
    tpu.vector_store %arg8[%c3_97, %c0_98, %c0_99], %166 {strides = array<i32>} : memref<4x4x1xf32, #tpu.memory_space<vmem>>, vector<1x4x1xf32>,
    %c0_i32_100 = arith.constant 0 : i32
    %167 = arith.cmpi eq, %arg2, %c0_i32_100 : i32
    %168 = arith.extui %167 : i1 to i32
    %c0_i32_101 = arith.constant 0 : i32
    %169 = arith.cmpi ne, %168, %c0_i32_101 : i32
    scf.if %169 {
      %c0_102 = arith.constant 0 : index
      %c0_103 = arith.constant 0 : index
      %c0_104 = arith.constant 0 : index
      %170 = vector.load %arg10[%c0_102, %c0_103, %c0_104] : memref<4x4x8xf32, #tpu.memory_space<vmem>>, vector<1x4x8xf32>
      %171 = vector.shape_cast %170 : vector<1x4x8xf32> to vector<4x8xf32>
      %c0_105 = arith.constant 0 : index
      %c0_106 = arith.constant 0 : index
      %c0_107 = arith.constant 0 : index
      %172 = vector.load %arg9[%c0_105, %c0_106, %c0_107] : memref<4x4x1xf32, #tpu.memory_space<vmem>>, vector<1x4x1xf32>
      %173 = vector.shape_cast %172 : vector<1x4x1xf32> to vector<4x1xf32>
      %174 = vector.broadcast %173 : vector<4x1xf32> to vector<4x8xf32>
      %175 = arith.divf %171, %174 : vector<4x8xf32>
      %c1_108 = arith.constant 1 : index
      %c0_109 = arith.constant 0 : index
      %c0_110 = arith.constant 0 : index
      %176 = vector.load %arg10[%c1_108, %c0_109, %c0_110] : memref<4x4x8xf32, #tpu.memory_space<vmem>>, vector<1x4x8xf32>
      %177 = vector.shape_cast %176 : vector<1x4x8xf32> to vector<4x8xf32>
      %c1_111 = arith.constant 1 : index
      %c0_112 = arith.constant 0 : index
      %c0_113 = arith.constant 0 : index
      %178 = vector.load %arg9[%c1_111, %c0_112, %c0_113] : memref<4x4x1xf32, #tpu.memory_space<vmem>>, vector<1x4x1xf32>
      %179 = vector.shape_cast %178 : vector<1x4x1xf32> to vector<4x1xf32>
      %180 = vector.broadcast %179 : vector<4x1xf32> to vector<4x8xf32>
      %181 = arith.divf %177, %180 : vector<4x8xf32>
      %c2_114 = arith.constant 2 : index
      %c0_115 = arith.constant 0 : index
      %c0_116 = arith.constant 0 : index
      %182 = vector.load %arg10[%c2_114, %c0_115, %c0_116] : memref<4x4x8xf32, #tpu.memory_space<vmem>>, vector<1x4x8xf32>
      %183 = vector.shape_cast %182 : vector<1x4x8xf32> to vector<4x8xf32>
      %c2_117 = arith.constant 2 : index
      %c0_118 = arith.constant 0 : index
      %c0_119 = arith.constant 0 : index
      %184 = vector.load %arg9[%c2_117, %c0_118, %c0_119] : memref<4x4x1xf32, #tpu.memory_space<vmem>>, vector<1x4x1xf32>
      %185 = vector.shape_cast %184 : vector<1x4x1xf32> to vector<4x1xf32>
      %186 = vector.broadcast %185 : vector<4x1xf32> to vector<4x8xf32>
      %187 = arith.divf %183, %186 : vector<4x8xf32>
      %c3_120 = arith.constant 3 : index
      %c0_121 = arith.constant 0 : index
      %c0_122 = arith.constant 0 : index
      %188 = vector.load %arg10[%c3_120, %c0_121, %c0_122] : memref<4x4x8xf32, #tpu.memory_space<vmem>>, vector<1x4x8xf32>
      %189 = vector.shape_cast %188 : vector<1x4x8xf32> to vector<4x8xf32>
      %c3_123 = arith.constant 3 : index
      %c0_124 = arith.constant 0 : index
      %c0_125 = arith.constant 0 : index
      %190 = vector.load %arg9[%c3_123, %c0_124, %c0_125] : memref<4x4x1xf32, #tpu.memory_space<vmem>>, vector<1x4x1xf32>
      %191 = vector.shape_cast %190 : vector<1x4x1xf32> to vector<4x1xf32>
      %192 = vector.broadcast %191 : vector<4x1xf32> to vector<4x8xf32>
      %193 = arith.divf %189, %192 : vector<4x8xf32>
      %194 = tpu.concatenate %175, %181, %187, %193 in 1 : vector<4x8xf32>, vector<4x8xf32>, vector<4x8xf32>, vector<4x8xf32> -> vector<4x32xf32>
      %c0_126 = arith.constant 0 : index
      %c0_127 = arith.constant 0 : index
      %c0_128 = arith.constant 0 : index
      %195 = vector.load %arg7[%c0_126, %c0_127, %c0_128] : memref<1x4x32xf32, #tpu.memory_space<vmem>>, vector<1x4x32xf32>
      %196 = vector.shape_cast %195 : vector<1x4x32xf32> to vector<4x32xf32>
      %197 = vector.shape_cast %194 : vector<4x32xf32> to vector<1x4x32xf32>
      tpu.vector_store %arg7[%c0_126, %c0_127, %c0_128], %197 {strides = array<i32>} : memref<1x4x32xf32, #tpu.memory_space<vmem>>, vector<1x4x32xf32>,
    } else {
    }
    return
  }
  func.func @transform_0(%arg0: i32, %arg1: i32, %arg2: i32) -> (i32, i32, i32) {
    %c0_i32 = arith.constant 0 : i32
    %c0_i32_0 = arith.constant 0 : i32
    return %arg0, %arg1, %c0_i32 : i32, i32, i32
  }
  func.func @transform_1(%arg0: i32, %arg1: i32, %arg2: i32) -> (i32, i32, i32) {
    %c0_i32 = arith.constant 0 : i32
    %c0_i32_0 = arith.constant 0 : i32
    return %arg0, %arg2, %c0_i32 : i32, i32, i32
  }
  func.func @transform_2(%arg0: i32, %arg1: i32, %arg2: i32) -> (i32, i32, i32) {
    %c0_i32 = arith.constant 0 : i32
    %c0_i32_0 = arith.constant 0 : i32
    return %arg0, %arg2, %c0_i32 : i32, i32, i32
  }
  func.func @transform_3(%arg0: i32, %arg1: i32, %arg2: i32) -> (i32, i32, i32) {
    %c0_i32 = arith.constant 0 : i32
    %c0_i32_0 = arith.constant 0 : i32
    return %arg0, %c0_i32, %arg2 : i32, i32, i32
  }
  func.func @transform_4(%arg0: i32, %arg1: i32, %arg2: i32) -> (i32, i32, i32) {
    %c0_i32 = arith.constant 0 : i32
    %c0_i32_0 = arith.constant 0 : i32
    return %arg0, %arg1, %c0_i32 : i32, i32, i32
  }
}

module attributes {stable_mosaic.version = 11 : i64} {
  func.func @_matmul_kernel(%arg0: i32, %arg1: i32, %arg2: i32, %arg3: memref<8x32xf32, #tpu.memory_space<vmem>>, %arg4: memref<32x64xf32, #tpu.memory_space<vmem>>, %arg5: memref<1x64xf32, #tpu.memory_space<vmem>>, %arg6: memref<8x64xf32, #tpu.memory_space<vmem>>, %arg7: memref<1x8x64xf32, #tpu.memory_space<vmem>>) attributes {dimension_semantics = [#tpu.dimension_semantics<parallel>, #tpu.dimension_semantics<parallel>, #tpu.dimension_semantics<arbitrary>], iteration_bounds = array<i64: 1, 1, 1>, scalar_prefetch = 0 : i64, scratch_operands = 1 : i64, tpu.core_type = #tpu.core_type<tc>, window_params = [{transform_indices = @transform_0, window_bounds = array<i64: 8, 32>}, {transform_indices = @transform_1, window_bounds = array<i64: 32, 64>}, {transform_indices = @transform_2, window_bounds = array<i64: 1, 64>}, {transform_indices = @transform_3, window_bounds = array<i64: 8, 64>}]} {
    %c0_i32 = arith.constant 0 : i32
    %0 = arith.cmpi eq, %arg2, %c0_i32 : i32
    %1 = arith.extui %0 : i1 to i32
    %c0_i32_0 = arith.constant 0 : i32
    %2 = arith.cmpi ne, %1, %c0_i32_0 : i32
    scf.if %2 {
      %cst_12 = arith.constant 0.000000e+00 : f32
      %15 = vector.broadcast %cst_12 : f32 to vector<1x8x64xf32>
      %c0_13 = arith.constant 0 : index
      %c0_14 = arith.constant 0 : index
      %c0_15 = arith.constant 0 : index
      %16 = vector.load %arg7[%c0_13, %c0_14, %c0_15] : memref<1x8x64xf32, #tpu.memory_space<vmem>>, vector<1x8x64xf32>
      tpu.vector_store %arg7[%c0_13, %c0_14, %c0_15], %15 {strides = array<i32>} : memref<1x8x64xf32, #tpu.memory_space<vmem>>, vector<1x8x64xf32>,
    } else {
    }
    %c0 = arith.constant 0 : index
    %c0_1 = arith.constant 0 : index
    %3 = vector.load %arg3[%c0, %c0_1] : memref<8x32xf32, #tpu.memory_space<vmem>>, vector<8x32xf32>
    %c0_2 = arith.constant 0 : index
    %c0_3 = arith.constant 0 : index
    %c0_4 = arith.constant 0 : index
    %4 = vector.load %arg7[%c0_2, %c0_3, %c0_4] : memref<1x8x64xf32, #tpu.memory_space<vmem>>, vector<1x8x64xf32>
    %5 = vector.shape_cast %4 : vector<1x8x64xf32> to vector<8x64xf32>
    %c0_5 = arith.constant 0 : index
    %c0_6 = arith.constant 0 : index
    %6 = vector.load %arg4[%c0_5, %c0_6] : memref<32x64xf32, #tpu.memory_space<vmem>>, vector<32x64xf32>
    %cst = arith.constant dense<0.000000e+00> : vector<8x64xf32>
    %7 = tpu.matmul %3, %6, %cst {dimension_numbers = #tpu.dot_dimension_numbers<[1], [0], [0], [1], [0, 0, 1, 1], [], []>} : vector<8x32xf32>, vector<32x64xf32>, vector<8x64xf32> -> vector<8x64xf32>
    %8 = arith.addf %5, %7 : vector<8x64xf32>
    %c0_7 = arith.constant 0 : index
    %c0_8 = arith.constant 0 : index
    %c0_9 = arith.constant 0 : index
    %9 = vector.load %arg7[%c0_7, %c0_8, %c0_9] : memref<1x8x64xf32, #tpu.memory_space<vmem>>, vector<1x8x64xf32>
    %10 = vector.shape_cast %9 : vector<1x8x64xf32> to vector<8x64xf32>
    %11 = vector.shape_cast %8 : vector<8x64xf32> to vector<1x8x64xf32>
    tpu.vector_store %arg7[%c0_7, %c0_8, %c0_9], %11 {strides = array<i32>} : memref<1x8x64xf32, #tpu.memory_space<vmem>>, vector<1x8x64xf32>,
    %c0_i32_10 = arith.constant 0 : i32
    %12 = arith.cmpi eq, %arg2, %c0_i32_10 : i32
    %13 = arith.extui %12 : i1 to i32
    %c0_i32_11 = arith.constant 0 : i32
    %14 = arith.cmpi ne, %13, %c0_i32_11 : i32
    scf.if %14 {
      %c0_12 = arith.constant 0 : index
      %c0_13 = arith.constant 0 : index
      %c0_14 = arith.constant 0 : index
      %15 = vector.load %arg7[%c0_12, %c0_13, %c0_14] : memref<1x8x64xf32, #tpu.memory_space<vmem>>, vector<1x8x64xf32>
      %16 = vector.shape_cast %15 : vector<1x8x64xf32> to vector<8x64xf32>
      %c0_15 = arith.constant 0 : index
      %c0_16 = arith.constant 0 : index
      %17 = vector.load %arg5[%c0_15, %c0_16] : memref<1x64xf32, #tpu.memory_space<vmem>>, vector<1x64xf32>
      %18 = vector.broadcast %17 : vector<1x64xf32> to vector<8x64xf32>
      %19 = arith.addf %16, %18 : vector<8x64xf32>
      %cst_17 = arith.constant 0.000000e+00 : f32
      %20 = vector.broadcast %cst_17 : f32 to vector<8x64xf32>
      %21 = arith.maximumf %19, %20 : vector<8x64xf32>
      %c0_18 = arith.constant 0 : index
      %c0_19 = arith.constant 0 : index
      %22 = vector.load %arg6[%c0_18, %c0_19] : memref<8x64xf32, #tpu.memory_space<vmem>>, vector<8x64xf32>
      tpu.vector_store %arg6[%c0_18, %c0_19], %21 {strides = array<i32>} : memref<8x64xf32, #tpu.memory_space<vmem>>, vector<8x64xf32>,
    } else {
    }
    return
  }
  func.func @transform_0(%arg0: i32, %arg1: i32, %arg2: i32) -> (i32, i32) {
    %c0_i32 = arith.constant 0 : i32
    return %arg0, %arg2 : i32, i32
  }
  func.func @transform_1(%arg0: i32, %arg1: i32, %arg2: i32) -> (i32, i32) {
    %c0_i32 = arith.constant 0 : i32
    return %arg2, %arg1 : i32, i32
  }
  func.func @transform_2(%arg0: i32, %arg1: i32, %arg2: i32) -> (i32, i32) {
    %c0_i32 = arith.constant 0 : i32
    %c0_i32_0 = arith.constant 0 : i32
    return %c0_i32, %arg1 : i32, i32
  }
  func.func @transform_3(%arg0: i32, %arg1: i32, %arg2: i32) -> (i32, i32) {
    %c0_i32 = arith.constant 0 : i32
    return %arg0, %arg1 : i32, i32
  }
}

module attributes {stable_mosaic.version = 11 : i64} {
  func.func @_matmul_kernel(%arg0: i32, %arg1: i32, %arg2: i32, %arg3: memref<8x64xf32, #tpu.memory_space<vmem>>, %arg4: memref<64x32xf32, #tpu.memory_space<vmem>>, %arg5: memref<1x32xf32, #tpu.memory_space<vmem>>, %arg6: memref<8x32xf32, #tpu.memory_space<vmem>>, %arg7: memref<1x32xf32, #tpu.memory_space<vmem>>, %arg8: memref<1x32xf32, #tpu.memory_space<vmem>>, %arg9: memref<8x32xf32, #tpu.memory_space<vmem>>, %arg10: memref<1x8x32xf32, #tpu.memory_space<vmem>>) attributes {dimension_semantics = [#tpu.dimension_semantics<parallel>, #tpu.dimension_semantics<parallel>, #tpu.dimension_semantics<arbitrary>], iteration_bounds = array<i64: 1, 1, 1>, scalar_prefetch = 0 : i64, scratch_operands = 1 : i64, tpu.core_type = #tpu.core_type<tc>, window_params = [{transform_indices = @transform_0, window_bounds = array<i64: 8, 64>}, {transform_indices = @transform_1, window_bounds = array<i64: 64, 32>}, {transform_indices = @transform_2, window_bounds = array<i64: 1, 32>}, {transform_indices = @transform_3, window_bounds = array<i64: 8, 32>}, {transform_indices = @transform_4, window_bounds = array<i64: 1, 32>}, {transform_indices = @transform_5, window_bounds = array<i64: 1, 32>}, {transform_indices = @transform_6, window_bounds = array<i64: 8, 32>}]} {
    %c0_i32 = arith.constant 0 : i32
    %0 = arith.cmpi eq, %arg2, %c0_i32 : i32
    %1 = arith.extui %0 : i1 to i32
    %c0_i32_0 = arith.constant 0 : i32
    %2 = arith.cmpi ne, %1, %c0_i32_0 : i32
    scf.if %2 {
      %cst_12 = arith.constant 0.000000e+00 : f32
      %15 = vector.broadcast %cst_12 : f32 to vector<1x8x32xf32>
      %c0_13 = arith.constant 0 : index
      %c0_14 = arith.constant 0 : index
      %c0_15 = arith.constant 0 : index
      %16 = vector.load %arg10[%c0_13, %c0_14, %c0_15] : memref<1x8x32xf32, #tpu.memory_space<vmem>>, vector<1x8x32xf32>
      tpu.vector_store %arg10[%c0_13, %c0_14, %c0_15], %15 {strides = array<i32>} : memref<1x8x32xf32, #tpu.memory_space<vmem>>, vector<1x8x32xf32>,
    } else {
    }
    %c0 = arith.constant 0 : index
    %c0_1 = arith.constant 0 : index
    %3 = vector.load %arg3[%c0, %c0_1] : memref<8x64xf32, #tpu.memory_space<vmem>>, vector<8x64xf32>
    %c0_2 = arith.constant 0 : index
    %c0_3 = arith.constant 0 : index
    %c0_4 = arith.constant 0 : index
    %4 = vector.load %arg10[%c0_2, %c0_3, %c0_4] : memref<1x8x32xf32, #tpu.memory_space<vmem>>, vector<1x8x32xf32>
    %5 = vector.shape_cast %4 : vector<1x8x32xf32> to vector<8x32xf32>
    %c0_5 = arith.constant 0 : index
    %c0_6 = arith.constant 0 : index
    %6 = vector.load %arg4[%c0_5, %c0_6] : memref<64x32xf32, #tpu.memory_space<vmem>>, vector<64x32xf32>
    %cst = arith.constant dense<0.000000e+00> : vector<8x32xf32>
    %7 = tpu.matmul %3, %6, %cst {dimension_numbers = #tpu.dot_dimension_numbers<[1], [0], [0], [1], [0, 0, 1, 1], [], []>} : vector<8x64xf32>, vector<64x32xf32>, vector<8x32xf32> -> vector<8x32xf32>
    %8 = arith.addf %5, %7 : vector<8x32xf32>
    %c0_7 = arith.constant 0 : index
    %c0_8 = arith.constant 0 : index
    %c0_9 = arith.constant 0 : index
    %9 = vector.load %arg10[%c0_7, %c0_8, %c0_9] : memref<1x8x32xf32, #tpu.memory_space<vmem>>, vector<1x8x32xf32>
    %10 = vector.shape_cast %9 : vector<1x8x32xf32> to vector<8x32xf32>
    %11 = vector.shape_cast %8 : vector<8x32xf32> to vector<1x8x32xf32>
    tpu.vector_store %arg10[%c0_7, %c0_8, %c0_9], %11 {strides = array<i32>} : memref<1x8x32xf32, #tpu.memory_space<vmem>>, vector<1x8x32xf32>,
    %c0_i32_10 = arith.constant 0 : i32
    %12 = arith.cmpi eq, %arg2, %c0_i32_10 : i32
    %13 = arith.extui %12 : i1 to i32
    %c0_i32_11 = arith.constant 0 : i32
    %14 = arith.cmpi ne, %13, %c0_i32_11 : i32
    scf.if %14 {
      %c0_12 = arith.constant 0 : index
      %c0_13 = arith.constant 0 : index
      %c0_14 = arith.constant 0 : index
      %15 = vector.load %arg10[%c0_12, %c0_13, %c0_14] : memref<1x8x32xf32, #tpu.memory_space<vmem>>, vector<1x8x32xf32>
      %16 = vector.shape_cast %15 : vector<1x8x32xf32> to vector<8x32xf32>
      %c0_15 = arith.constant 0 : index
      %c0_16 = arith.constant 0 : index
      %17 = vector.load %arg5[%c0_15, %c0_16] : memref<1x32xf32, #tpu.memory_space<vmem>>, vector<1x32xf32>
      %18 = vector.broadcast %17 : vector<1x32xf32> to vector<8x32xf32>
      %19 = arith.addf %16, %18 : vector<8x32xf32>
      %c0_17 = arith.constant 0 : index
      %c0_18 = arith.constant 0 : index
      %20 = vector.load %arg6[%c0_17, %c0_18] : memref<8x32xf32, #tpu.memory_space<vmem>>, vector<8x32xf32>
      %21 = arith.addf %19, %20 : vector<8x32xf32>
      %cst_19 = arith.constant dense<0.000000e+00> : vector<8xf32>
      %22 = vector.multi_reduction <add>, %21, %cst_19 [1] : vector<8x32xf32> to vector<8xf32>
      %23 = vector.shape_cast %22 : vector<8xf32> to vector<8x1xf32>
      %cst_20 = arith.constant 3.200000e+01 : f32
      %24 = vector.broadcast %cst_20 : f32 to vector<8x1xf32>
      %25 = arith.divf %23, %24 : vector<8x1xf32>
      %26 = vector.broadcast %25 : vector<8x1xf32> to vector<8x32xf32>
      %27 = arith.subf %21, %26 : vector<8x32xf32>
      %28 = arith.mulf %27, %27 : vector<8x32xf32>
      %cst_21 = arith.constant dense<0.000000e+00> : vector<8xf32>
      %29 = vector.multi_reduction <add>, %28, %cst_21 [1] : vector<8x32xf32> to vector<8xf32>
      %30 = vector.shape_cast %29 : vector<8xf32> to vector<8x1xf32>
      %cst_22 = arith.constant 3.200000e+01 : f32
      %31 = vector.broadcast %cst_22 : f32 to vector<8x1xf32>
      %32 = arith.divf %30, %31 : vector<8x1xf32>
      %33 = vector.broadcast %25 : vector<8x1xf32> to vector<8x32xf32>
      %34 = arith.subf %21, %33 : vector<8x32xf32>
      %cst_23 = arith.constant 9.99999997E-7 : f32
      %35 = vector.broadcast %cst_23 : f32 to vector<8x1xf32>
      %36 = arith.addf %32, %35 : vector<8x1xf32>
      %37 = math.rsqrt %36 : vector<8x1xf32>
      %38 = vector.broadcast %37 : vector<8x1xf32> to vector<8x32xf32>
      %39 = arith.mulf %34, %38 : vector<8x32xf32>
      %c0_24 = arith.constant 0 : index
      %c0_25 = arith.constant 0 : index
      %40 = vector.load %arg7[%c0_24, %c0_25] : memref<1x32xf32, #tpu.memory_space<vmem>>, vector<1x32xf32>
      %41 = vector.broadcast %40 : vector<1x32xf32> to vector<8x32xf32>
      %42 = arith.mulf %39, %41 : vector<8x32xf32>
      %c0_26 = arith.constant 0 : index
      %c0_27 = arith.constant 0 : index
      %43 = vector.load %arg8[%c0_26, %c0_27] : memref<1x32xf32, #tpu.memory_space<vmem>>, vector<1x32xf32>
      %44 = vector.broadcast %43 : vector<1x32xf32> to vector<8x32xf32>
      %45 = arith.addf %42, %44 : vector<8x32xf32>
      %c0_28 = arith.constant 0 : index
      %c0_29 = arith.constant 0 : index
      %46 = vector.load %arg9[%c0_28, %c0_29] : memref<8x32xf32, #tpu.memory_space<vmem>>, vector<8x32xf32>
      tpu.vector_store %arg9[%c0_28, %c0_29], %45 {strides = array<i32>} : memref<8x32xf32, #tpu.memory_space<vmem>>, vector<8x32xf32>,
    } else {
    }
    return
  }
  func.func @transform_0(%arg0: i32, %arg1: i32, %arg2: i32) -> (i32, i32) {
    %c0_i32 = arith.constant 0 : i32
    return %arg0, %arg2 : i32, i32
  }
  func.func @transform_1(%arg0: i32, %arg1: i32, %arg2: i32) -> (i32, i32) {
    %c0_i32 = arith.constant 0 : i32
    return %arg2, %arg1 : i32, i32
  }
  func.func @transform_2(%arg0: i32, %arg1: i32, %arg2: i32) -> (i32, i32) {
    %c0_i32 = arith.constant 0 : i32
    %c0_i32_0 = arith.constant 0 : i32
    return %c0_i32, %arg1 : i32, i32
  }
  func.func @transform_3(%arg0: i32, %arg1: i32, %arg2: i32) -> (i32, i32) {
    %c0_i32 = arith.constant 0 : i32
    return %arg0, %arg1 : i32, i32
  }
  func.func @transform_4(%arg0: i32, %arg1: i32, %arg2: i32) -> (i32, i32) {
    %c0_i32 = arith.constant 0 : i32
    %c0_i32_0 = arith.constant 0 : i32
    return %c0_i32, %arg1 : i32, i32
  }
  func.func @transform_5(%arg0: i32, %arg1: i32, %arg2: i32) -> (i32, i32) {
    %c0_i32 = arith.constant 0 : i32
    %c0_i32_0 = arith.constant 0 : i32
    return %c0_i32, %arg1 : i32, i32
  }
  func.func @transform_6(%arg0: i32, %arg1: i32, %arg2: i32) -> (i32, i32) {
    %c0_i32 = arith.constant 0 : i32
    return %arg0, %arg1 : i32, i32
  }
}

module attributes {stable_mosaic.version = 11 : i64} {
  func.func @_layer_norm_kernel(%arg0: i32, %arg1: memref<8x32xf32, #tpu.memory_space<vmem>>, %arg2: memref<1x32xf32, #tpu.memory_space<vmem>>, %arg3: memref<1x32xf32, #tpu.memory_space<vmem>>, %arg4: memref<8x32xf32, #tpu.memory_space<vmem>>) attributes {dimension_semantics = [#tpu.dimension_semantics<parallel>], iteration_bounds = array<i64: 1>, scalar_prefetch = 0 : i64, scratch_operands = 0 : i64, tpu.core_type = #tpu.core_type<tc>, window_params = [{transform_indices = @transform_0, window_bounds = array<i64: 8, 32>}, {pipeline_mode = #tpu.pipeline_mode<synchronous>, transform_indices = @transform_1, window_bounds = array<i64: 1, 32>}, {pipeline_mode = #tpu.pipeline_mode<synchronous>, transform_indices = @transform_2, window_bounds = array<i64: 1, 32>}, {transform_indices = @transform_3, window_bounds = array<i64: 8, 32>}]} {
    %c0 = arith.constant 0 : index
    %c0_0 = arith.constant 0 : index
    %0 = vector.load %arg1[%c0, %c0_0] : memref<8x32xf32, #tpu.memory_space<vmem>>, vector<8x32xf32>
    %cst = arith.constant dense<0.000000e+00> : vector<8xf32>
    %1 = vector.multi_reduction <add>, %0, %cst [1] : vector<8x32xf32> to vector<8xf32>
    %2 = vector.shape_cast %1 : vector<8xf32> to vector<8x1xf32>
    %cst_1 = arith.constant 3.200000e+01 : f32
    %3 = vector.broadcast %cst_1 : f32 to vector<8x1xf32>
    %4 = arith.divf %2, %3 : vector<8x1xf32>
    %5 = vector.broadcast %4 : vector<8x1xf32> to vector<8x32xf32>
    %6 = arith.subf %0, %5 : vector<8x32xf32>
    %7 = arith.mulf %6, %6 : vector<8x32xf32>
    %cst_2 = arith.constant dense<0.000000e+00> : vector<8xf32>
    %8 = vector.multi_reduction <add>, %7, %cst_2 [1] : vector<8x32xf32> to vector<8xf32>
    %9 = vector.shape_cast %8 : vector<8xf32> to vector<8x1xf32>
    %cst_3 = arith.constant 3.200000e+01 : f32
    %10 = vector.broadcast %cst_3 : f32 to vector<8x1xf32>
    %11 = arith.divf %9, %10 : vector<8x1xf32>
    %12 = vector.broadcast %4 : vector<8x1xf32> to vector<8x32xf32>
    %13 = arith.subf %0, %12 : vector<8x32xf32>
    %cst_4 = arith.constant 9.99999997E-7 : f32
    %14 = vector.broadcast %cst_4 : f32 to vector<8x1xf32>
    %15 = arith.addf %11, %14 : vector<8x1xf32>
    %16 = math.rsqrt %15 : vector<8x1xf32>
    %17 = vector.broadcast %16 : vector<8x1xf32> to vector<8x32xf32>
    %18 = arith.mulf %13, %17 : vector<8x32xf32>
    %c0_5 = arith.constant 0 : index
    %c0_6 = arith.constant 0 : index
    %19 = vector.load %arg2[%c0_5, %c0_6] : memref<1x32xf32, #tpu.memory_space<vmem>>, vector<1x32xf32>
    %20 = vector.broadcast %19 : vector<1x32xf32> to vector<8x32xf32>
    %21 = arith.mulf %18, %20 : vector<8x32xf32>
    %c0_7 = arith.constant 0 : index
    %c0_8 = arith.constant 0 : index
    %22 = vector.load %arg3[%c0_7, %c0_8] : memref<1x32xf32, #tpu.memory_space<vmem>>, vector<1x32xf32>
    %23 = vector.broadcast %22 : vector<1x32xf32> to vector<8x32xf32>
    %24 = arith.addf %21, %23 : vector<8x32xf32>
    %c0_9 = arith.constant 0 : index
    %c0_10 = arith.constant 0 : index
    %25 = vector.load %arg4[%c0_9, %c0_10] : memref<8x32xf32, #tpu.memory_space<vmem>>, vector<8x32xf32>
    tpu.vector_store %arg4[%c0_9, %c0_10], %24 {strides = array<i32>} : memref<8x32xf32, #tpu.memory_space<vmem>>, vector<8x32xf32>,
    return
  }
  func.func @transform_0(%arg0: i32) -> (i32, i32) {
    %c0_i32 = arith.constant 0 : i32
    %c0_i32_0 = arith.constant 0 : i32
    return %arg0, %c0_i32 : i32, i32
  }
  func.func @transform_1(%arg0: i32) -> (i32, i32) {
    %c0_i32 = arith.constant 0 : i32
    %c0_i32_0 = arith.constant 0 : i32
    %c0_i32_1 = arith.constant 0 : i32
    return %c0_i32, %c0_i32_0 : i32, i32
  }
  func.func @transform_2(%arg0: i32) -> (i32, i32) {
    %c0_i32 = arith.constant 0 : i32
    %c0_i32_0 = arith.constant 0 : i32
    %c0_i32_1 = arith.constant 0 : i32
    return %c0_i32, %c0_i32_0 : i32, i32
  }
  func.func @transform_3(%arg0: i32) -> (i32, i32) {
    %c0_i32 = arith.constant 0 : i32
    %c0_i32_0 = arith.constant 0 : i32
    return %arg0, %c0_i32 : i32, i32
  }
}

</mosaic_0001>

<bundles_post_ra>
// kernel: encoder_forward.14
= control target key start
LH: loop header
LB: loop body
LE: loop exit
PB: predicated region body
PF: predicated region fallthrough
CT: control target
= control target key end

     0   :  { %vm118_vm0 = vcmask 1040384   ;;  %vm69_vm1 = vcmask 72704   ;;  %vm18_vm2 = vcmask 31744   ;;  %vm452_vm3 = vmmov 1   ;;  %s673_s1 = inlined_call_operand.vmem [shape: f32[9,4], index: 1, kind: input, shape index: {}]   ;;  %s674_s0 = inlined_call_operand.vmem [shape: f32[128,9], index: 0, kind: input, shape index: {}]   ;;  %s675_s2 = inlined_call_operand.vmem [shape: f32[1,4], index: 2, kind: input, shape index: {}]   ;;  %s676_s3 = inlined_call_operand.vmem [shape: f32[128,4], index: 3, kind: output, shape index: {}]  }
   0x1   :  { %v67_v0 = vld [vmem:[%s673_s1] sm:$0xff]  ;;  %v68_v1 = vld [vmem:[%s673_s1 + $0x8] sm:$0x1]  ;;  %vm480_vm4 = vmpackc.low %vm118_vm0, %vm452_vm3  ;;  %v453_v6 = vmov 0.0  }
   0x2   :  { %v442_v3 = vpack.c.bf16 %v68_v1, %v67_v0  ;;  %v35_v4 = vld [vmem:[%s674_s0] sm:$0xff]  ;;  %20 = vst.msk [vmem:[#allocation2 + $0x8] sm:$0xff] %vm18_vm2, %v453_v6  ;;  %19 = vst.msk [vmem:[#allocation2] sm:$0xff] %vm18_vm2, %v453_v6  ;;  %v36_v7 = vld [vmem:[%s674_s0 + $0x8] sm:$0xff] }
   0x3   :  { %v43_v5 = vld [vmem:[%s674_s0 + $0x40] sm:$0xff]  ;;  %21 = vst.msk [vmem:[#allocation2 + $0x10] sm:$0xff] %vm18_vm2, %v453_v6  ;;  %22 = vst.msk [vmem:[#allocation2 + $0x18] sm:$0xff] %vm18_vm2, %v453_v6  ;;  %418 = vmatprep.mubr.msk.f32.mxu0 %vm69_vm1, %v35_v4  ;;  %v44_v8 = vld [vmem:[%s674_s0 + $0x48] sm:$0xff] }
   0x4   :  { %23 = vst.msk [vmem:[#allocation2 + $0x20] sm:$0xff] %vm18_vm2, %v453_v6  ;;  %24 = vst.msk [vmem:[#allocation2 + $0x28] sm:$0xff] %vm18_vm2, %v453_v6  ;;  %430 = vmatprep.mubr.msk.f32.mxu1 %vm69_vm1, %v43_v5  ;;  %444 = vmatprep.subr.msk.bf16.mxu0 %vm480_vm4, %v442_v3  ;;  %v37_v9 = vld [vmem:[%s674_s0 + $0x10] sm:$0xff]  ;;  %v38_v11 = vld [vmem:[%s674_s0 + $0x18] sm:$0xff] }
   0x5   :  { %25 = vst.msk [vmem:[#allocation2 + $0x30] sm:$0xff] %vm18_vm2, %v453_v6  ;;  %26 = vst.msk [vmem:[#allocation2 + $0x38] sm:$0xff] %vm18_vm2, %v453_v6  ;;  %448 = vmatprep.subr.msk.bf16.mxu1 %vm480_vm4, %v442_v3  ;;  %447 = vmatpush3.bf16.msk.msra.mxu0 %vm480_vm4, %v442_v3  ;;  %v45_v10 = vld [vmem:[%s674_s0 + $0x50] sm:$0xff]  ;;  %v46_v12 = vld [vmem:[%s674_s0 + $0x58] sm:$0xff] }
   0x6   :  { %27 = vst.msk [vmem:[#allocation2 + $0x40] sm:$0xff] %vm18_vm2, %v453_v6  ;;  %28 = vst.msk [vmem:[#allocation2 + $0x48] sm:$0xff] %vm18_vm2, %v453_v6  ;;  %449 = vmatpush3.bf16.msk.msra.mxu1 %vm480_vm4, %v442_v3  ;;  %v39_v13 = vld [vmem:[%s674_s0 + $0x20] sm:$0xff]  ;;  %v40_v15 = vld [vmem:[%s674_s0 + $0x28] sm:$0xff] }
   0x7   :  { %29 = vst.msk [vmem:[#allocation2 + $0x50] sm:$0xff] %vm18_vm2, %v453_v6  ;;  %30 = vst.msk [vmem:[#allocation2 + $0x58] sm:$0xff] %vm18_vm2, %v453_v6  ;;  %v47_v14 = vld [vmem:[%s674_s0 + $0x60] sm:$0xff]  ;;  %v48_v16 = vld [vmem:[%s674_s0 + $0x68] sm:$0xff] }
   0x8   :  { %31 = vst.msk [vmem:[#allocation2 + $0x60] sm:$0xff] %vm18_vm2, %v453_v6  ;;  %32 = vst.msk [vmem:[#allocation2 + $0x68] sm:$0xff] %vm18_vm2, %v453_v6  ;;  %419 = vmatmul.mubr.msk.f32.vlgmr.msra.gmra.mrb[0].mxu0 %vm69_vm1, %v36_v7  ;;  %v41_v17 = vld [vmem:[%s674_s0 + $0x30] sm:$0xff]  ;;  %v42_v19 = vld [vmem:[%s674_s0 + $0x38] sm:$0xff] }
   0x9   :  { %33 = vst.msk [vmem:[#allocation2 + $0x70] sm:$0xff] %vm18_vm2, %v453_v6  ;;  %34 = vst.msk [vmem:[#allocation2 + $0x78] sm:$0xff] %vm18_vm2, %v453_v6  ;;  %431 = vmatmul.mubr.msk.f32.vlgmr.msra.gmra.mrb[0].mxu1 %vm69_vm1, %v44_v8  ;;  %421 = vmatprep.mubr.msk.f32.mxu0 %vm69_vm1, %v37_v9  ;;  %v49_v18 = vld [vmem:[%s674_s0 + $0x70] sm:$0xff]  ;;  %v50_v20 = vld [vmem:[%s674_s0 + $0x78] sm:$0xff] }
   0xa   :  { %433 = vmatprep.mubr.msk.f32.mxu1 %vm69_vm1, %v45_v10  ;;  %v52_v21 = vld [vmem:[#allocation2 + $0x8] sm:$0xff]  ;;  %v51_v23 = vld [vmem:[#allocation2] sm:$0xff]  ;;  %v54_v33 = vld [vmem:[#allocation2 + $0x18] sm:$0xff] }
   0xb   :  { %v53_v35 = vld [vmem:[#allocation2 + $0x10] sm:$0xff]  ;;  %v56_v45 = vld [vmem:[#allocation2 + $0x28] sm:$0xff]  ;;  %v55_v47 = vld [vmem:[#allocation2 + $0x20] sm:$0xff] }
   0xc   :  { %422 = vmatmul.mubr.msk.f32.gmra.mrb[2].mxu0 %vm69_vm1, %v38_v11  ;;  %v581_v49 = vld [vmem:[%s675_s2] ss:$0 sm:$0xff]  ;;  %v58_v56 = vld [vmem:[#allocation2 + $0x38] sm:$0xff]  ;;  %v57_v62 = vld [vmem:[#allocation2 + $0x30] sm:$0xff] }
   0xd   :  { %434 = vmatmul.mubr.msk.f32.gmra.mrb[2].mxu1 %vm69_vm1, %v46_v12  ;;  %424 = vmatprep.mubr.msk.f32.mxu0 %vm69_vm1, %v39_v13  ;;  %v60_v22 = vld [vmem:[#allocation2 + $0x48] sm:$0xff]  ;;  %v59_v24 = vld [vmem:[#allocation2 + $0x40] sm:$0xff] }
   0xe   :  { %436 = vmatprep.mubr.msk.f32.mxu1 %vm69_vm1, %v47_v14  ;;  %v62_v34 = vld [vmem:[#allocation2 + $0x58] sm:$0xff]  ;;  %v61_v36 = vld [vmem:[#allocation2 + $0x50] sm:$0xff] }
   0xf   :  { %v64_v46 = vld [vmem:[#allocation2 + $0x68] sm:$0xff]  ;;  %v63_v48 = vld [vmem:[#allocation2 + $0x60] sm:$0xff] }
  0x10   :  { %425 = vmatmul.mubr.msk.f32.gmra.mrb[4].mxu0 %vm69_vm1, %v40_v15  ;;  %v66_v57 = vld [vmem:[#allocation2 + $0x78] sm:$0xff]  ;;  %v65_v3 = vld [vmem:[#allocation2 + $0x70] sm:$0xff] }
  0x11   :  { %437 = vmatmul.mubr.msk.f32.gmra.mrb[4].mxu1 %vm69_vm1, %v48_v16  ;;  %427 = vmatprep.mubr.msk.f32.mxu0 %vm69_vm1, %v41_v17 }
  0x12   :  { %439 = vmatprep.mubr.msk.f32.mxu1 %vm69_vm1, %v49_v18 }
  0x14   :  { %428 = vmatmul.mubr.msk.f32.gmra.mrb[6].mxu0 %vm69_vm1, %v42_v19 }
  0x15   :  { %440 = vmatmul.mubr.msk.f32.gmra.mrb[6].mxu1 %vm69_vm1, %v50_v20 }
  0xdb   :  { %v420_v25 = vpop.f32.mrb[0].mxu0 }
  0xdc   :  { %v432_v26 = vpop.f32.mrb[0].mxu1  ;;  %v268_v27 = vadd.f32 %v420_v25, %v52_v21  ;;  %v188_v29 = vpop.f32.mrb[1].mxu0 }
  0xdd   :  { %v276_v28 = vadd.f32 %v432_v26, %v60_v22  ;;  %v228_v30 = vpop.f32.mrb[1].mxu1  ;;  %v267_v31 = vadd.f32 %v188_v29, %v51_v23 }
  0xde   :  { %v275_v32 = vadd.f32 %v228_v30, %v59_v24  ;;  %285 = vst.msk [vmem:[#allocation2 + $0x8] sm:$0xff] %vm18_vm2, %v268_v27 }
  0xdf   :  { %293 = vst.msk [vmem:[#allocation2 + $0x48] sm:$0xff] %vm18_vm2, %v276_v28  ;;  %284 = vst.msk [vmem:[#allocation2] sm:$0xff] %vm18_vm2, %v267_v31  ;;  %v423_v37 = vpop.f32.mrb[2].mxu0 }
  0xe0   :  { %292 = vst.msk [vmem:[#allocation2 + $0x40] sm:$0xff] %vm18_vm2, %v275_v32  ;;  %v435_v38 = vpop.f32.mrb[2].mxu1  ;;  %v270_v39 = vadd.f32 %v423_v37, %v54_v33  ;;  %v198_v41 = vpop.f32.mrb[3].mxu0 }
  0xe1   :  { %v278_v40 = vadd.f32 %v435_v38, %v62_v34  ;;  %v238_v42 = vpop.f32.mrb[3].mxu1  ;;  %v269_v43 = vadd.f32 %v198_v41, %v53_v35 }
  0xe2   :  { %v277_v44 = vadd.f32 %v238_v42, %v61_v36  ;;  %287 = vst.msk [vmem:[#allocation2 + $0x18] sm:$0xff] %vm18_vm2, %v270_v39 }
  0xe3   :  { %295 = vst.msk [vmem:[#allocation2 + $0x58] sm:$0xff] %vm18_vm2, %v278_v40  ;;  %286 = vst.msk [vmem:[#allocation2 + $0x10] sm:$0xff] %vm18_vm2, %v269_v43  ;;  %v426_v50 = vpop.f32.mrb[4].mxu0 }
  0xe4   :  { %294 = vst.msk [vmem:[#allocation2 + $0x50] sm:$0xff] %vm18_vm2, %v277_v44  ;;  %v438_v51 = vpop.f32.mrb[4].mxu1  ;;  %v272_v52 = vadd.f32 %v426_v50, %v56_v45  ;;  %v208_v54 = vpop.f32.mrb[5].mxu0 }
  0xe5   :  { %v280_v53 = vadd.f32 %v438_v51, %v64_v46  ;;  %v248_v55 = vpop.f32.mrb[5].mxu1  ;;  %v304_v58 = vld [vmem:[#allocation2 + $0x8] sm:$0xff]  ;;  %v271_v60 = vadd.f32 %v208_v54, %v55_v47 }
  0xe6   :  { %v312_v59 = vld [vmem:[#allocation2 + $0x48] sm:$0xff]  ;;  %v279_v61 = vadd.f32 %v248_v55, %v63_v48  ;;  %v327_v63 = vadd.f32 %v581_v49, %v304_v58  ;;  %v303_v1 = vld [vmem:[#allocation2] sm:$0xff]  ;;  %289 = vst.msk [vmem:[#allocation2 + $0x28] sm:$0xff] %vm18_vm2, %v272_v52 }
  0xe7   :  { %v335_v0 = vadd.f32 %v581_v49, %v312_v59  ;;  %v311_v2 = vld [vmem:[#allocation2 + $0x40] sm:$0xff]  ;;  %297 = vst.msk [vmem:[#allocation2 + $0x68] sm:$0xff] %vm18_vm2, %v280_v53  ;;  %v326_v4 = vadd.f32 %v581_v49, %v303_v1  ;;  %288 = vst.msk [vmem:[#allocation2 + $0x20] sm:$0xff] %vm18_vm2, %v271_v60  ;;  %v429_v6 = vpop.f32.mrb[6].mxu0 }
  0xe8   :  { %v334_v5 = vadd.f32 %v581_v49, %v311_v2  ;;  %296 = vst.msk [vmem:[#allocation2 + $0x60] sm:$0xff] %vm18_vm2, %v279_v61  ;;  %v441_v7 = vpop.f32.mrb[6].mxu1  ;;  %v343_v8 = vmax.f32 %v327_v63, 0.0  ;;  %v274_v10 = vadd.f32 %v429_v6, %v58_v56  ;;  %v218_v12 = vpop.f32.mrb[7].mxu0 }
  0xe9   :  { %v351_v9 = vmax.f32 %v335_v0, 0.0  ;;  %v282_v11 = vadd.f32 %v441_v7, %v66_v57  ;;  %v258_v13 = vpop.f32.mrb[7].mxu1  ;;  %v342_v14 = vmax.f32 %v326_v4, 0.0  ;;  %v306_v16 = vld [vmem:[#allocation2 + $0x18] sm:$0xff]  ;;  %v273_v18 = vadd.f32 %v218_v12, %v57_v62 }
  0xea   :  { %v350_v15 = vmax.f32 %v334_v5, 0.0  ;;  %v314_v17 = vld [vmem:[#allocation2 + $0x58] sm:$0xff]  ;;  %v281_v19 = vadd.f32 %v258_v13, %v65_v3  ;;  %359 = vst.msk [vmem:[%s676_s3 + $0x8] sm:$0xff] %vm18_vm2, %v343_v8  ;;  %v329_v20 = vadd.f32 %v581_v49, %v306_v16  ;;  %v305_v22 = vld [vmem:[#allocation2 + $0x10] sm:$0xff]  ;;  %291 = vst.msk [vmem:[#allocation2 + $0x38] sm:$0xff] %vm18_vm2, %v274_v10 }
  0xeb   :  { %367 = vst.msk [vmem:[%s676_s3 + $0x48] sm:$0xff] %vm18_vm2, %v351_v9  ;;  %v337_v21 = vadd.f32 %v581_v49, %v314_v17  ;;  %v313_v23 = vld [vmem:[#allocation2 + $0x50] sm:$0xff]  ;;  %299 = vst.msk [vmem:[#allocation2 + $0x78] sm:$0xff] %vm18_vm2, %v282_v11  ;;  %v328_v24 = vadd.f32 %v581_v49, %v305_v22 }
  0xec   :  { %358 = vst.msk [vmem:[%s676_s3] sm:$0xff] %vm18_vm2, %v342_v14  ;;  %366 = vst.msk [vmem:[%s676_s3 + $0x40] sm:$0xff] %vm18_vm2, %v350_v15  ;;  %v336_v25 = vadd.f32 %v581_v49, %v313_v23  ;;  %v345_v26 = vmax.f32 %v329_v20, 0.0 }
  0xed   :  { %290 = vst.msk [vmem:[#allocation2 + $0x30] sm:$0xff] %vm18_vm2, %v273_v18  ;;  %298 = vst.msk [vmem:[#allocation2 + $0x70] sm:$0xff] %vm18_vm2, %v281_v19  ;;  %v353_v27 = vmax.f32 %v337_v21, 0.0  ;;  %v344_v28 = vmax.f32 %v328_v24, 0.0  ;;  %v308_v30 = vld [vmem:[#allocation2 + $0x28] sm:$0xff] }
  0xee   :  { %v352_v29 = vmax.f32 %v336_v25, 0.0  ;;  %v316_v31 = vld [vmem:[#allocation2 + $0x68] sm:$0xff]  ;;  %361 = vst.msk [vmem:[%s676_s3 + $0x18] sm:$0xff] %vm18_vm2, %v345_v26  ;;  %v331_v32 = vadd.f32 %v581_v49, %v308_v30  ;;  %v307_v34 = vld [vmem:[#allocation2 + $0x20] sm:$0xff] }
  0xef   :  { %369 = vst.msk [vmem:[%s676_s3 + $0x58] sm:$0xff] %vm18_vm2, %v353_v27  ;;  %v339_v33 = vadd.f32 %v581_v49, %v316_v31  ;;  %v315_v35 = vld [vmem:[#allocation2 + $0x60] sm:$0xff]  ;;  %360 = vst.msk [vmem:[%s676_s3 + $0x10] sm:$0xff] %vm18_vm2, %v344_v28  ;;  %v330_v36 = vadd.f32 %v581_v49, %v307_v34 }
  0xf0   :  { %368 = vst.msk [vmem:[%s676_s3 + $0x50] sm:$0xff] %vm18_vm2, %v352_v29  ;;  %v338_v37 = vadd.f32 %v581_v49, %v315_v35  ;;  %v347_v38 = vmax.f32 %v331_v32, 0.0 }
  0xf1   :  { %v355_v39 = vmax.f32 %v339_v33, 0.0  ;;  %v346_v40 = vmax.f32 %v330_v36, 0.0  ;;  %v310_v42 = vld [vmem:[#allocation2 + $0x38] sm:$0xff] }
  0xf2   :  { %v354_v41 = vmax.f32 %v338_v37, 0.0  ;;  %v318_v43 = vld [vmem:[#allocation2 + $0x78] sm:$0xff]  ;;  %363 = vst.msk [vmem:[%s676_s3 + $0x28] sm:$0xff] %vm18_vm2, %v347_v38  ;;  %v333_v44 = vadd.f32 %v581_v49, %v310_v42 }
  0xf3   :  { %371 = vst.msk [vmem:[%s676_s3 + $0x68] sm:$0xff] %vm18_vm2, %v355_v39  ;;  %v341_v45 = vadd.f32 %v581_v49, %v318_v43  ;;  %362 = vst.msk [vmem:[%s676_s3 + $0x20] sm:$0xff] %vm18_vm2, %v346_v40 }
  0xf4   :  { %v309_v46 = vld [vmem:[#allocation2 + $0x30] sm:$0xff]  ;;  %370 = vst.msk [vmem:[%s676_s3 + $0x60] sm:$0xff] %vm18_vm2, %v354_v41  ;;  %v349_v51 = vmax.f32 %v333_v44, 0.0 }
  0xf5   :  { %v317_v47 = vld [vmem:[#allocation2 + $0x70] sm:$0xff]  ;;  %v332_v48 = vadd.f32 %v581_v49, %v309_v46  ;;  %v357_v52 = vmax.f32 %v341_v45, 0.0 }
  0xf6   :  { %v340_v50 = vadd.f32 %v581_v49, %v317_v47  ;;  %365 = vst.msk [vmem:[%s676_s3 + $0x38] sm:$0xff] %vm18_vm2, %v349_v51 }
  0xf7   :  { %v348_v53 = vmax.f32 %v332_v48, 0.0  ;;  %373 = vst.msk [vmem:[%s676_s3 + $0x78] sm:$0xff] %vm18_vm2, %v357_v52 }
  0xf8   :  { %v356_v54 = vmax.f32 %v340_v50, 0.0 }
  0xf9   :  { %364 = vst.msk [vmem:[%s676_s3 + $0x30] sm:$0xff] %vm18_vm2, %v348_v53 }
  0xfa   :  { %372 = vst.msk [vmem:[%s676_s3 + $0x70] sm:$0xff] %vm18_vm2, %v356_v54 }

// kernel: encoder_forward.15
= control target key start
LH: loop header
LB: loop body
LE: loop exit
PB: predicated region body
PF: predicated region fallthrough
CT: control target
= control target key end

     0   :  { %vm36_vm0 = vcmask 293888   ;;  %vm18_vm1 = vcmask 31744   ;;  %v223_v3 = vmov 0.0   ;;  %vm49_vm2 = vcmask 1043456   ;;  %s302_s1 = inlined_call_operand.vmem [shape: f32[36,4], index: 1, kind: input, shape index: {}]   ;;  %s303_s0 = inlined_call_operand.vmem [shape: f32[32,36], index: 0, kind: input, shape index: {}]   ;;  %s304_s2 = inlined_call_operand.vmem [shape: f32[1,4], index: 2, kind: input, shape index: {}]   ;;  %s305_s3 = inlined_call_operand.vmem [shape: f32[32,4], index: 3, kind: output, shape index: {}]  }
   0x1   :  { %v31_v0 = vld [vmem:[%s302_s1] sm:$0xff]  ;;  %v32_v1 = vld [vmem:[%s302_s1 + $0x8] sm:$0xff]  ;;  %v33_v2 = vld [vmem:[%s302_s1 + $0x10] sm:$0xff]  ;;  %20 = vst.msk [vmem:[#allocation2 + $0x8] sm:$0xff] %vm18_vm1, %v223_v3 }
   0x2   :  { %19 = vst.msk [vmem:[#allocation2] sm:$0xff] %vm18_vm1, %v223_v3  ;;  %21 = vst.msk [vmem:[#allocation2 + $0x10] sm:$0xff] %vm18_vm1, %v223_v3  ;;  %v208_v4 = vpack.c.bf16 %v32_v1, %v31_v0  ;;  %v34_v5 = vld [vmem:[%s302_s1 + $0x18] sm:$0xff]  ;;  %v23_v6 = vld [vmem:[%s303_s0] sm:$0xff] }
   0x3   :  { %22 = vst.msk [vmem:[#allocation2 + $0x18] sm:$0xff] %vm18_vm1, %v223_v3  ;;  %v212_v7 = vpack.c.bf16 %v34_v5, %v33_v2  ;;  %202 = vmatprep.mubr.msk.f32.mxu0 %vm36_vm0, %v23_v6  ;;  %v25_v8 = vld [vmem:[%s303_s0 + $0x10] sm:$0xff]  ;;  %v35_v9 = vld [vmem:[%s302_s1 + $0x20] sm:$0xf]  ;;  %v24_v10 = vld [vmem:[%s303_s0 + $0x8] sm:$0xff] }
   0x4   :  { %209 = vmatprep.subr.bf16.mxu0 %v208_v4  ;;  %216 = vmatprep.subr.bf16.mxu1 %v208_v4  ;;  %v26_v11 = vld [vmem:[%s303_s0 + $0x18] sm:$0xff]  ;;  %v182_v24 = vld [vmem:[%s304_s2] ss:$0 sm:$0xff] }
   0x5   :  { %211 = vmatpush3.bf16.msra.mxu0 %v208_v4  ;;  %219 = vmatpush3.bf16.msra.mxu1 %v208_v4 }
   0x6   :  { %213 = vmatprep.subr.bf16.mxu0 %v212_v7  ;;  %217 = vmatprep.subr.bf16.mxu1 %v212_v7 }
   0x7   :  { %205 = vmatprep.mubr.msk.f32.mxu1 %vm36_vm0, %v25_v8 }
   0x8   :  { %v28_v12 = vld [vmem:[#allocation2 + $0x8] sm:$0xff] }
   0x9   :  { %215 = vmatpush3.bf16.msra.mxu0 %v212_v7  ;;  %220 = vmatpush3.bf16.msra.mxu1 %v212_v7  ;;  %v27_v14 = vld [vmem:[#allocation2] sm:$0xff]  ;;  %v29_v15 = vld [vmem:[#allocation2 + $0x10] sm:$0xff] }
   0xa   :  { %200 = vmatprep.subr.msk.mxu0 %vm49_vm2, %v35_v9  ;;  %218 = vmatprep.subr.msk.mxu1 %vm49_vm2, %v35_v9  ;;  %v30_v13 = vld [vmem:[#allocation2 + $0x18] sm:$0xff] }
   0xd   :  { %201 = vmatpush3.msk.msra.mxu0 %vm49_vm2, %v35_v9  ;;  %221 = vmatpush3.msk.msra.mxu1 %vm49_vm2, %v35_v9 }
   0xe   :  { %203 = vmatmul.mubr.msk.f32.vlgmr.msra.gmra.mrb[0].mxu0 %vm36_vm0, %v24_v10  ;;  %206 = vmatmul.mubr.msk.f32.vlgmr.msra.gmra.mrb[0].mxu1 %vm36_vm0, %v26_v11 }
  0xe1   :  { %v204_v16 = vpop.f32.mrb[0].mxu0  ;;  %v207_v17 = vpop.f32.mrb[0].mxu1 }
  0xe2   :  { %v139_v18 = vadd.f32 %v204_v16, %v28_v12  ;;  %v141_v19 = vadd.f32 %v207_v17, %v30_v13  ;;  %v119_v20 = vpop.f32.mrb[1].mxu0  ;;  %v129_v21 = vpop.f32.mrb[1].mxu1 }
  0xe3   :  { %v138_v22 = vadd.f32 %v119_v20, %v27_v14  ;;  %v140_v23 = vadd.f32 %v129_v21, %v29_v15 }
  0xe4   :  { %144 = vst.msk [vmem:[#allocation2 + $0x8] sm:$0xff] %vm18_vm1, %v139_v18  ;;  %146 = vst.msk [vmem:[#allocation2 + $0x18] sm:$0xff] %vm18_vm1, %v141_v19 }
  0xe5   :  { %143 = vst.msk [vmem:[#allocation2] sm:$0xff] %vm18_vm1, %v138_v22  ;;  %145 = vst.msk [vmem:[#allocation2 + $0x10] sm:$0xff] %vm18_vm1, %v140_v23 }
  0xeb   :  { %v151_v25 = vld [vmem:[#allocation2 + $0x8] sm:$0xff]  ;;  %v153_v26 = vld [vmem:[#allocation2 + $0x18] sm:$0xff] }
  0xec   :  { %v162_v27 = vadd.f32 %v182_v24, %v151_v25  ;;  %v164_v28 = vadd.f32 %v182_v24, %v153_v26  ;;  %v150_v29 = vld [vmem:[#allocation2] sm:$0xff]  ;;  %v152_v30 = vld [vmem:[#allocation2 + $0x10] sm:$0xff] }
  0xed   :  { %v161_v31 = vadd.f32 %v182_v24, %v150_v29  ;;  %v163_v32 = vadd.f32 %v182_v24, %v152_v30 }
  0xee   :  { %v166_v33 = vmax.f32 %v162_v27, 0.0  ;;  %v168_v34 = vmax.f32 %v164_v28, 0.0 }
  0xef   :  { %v165_v35 = vmax.f32 %v161_v31, 0.0  ;;  %v167_v36 = vmax.f32 %v163_v32, 0.0 }
  0xf0   :  { %170 = vst.msk [vmem:[%s305_s3 + $0x8] sm:$0xff] %vm18_vm1, %v166_v33  ;;  %172 = vst.msk [vmem:[%s305_s3 + $0x18] sm:$0xff] %vm18_vm1, %v168_v34 }
  0xf1   :  { %169 = vst.msk [vmem:[%s305_s3] sm:$0xff] %vm18_vm1, %v165_v35  ;;  %171 = vst.msk [vmem:[%s305_s3 + $0x10] sm:$0xff] %vm18_vm1, %v167_v36 }

// kernel: encoder_forward.16
= control target key start
LH: loop header
LB: loop body
LE: loop exit
PB: predicated region body
PF: predicated region fallthrough
CT: control target
= control target key end

     0   :  { %vm21_vm0 = vcmask 261120   ;;  %v141_v0 = vmov 0.0|0.0   ;;  %v142_v3 = vmov 0.0   ;;  %vm143_vm1 = vmmov 0   ;;  %s190_s1 = inlined_call_operand.vmem [shape: f32[16,32], index: 1, kind: input, shape index: {}]   ;;  %s191_s0 = inlined_call_operand.vmem [shape: f32[8,16], index: 0, kind: input, shape index: {}]   ;;  %s192_s2 = inlined_call_operand.vmem [shape: f32[1,32], index: 2, kind: input, shape index: {}]   ;;  %s193_s3 = inlined_call_operand.vmem [shape: f32[8,32], index: 3, kind: input, shape index: {}]   ;;  %s194_s4 = inlined_call_operand.vmem [shape: f32[8,32], index: 4, kind: output, shape index: {}]  }
   0x1   :  { %135 = vmatprep.subr.bf16.mxu0 %v141_v0  ;;  %v25_v1 = vld [vmem:[%s190_s1] sm:$0xff]  ;;  %v26_v2 = vld [vmem:[%s190_s1 + $0x8] sm:$0xff]  ;;  %22 = vst.msk [vmem:[#allocation2] sm:$0xff] %vm21_vm0, %v142_v3  ;;  %132 = vmatprep.mubr.msk.f32.mxu0 %vm143_vm1, %v142_v3  ;;  %vm27_vm2 = vcmask 130048  }
   0x2   :  { %v136_v4 = vpack.c.bf16 %v26_v2, %v25_v1  ;;  %v23_v5 = vld [vmem:[%s191_s0] sm:$0xff] }
   0x3   :  { %v124_v10 = vld [vmem:[%s192_s2] ss:$0 sm:$0xff] }
   0x4   :  { %137 = vmatpush3.bf16.msra.mxu0 %v136_v4  ;;  %v116_v12 = vld [vmem:[%s193_s3] sm:$0xff] }
   0x7   :  { %133 = vmatmul.mubr.msk.f32.vlgmr.msra.gmra.mrb[0].mxu0 %vm27_vm2, %v23_v5 }
   0x8   :  { %v24_v6 = vld [vmem:[#allocation2] sm:$0xff] }
  0xda   :  { %v97_v7 = vpop.f32.mrb[0].mxu0 }
  0xdb   :  { %v101_v8 = vadd.f32 %v97_v7, %v24_v6  ;;  %v134_v9 = vpop.f32.mrb[1].mxu0 }
  0xdd   :  { %103 = vst.msk [vmem:[#allocation2] sm:$0xff] %vm21_vm0, %v101_v8 }
  0xe4   :  { %v107_v11 = vld [vmem:[#allocation2] sm:$0xff] }
  0xe5   :  { %v115_v13 = vadd.f32 %v124_v10, %v107_v11 }
  0xe7   :  { %v117_v14 = vadd.f32 %v116_v12, %v115_v13 }
  0xe9   :  { %118 = vst.msk [vmem:[%s194_s4] sm:$0xff] %vm21_vm0, %v117_v14 }

// kernel: encoder_forward.17
= control target key start
LH: loop header
LB: loop body
LE: loop exit
PB: predicated region body
PF: predicated region fallthrough
CT: control target
= control target key end

     0   :  { %vm33_vm0 = vcmask 261120   ;;  %v395_v0 = vmov 0.0|0.0   ;;  %vm396_vm1 = vmmov 0   ;;  %v397_v4 = vmov 0.0   ;;  %s520_s1 = inlined_call_operand.vmem [shape: f32[32,32], index: 1, kind: input, shape index: {}]   ;;  %s521_s2 = inlined_call_operand.vmem [shape: f32[32,32], index: 2, kind: input, shape index: {}]   ;;  %s522_s3 = inlined_call_operand.vmem [shape: f32[32,32], index: 3, kind: input, shape index: {}]   ;;  %s523_s0 = inlined_call_operand.vmem [shape: f32[8,32], index: 0, kind: input, shape index: {}]   ;;  %s524_s4 = inlined_call_operand.vmem [shape: f32[1,32], index: 4, kind: input, shape index: {}]   ;;  %s525_s5 = inlined_call_operand.vmem [shape: f32[1,32], index: 5, kind: input, shape index: {}]   ;;  %s526_s7 = inlined_call_operand.vmem [shape: f32[8,32], index: 7, kind: output, shape index: {0}]   ;;  %s527_s8 = inlined_call_operand.vmem [shape: f32[8,32], index: 8, kind: output, shape index: {1}]   ;;  %s528_s6 = inlined_call_operand.vmem [shape: f32[1,32], index: 6, kind: input, shape index: {}]   ;;  %s529_s9 = inlined_call_operand.vmem [shape: f32[8,32], index: 9, kind: output, shape index: {2}]  }
   0x1   :  { %374 = vmatprep.subr.bf16.mxu0 %v395_v0  ;;  %v39_v1 = vld [vmem:[%s520_s1] sm:$0xff]  ;;  %v40_v2 = vld [vmem:[%s520_s1 + $0x8] sm:$0xff]  ;;  %v41_v3 = vld [vmem:[%s520_s1 + $0x10] sm:$0xff]  ;;  %349 = vmatprep.mubr.msk.f32.mxu0 %vm396_vm1, %v397_v4  ;;  %34 = vst.msk [vmem:[#allocation2] sm:$0xff] %vm33_vm0, %v397_v4 }
   0x2   :  { %35 = vst.msk [vmem:[#allocation2 + $0x8] sm:$0xff] %vm33_vm0, %v397_v4  ;;  %36 = vst.msk [vmem:[#allocation2 + $0x10] sm:$0xff] %vm33_vm0, %v397_v4  ;;  %v375_v5 = vpack.c.bf16 %v40_v2, %v39_v1  ;;  %v42_v6 = vld [vmem:[%s520_s1 + $0x18] sm:$0xff]  ;;  %380 = vmatprep.subr.bf16.mxu1 %v395_v0  ;;  %v121_v7 = vld [vmem:[%s521_s2] sm:$0xff]  ;;  %360 = vmatprep.mubr.msk.f32.mxu1 %vm396_vm1, %v397_v4 }
   0x3   :  { %v122_v8 = vld [vmem:[%s521_s2 + $0x8] sm:$0xff]  ;;  %v378_v9 = vpack.c.bf16 %v42_v6, %v41_v3  ;;  %v123_v11 = vld [vmem:[%s521_s2 + $0x10] sm:$0xff]  ;;  %v124_v12 = vld [vmem:[%s521_s2 + $0x18] sm:$0xff] }
   0x4   :  { %376 = vmatpush3.bf16.msra.mxu0 %v375_v5  ;;  %v381_v10 = vpack.c.bf16 %v122_v8, %v121_v7  ;;  %v199_v13 = vld [vmem:[%s522_s3] sm:$0xff]  ;;  %v200_v14 = vld [vmem:[%s522_s3 + $0x8] sm:$0xff]  ;;  %v384_v15 = vpack.c.bf16 %v124_v12, %v123_v11  ;;  %v201_v18 = vld [vmem:[%s522_s3 + $0x10] sm:$0xff] }
   0x5   :  { %377 = vmatprep.subr.bf16.mxu0 %v395_v0  ;;  %v37_v16 = vld [vmem:[%s523_s0] sm:$0xff]  ;;  %v387_v17 = vpack.c.bf16 %v200_v14, %v199_v13  ;;  %v202_v19 = vld [vmem:[%s522_s3 + $0x18] sm:$0xff] }
   0x6   :  { %382 = vmatpush3.bf16.msra.mxu1 %v381_v10  ;;  %v390_v20 = vpack.c.bf16 %v202_v19, %v201_v18  ;;  %v323_v30 = vld [vmem:[%s524_s4] ss:$0 sm:$0xff] }
   0x7   :  { %383 = vmatprep.subr.bf16.mxu1 %v395_v0  ;;  %v324_v35 = vld [vmem:[%s525_s5] ss:$0 sm:$0xff] }
   0x8   :  { %379 = vmatpush3.bf16.msra.mxu0 %v378_v9  ;;  %v38_v21 = vld [vmem:[#allocation2] sm:$0xff] }
   0x9   :  { %386 = vmatprep.subr.bf16.mxu0 %v395_v0  ;;  %v120_v23 = vld [vmem:[#allocation2 + $0x8] sm:$0xff]  ;;  %v198_v29 = vld [vmem:[#allocation2 + $0x10] sm:$0xff]  ;;  %v325_v39 = vld [vmem:[%s528_s6] ss:$0 sm:$0xff] }
   0xa   :  { %385 = vmatpush3.bf16.msra.mxu1 %v384_v15 }
   0xb   :  { %350 = vmatmul.mubr.msk.f32.vlgmr.msra.gmra.mrb[0].mxu0 %vm33_vm0, %v37_v16 }
   0xc   :  { %388 = vmatpush3.bf16.msra.mxu0 %v387_v17  ;;  %371 = vmatprep.mubr.msk.f32.mxu0 %vm396_vm1, %v397_v4 }
   0xd   :  { %389 = vmatprep.subr.bf16.mxu0 %v395_v0  ;;  %361 = vmatmul.mubr.msk.f32.vlgmr.msra.gmra.mrb[0].mxu1 %vm33_vm0, %v37_v16 }
  0x10   :  { %391 = vmatpush3.bf16.msra.mxu0 %v390_v20 }
  0x13   :  { %372 = vmatmul.mubr.msk.f32.vlgmr.msra.gmra.mrb[2].mxu0 %vm33_vm0, %v37_v16 }
  0xde   :  { %v113_v22 = vpop.f32.mrb[0].mxu0 }
  0xdf   :  { %v117_v24 = vadd.f32 %v113_v22, %v38_v21  ;;  %v351_v25 = vpop.f32.mrb[1].mxu0 }
  0xe0   :  { %v191_v26 = vpop.f32.mrb[0].mxu1 }
  0xe1   :  { %118 = vst.msk [vmem:[#allocation2] sm:$0xff] %vm33_vm0, %v117_v24  ;;  %v195_v27 = vadd.f32 %v191_v26, %v120_v23  ;;  %v362_v28 = vpop.f32.mrb[1].mxu1 }
  0xe3   :  { %196 = vst.msk [vmem:[#allocation2 + $0x8] sm:$0xff] %vm33_vm0, %v195_v27 }
  0xe6   :  { %v269_v31 = vpop.f32.mrb[2].mxu0 }
  0xe7   :  { %v273_v32 = vadd.f32 %v269_v31, %v198_v29  ;;  %v373_v33 = vpop.f32.mrb[3].mxu0 }
  0xe8   :  { %v278_v34 = vld [vmem:[#allocation2] sm:$0xff] }
  0xe9   :  { %v286_v36 = vadd.f32 %v323_v30, %v278_v34  ;;  %274 = vst.msk [vmem:[#allocation2 + $0x10] sm:$0xff] %vm33_vm0, %v273_v32 }
  0xea   :  { %v288_v37 = vld [vmem:[#allocation2 + $0x8] sm:$0xff] }
  0xeb   :  { %287 = vst.msk [vmem:[%s526_s7] sm:$0xff] %vm33_vm0, %v286_v36  ;;  %v296_v38 = vadd.f32 %v324_v35, %v288_v37 }
  0xed   :  { %297 = vst.msk [vmem:[%s527_s8] sm:$0xff] %vm33_vm0, %v296_v38 }
  0xf0   :  { %v298_v40 = vld [vmem:[#allocation2 + $0x10] sm:$0xff] }
  0xf1   :  { %v306_v41 = vadd.f32 %v325_v39, %v298_v40 }
  0xf3   :  { %307 = vst.msk [vmem:[%s529_s9] sm:$0xff] %vm33_vm0, %v306_v41 }

// kernel: encoder_forward.19
= control target key start
LH: loop header
LB: loop body
LE: loop exit
PB: predicated region body
PF: predicated region fallthrough
CT: control target
= control target key end

     0   :  { %vm27_vm0 = vcmask 261120   ;;  %v191_v0 = vmov 0.0|0.0   ;;  %v192_v4 = vmov 0.0   ;;  %vm193_vm1 = vmmov 0   ;;  %s265_s1 = inlined_call_operand.vmem [shape: f32[32,32], index: 1, kind: input, shape index: {}]   ;;  %s266_s0 = inlined_call_operand.vmem [shape: f32[8,32], index: 0, kind: input, shape index: {}]   ;;  %s267_s2 = inlined_call_operand.vmem [shape: f32[1,32], index: 2, kind: input, shape index: {}]   ;;  %s268_s3 = inlined_call_operand.vmem [shape: f32[8,32], index: 3, kind: input, shape index: {}]   ;;  %s269_s4 = inlined_call_operand.vmem [shape: f32[1,32], index: 4, kind: input, shape index: {}]   ;;  %s270_s5 = inlined_call_operand.vmem [shape: f32[1,32], index: 5, kind: input, shape index: {}]   ;;  %s271_s6 = inlined_call_operand.vmem [shape: f32[8,32], index: 6, kind: output, shape index: {}]  }
   0x1   :  { %180 = vmatprep.subr.bf16.mxu0 %v191_v0  ;;  %v31_v1 = vld [vmem:[%s265_s1] sm:$0xff]  ;;  %v32_v2 = vld [vmem:[%s265_s1 + $0x8] sm:$0xff]  ;;  %v33_v3 = vld [vmem:[%s265_s1 + $0x10] sm:$0xff]  ;;  %28 = vst.msk [vmem:[#allocation2] sm:$0xff] %vm27_vm0, %v192_v4  ;;  %177 = vmatprep.mubr.msk.f32.mxu0 %vm193_vm1, %v192_v4 }
   0x2   :  { %v181_v5 = vpack.c.bf16 %v32_v2, %v31_v1  ;;  %v34_v6 = vld [vmem:[%s265_s1 + $0x18] sm:$0xff]  ;;  %v29_v8 = vld [vmem:[%s266_s0] sm:$0xff] }
   0x3   :  { %v184_v7 = vpack.c.bf16 %v34_v6, %v33_v3  ;;  %v161_v13 = vld [vmem:[%s267_s2] ss:$0 sm:$0xff] }
   0x4   :  { %182 = vmatpush3.bf16.msra.mxu0 %v181_v5  ;;  %v123_v15 = vld [vmem:[%s268_s3] sm:$0xff] }
   0x5   :  { %183 = vmatprep.subr.bf16.mxu0 %v191_v0  ;;  %v162_v28 = vld [vmem:[%s269_s4] ss:$0 sm:$0xff] }
   0x6   :  { %v163_v30 = vld [vmem:[%s270_s5] ss:$0 sm:$0xff] }
   0x8   :  { %185 = vmatpush3.bf16.msra.mxu0 %v184_v7  ;;  %v30_v9 = vld [vmem:[#allocation2] sm:$0xff] }
   0xb   :  { %178 = vmatmul.mubr.msk.f32.vlgmr.msra.gmra.mrb[0].mxu0 %vm27_vm0, %v29_v8 }
  0xde   :  { %v105_v10 = vpop.f32.mrb[0].mxu0 }
  0xdf   :  { %v109_v11 = vadd.f32 %v105_v10, %v30_v9  ;;  %v179_v12 = vpop.f32.mrb[1].mxu0 }
  0xe1   :  { %110 = vst.msk [vmem:[#allocation2] sm:$0xff] %vm27_vm0, %v109_v11 }
  0xe8   :  { %v114_v14 = vld [vmem:[#allocation2] sm:$0xff] }
  0xe9   :  { %v122_v16 = vadd.f32 %v161_v13, %v114_v14 }
  0xeb   :  { %v124_v17 = vadd.f32 %v123_v15, %v122_v16 }
  0xed   :  { %v125_v18 = vsel %vm27_vm0, %v124_v17, 0.0 }
  0xee   :  { %126 = vadd.xlane.f32.xlu0 %v125_v18 }
 0x17b   :  { %v127_v19 = vpop.xlane.xlu0 %126 }
 0x17c   :  { %v129_v20 = vmul.f32 0.03125, %v127_v19 }
 0x17e   :  { %v130_v21 = vsub.f32 %v124_v17, %v129_v20 }
 0x180   :  { %v131_v22 = vmul.f32 %v130_v21, %v130_v21 }
 0x182   :  { %v132_v23 = vsel %vm27_vm0, %v131_v22, 0.0 }
 0x183   :  { %133 = vadd.xlane.f32.xlu0 %v132_v23 }
 0x210   :  { %v134_v24 = vpop.xlane.xlu0 %133 }
 0x211   :  { %v135_v25 = vmul.f32 0.03125, %v134_v24 }
 0x213   :  { %v136_v26 = vadd.f32 1e-06, %v135_v25 }
 0x215   :  { %189 = vrsqrt.f32 %v136_v26 }
 0x21f   :  { %v190_v27 = vpop.eup %189 }
 0x220   :  { %v138_v29 = vmul.f32 %v190_v27, %v130_v21 }
 0x222   :  { %v146_v31 = vmul.f32 %v162_v28, %v138_v29 }
 0x224   :  { %v154_v32 = vadd.f32 %v163_v30, %v146_v31 }
 0x226   :  { %155 = vst.msk [vmem:[%s271_s6] sm:$0xff] %vm27_vm0, %v154_v32 }

// kernel: encoder_forward.20
= control target key start
LH: loop header
LB: loop body
LE: loop exit
PB: predicated region body
PF: predicated region fallthrough
CT: control target
= control target key end

     0   :  { %vm18_vm0 = vcmask 523264   ;;  %v148_v0 = vmov 0.0|0.0   ;;  %v149_v4 = vmov 0.0   ;;  %vm150_vm1 = vmmov 0   ;;  %s195_s1 = inlined_call_operand.vmem [shape: f32[32,64], index: 1, kind: input, shape index: {}]   ;;  %s196_s0 = inlined_call_operand.vmem [shape: f32[8,32], index: 0, kind: input, shape index: {}]   ;;  %s197_s2 = inlined_call_operand.vmem [shape: f32[1,64], index: 2, kind: input, shape index: {}]   ;;  %s198_s3 = inlined_call_operand.vmem [shape: f32[8,64], index: 3, kind: output, shape index: {}]  }
   0x1   :  { %139 = vmatprep.subr.bf16.mxu0 %v148_v0  ;;  %v22_v1 = vld [vmem:[%s195_s1] sm:$0xff]  ;;  %v23_v2 = vld [vmem:[%s195_s1 + $0x8] sm:$0xff]  ;;  %v24_v3 = vld [vmem:[%s195_s1 + $0x10] sm:$0xff]  ;;  %19 = vst.msk [vmem:[#allocation2] sm:$0xff] %vm18_vm0, %v149_v4  ;;  %136 = vmatprep.mubr.msk.f32.mxu0 %vm150_vm1, %v149_v4  ;;  %vm26_vm2 = vcmask 261120  }
   0x2   :  { %v140_v5 = vpack.c.bf16 %v23_v2, %v22_v1  ;;  %v25_v6 = vld [vmem:[%s195_s1 + $0x18] sm:$0xff]  ;;  %v20_v8 = vld [vmem:[%s196_s0] sm:$0xff] }
   0x3   :  { %v143_v7 = vpack.c.bf16 %v25_v6, %v24_v3  ;;  %v122_v13 = vld [vmem:[%s197_s2] ss:$0 sm:$0xff] }
   0x4   :  { %141 = vmatpush3.bf16.msra.mxu0 %v140_v5 }
   0x5   :  { %142 = vmatprep.subr.bf16.mxu0 %v148_v0 }
   0x8   :  { %144 = vmatpush3.bf16.msra.mxu0 %v143_v7  ;;  %v21_v9 = vld [vmem:[#allocation2] sm:$0xff] }
   0xb   :  { %137 = vmatmul.mubr.msk.f32.vlgmr.msra.gmra.mrb[0].mxu0 %vm26_vm2, %v20_v8 }
  0xde   :  { %v96_v10 = vpop.f32.mrb[0].mxu0 }
  0xdf   :  { %v100_v11 = vadd.f32 %v96_v10, %v21_v9  ;;  %v138_v12 = vpop.f32.mrb[1].mxu0 }
  0xe1   :  { %102 = vst.msk [vmem:[#allocation2] sm:$0xff] %vm18_vm0, %v100_v11 }
  0xe8   :  { %v106_v14 = vld [vmem:[#allocation2] sm:$0xff] }
  0xe9   :  { %v114_v15 = vadd.f32 %v122_v13, %v106_v14 }
  0xeb   :  { %v115_v16 = vmax.f32 %v114_v15, 0.0 }
  0xed   :  { %116 = vst.msk [vmem:[%s198_s3] sm:$0xff] %vm18_vm0, %v115_v16 }

// kernel: encoder_forward.18
= control target key start
LH: loop header
LB: loop body
LE: loop exit
PB: predicated region body
PF: predicated region fallthrough
CT: control target
= control target key end

     0   :  { %s1492_s15 = smov 0   ;;  %s1494_s16 = smov 0   ;;  %s1661_s0 = inlined_call_operand.vmem [shape: f32[2,4,32], index: 0, kind: input, shape index: {}]   ;;  %s1662_s1 = inlined_call_operand.vmem [shape: f32[2,4,32], index: 1, kind: input, shape index: {}]   ;;  %s1663_s2 = inlined_call_operand.vmem [shape: f32[2,4,32], index: 2, kind: input, shape index: {}]   ;;  %s1664_s3 = inlined_call_operand.vmem [shape: f32[2,1,4], index: 3, kind: input, shape index: {}]   ;;  %s1665_s4 = inlined_call_operand.vmem [shape: f32[2,4,32], index: 4, kind: output, shape index: {}]  }
   0x1   :  { %s1496_s17 = smov 0  }
   0x2 LB: > { %s33_s18 = sadd.s32 1, %s1451_s16  ;;  %p1293_p0 = scmp.ge.s32.totalorder %s1455_s17, 1  ;;  %s1455_s17 = sphi %s1496_s17, %s14_s17   ;;  %s1451_s16 = sphi %s1494_s16, %s1667_s16   ;;  %s1447_s15 = sphi %s1492_s15, %s1666_s15  }
   0x3   : > { %p35_p1 = scmp.ge.s32.totalorder %s33_s18, 2  ;;  %p228_p2 = scmp.lt.s32.totalorder %s1455_s17, 3 }
   0x5   : > { %s1669_s18 = smov (%p35_p1, %s33_s18), 0  ;;  %p229_p3 = pnand %p1293_p0, %p228_p2 }
   0x6   : > { %p278_p4 = scmp.lt.s32.totalorder (!%p229_p3), %s1447_s15, 1  ;;  %v1457_v0 = vmov (!%p229_p3), 0.0   ;;  %vm1458_vm0 = vmmov (!%p229_p3), 0   ;;  %vm334_vm1 = vcmask (!%p229_p3), 64512   ;;  %vm316_vm2 = vcmask (!%p229_p3), 3072   ;;  %s1461_s29 = smov (!%p229_p3), 120  }
   0x7   : > { %232 = sbr.rel (%p229_p3) target bundleno = 1452 (0x5ac), region = 36  ;;  %1333 = vmatprep.subr.mxu0 (!%p229_p3), %v1457_v0  ;;  %1335 = vmatprep.mubr.msk.f32.mxu0 (!%p229_p3), %vm1458_vm0, %v1457_v0  ;;  %v1459_v3 = vmov (!%p229_p3), -inf   ;;  %321 = vst.msk [vmem:[#allocation3] sm:$0xf] (!%p229_p3), %vm316_vm2, %v1457_v0  ;;  %322 = vst.msk [vmem:[#allocation3 + $0x4] sm:$0xf] (!%p229_p3), %vm316_vm2, %v1457_v0 }
   0x8   : > { %1338 = vmatprep.subr.mxu1 (!%p229_p3), %v1457_v0  ;;  %1340 = vmatprep.mubr.msk.f32.mxu1 (!%p229_p3), %vm1458_vm0, %v1457_v0  ;;  %317 = vst.msk [vmem:[#allocation2] sm:$0xf] (!%p229_p3), %vm316_vm2, %v1459_v3  ;;  %318 = vst.msk [vmem:[#allocation2 + $0x4] sm:$0xf] (!%p229_p3), %vm316_vm2, %v1459_v3  ;;  %vm420_vm3 = vcmask (!%p229_p3), 27648   ;;  %v1460_v10 = vmov (!%p229_p3), 0  }
   0x9   : > { %319 = vst.msk [vmem:[#allocation2 + $0x8] sm:$0xf] (!%p229_p3), %vm316_vm2, %v1459_v3  ;;  %320 = vst.msk [vmem:[#allocation2 + $0xc] sm:$0xf] (!%p229_p3), %vm316_vm2, %v1459_v3  ;;  %1407 = vset.pattern.permute.xlu0 (!%p229_p3), %v1460_v10  ;;  %1408 = vset.pattern.permute.xlu1 (!%p229_p3), %v1460_v10  ;;  %s1462_s30 = smov (!%p229_p3), 112   ;;  %s1463_s5 = smov (!%p229_p3), 104  }
   0xa   : > { %323 = vst.msk [vmem:[#allocation3 + $0x8] sm:$0xf] (!%p229_p3), %vm316_vm2, %v1457_v0  ;;  %324 = vst.msk [vmem:[#allocation3 + $0xc] sm:$0xf] (!%p229_p3), %vm316_vm2, %v1457_v0  ;;  %vm455_vm4 = vcmask (!%p229_p3), 1043456   ;;  %vm451_vm5 = vcmask (!%p229_p3), 31744  }
   0xb   : > { %vm325_vm6 = vcmask (!%p229_p3), 60416   ;;  %s1464_s9 = smov (!%p229_p3), 8   ;;  %s1465_s10 = smov (!%p229_p3), 16   ;;  %vm1164_vm7 = vcmask (!%p229_p3), 130048   ;;  %vm1166_vm8 = vcmask (!%p229_p3), 195584   ;;  %vm1168_vm9 = vcmask (!%p229_p3), 257024  }
   0xc   : > { %327 = vst.msk [vmem:[#allocation4 + $0x4] sm:$0xf] (!%p229_p3), %vm325_vm6, %v1457_v0  ;;  %326 = vst.msk [vmem:[#allocation4] sm:$0xf] (!%p229_p3), %vm325_vm6, %v1457_v0  ;;  %s1466_s11 = smov (!%p229_p3), 24  }
   0xd   : > { %328 = vst.msk [vmem:[#allocation4 + $0x8] sm:$0xf] (!%p229_p3), %vm325_vm6, %v1457_v0  ;;  %329 = vst.msk [vmem:[#allocation4 + $0xc] sm:$0xf] (!%p229_p3), %vm325_vm6, %v1457_v0 }
   0xe   : > { %s1671_s15 = smov (!%p278_p4, %s1447_s15), 1 }
   0xf   : > { %s1516_s19 = sshll.u32 %s1671_s15, 2  ;;  %s304_s28 = scalar_lea.vmem %s1664_s3, %s1671_s15  ;;  %v1556_v11 = vld [vmem:[#allocation2] sm:$0xf]  ;;  %v614_v43 = vld [vmem:[#allocation2 + $0x4] sm:$0xf] }
  0x10   : > { %s291_s22 = scalar_lea.vmem %s1662_s1, %s1516_s19  ;;  %s284_s25 = scalar_lea.vmem %s1661_s0, %s1516_s19  ;;  %v1546_v5 = vld [vmem:[%s304_s28] ss:$0 sm:$0xff]  ;;  %v1598_v46 = vld [vmem:[#allocation2 + $0x8] sm:$0xf]  ;;  %v1000_v50 = vld [vmem:[#allocation2 + $0xc] sm:$0xf] }
  0x11   : > { %v331_v1 = vld [vmem:[%s291_s22] sm:$0xf]  ;;  %s298_s8 = scalar_lea.vmem %s1663_s2, %s1516_s19  ;;  %s311_s14 = scalar_lea.vmem %s1665_s4, %s1516_s19 }
  0x12   : > { %1334 = vmatpush3.xpose.msk.msra.mxu0 %vm334_vm1, %v331_v1  ;;  %v330_v2 = vld [vmem:[%s284_s25] sm:$0xf]  ;;  %535 = vrot.lane.b32.xlu1 %v331_v1, %s1461_s29 }
  0x13   : > { %1348 = vmatprep.subr.mxu0 %v1457_v0  ;;  %v1570_v15 = vld [vmem:[%s298_s8] sm:$0xf] }
  0x14   : > { %1339 = vmatpush3.msk.msra.mxu1 %vm455_vm4, %v1570_v15 }
  0x15   : > { %1336 = vmatmul.mubr.msk.f32.vlgmr.msra.gmra.mrb[0].mxu0 %vm334_vm1, %v330_v2  ;;  %1343 = vmatprep.subr.mxu1 %v1457_v0 }
  0x16   : > { %1350 = vmatprep.mubr.msk.f32.mxu0 %vm1458_vm0, %v1457_v0  ;;  %533 = vrot.lane.b32.xlu1 %v330_v2, %s1461_s29 }
  0x1a   : > { %728 = vrot.lane.b32.xlu1 %v331_v1, %s1462_s30 }
  0x1e   : > { %726 = vrot.lane.b32.xlu1 %v330_v2, %s1462_s30 }
  0x22   : > { %921 = vrot.lane.b32.xlu1 %v331_v1, %s1463_s5 }
  0x26   : > { %919 = vrot.lane.b32.xlu1 %v330_v2, %s1463_s5 }
  0x84   : > { %v536_v16 = vpop.permute.xlu1 %535 }
  0x88   : > { %v534_v19 = vpop.permute.xlu1 %533 }
  0x8c   : > { %v729_v21 = vpop.permute.xlu1 %728 }
  0x90   : > { %v727_v22 = vpop.permute.xlu1 %726 }
  0x94   : > { %v922_v24 = vpop.permute.xlu1 %921 }
  0x98   : > { %v920_v25 = vpop.permute.xlu1 %919 }
  0xe8   : > { %v407_v4 = vpop.f32.mrb[0].mxu0 }
  0xe9   : > { %v411_v6 = vmul.f32 0.35355338, %v407_v4  ;;  %v1337_v7 = vpop.f32.mrb[1].mxu0 }
  0xeb   : > { %v418_v8 = vadd.f32 %v1546_v5, %v411_v6 }
  0xed   : > { %v421_v9 = vsel %vm420_vm3, %v418_v8, -inf }
  0xee   : > { %422 = vmax.xlane.f32.xlu0 %v421_v9 }
 0x17b   : > { %v423_v12 = vpop.xlane.xlu0 %422 }
 0x17c   : > { %v1559_v13 = vmax.f32 %v1556_v11, %v423_v12 }
 0x17e   : > { %v425_v14 = vsub.f32 %v1556_v11, %v1559_v13  ;;  %532 = vst.msk [vmem:[#allocation2] sm:$0xf] %vm316_vm2, %v1559_v13  ;;  %430 = vperm.xlu0 %1407, %v1559_v13  }
 0x1fd   : > { %v431_v17 = vpop.permute.xlu0 %430 }
 0x1fe   : > { %v433_v18 = vsub.f32 %v418_v8, %v431_v17 }
 0x200   : > { %v434_v20 = vmul.f32 1.442695, %v433_v18 }
 0x202   : > { %1409 = vpow2.f32 %v434_v20 }
 0x20c   : > { %v1410_v23 = vpop.eup %1409 }
 0x20d   : > { %1341 = vmatmul.mubr.msk.f32.vlgmr.msra.gmra.mrb[0].mxu1 %vm451_vm5, %v1410_v23  ;;  %v438_v55 = vsel %vm420_vm3, %v1410_v23, 0.0 }
 0x20e   : > { %1344 = vmatpush3.xpose.msk.msra.mxu1 %vm334_vm1, %v536_v16  ;;  %1345 = vmatprep.mubr.msk.f32.mxu1 %vm1458_vm0, %v1457_v0  ;;  %v426_v16 = vmul.f32 1.442695, %v425_v14  ;;  %v436_v14 = vld [vmem:[#allocation3] sm:$0xf] }
 0x20f   : > { %1353 = vmatprep.subr.mxu1 %v1457_v0 }
 0x211   : > { %1346 = vmatmul.mubr.msk.f32.vlgmr.msra.gmra.mrb[2].mxu1 %vm334_vm1, %v534_v19 }
 0x212   : > { %1354 = vmatpush3.xpose.msk.msra.mxu1 %vm334_vm1, %v729_v21  ;;  %1355 = vmatprep.mubr.msk.f32.mxu1 %vm1458_vm0, %v1457_v0 }
 0x213   : > { %1363 = vmatprep.subr.mxu1 %v1457_v0 }
 0x215   : > { %1356 = vmatmul.mubr.msk.f32.vlgmr.msra.gmra.mrb[4].mxu1 %vm334_vm1, %v727_v22 }
 0x216   : > { %1364 = vmatpush3.xpose.msk.msra.mxu1 %vm334_vm1, %v922_v24  ;;  %1365 = vmatprep.mubr.msk.f32.mxu1 %vm1458_vm0, %v1457_v0 }
 0x219   : > { %1366 = vmatmul.mubr.msk.f32.vlgmr.msra.gmra.mrb[6].mxu1 %vm334_vm1, %v920_v25 }
 0x2e0   : > { %v1590_v26 = vpop.f32.mrb[0].mxu1 }
 0x2e1   : > { %v1342_v27 = vpop.f32.mrb[1].mxu1 }
 0x2e2   : > { %v824_v27 = vld [vmem:[#allocation3 + $0x8] sm:$0xf] }
 0x2e4   : > { %v607_v28 = vpop.f32.mrb[2].mxu1 }
 0x2e5   : > { %v611_v29 = vmul.f32 0.35355338, %v607_v28  ;;  %v1347_v30 = vpop.f32.mrb[3].mxu1 }
 0x2e7   : > { %v612_v31 = vadd.f32 %v1546_v5, %v611_v29 }
 0x2e8   : > { %v800_v32 = vpop.f32.mrb[4].mxu1 }
 0x2e9   : > { %v804_v33 = vmul.f32 0.35355338, %v800_v32  ;;  %v1357_v34 = vpop.f32.mrb[5].mxu1  ;;  %v615_v35 = vsel %vm420_vm3, %v612_v31, -inf }
 0x2ea   : > { %616 = vmax.xlane.f32.xlu1 %v615_v35 }
 0x2eb   : > { %v805_v36 = vadd.f32 %v1546_v5, %v804_v33 }
 0x2ec   : > { %v993_v37 = vpop.f32.mrb[6].mxu1 }
 0x2ed   : > { %v997_v38 = vmul.f32 0.35355338, %v993_v37  ;;  %v1367_v39 = vpop.f32.mrb[7].mxu1  ;;  %v808_v40 = vsel %vm420_vm3, %v805_v36, -inf }
 0x2ee   : > { %809 = vmax.xlane.f32.xlu0 %v808_v40 }
 0x2ef   : > { %v998_v41 = vadd.f32 %v1546_v5, %v997_v38  ;;  %v444_v38 = vld [vmem:[#allocation4] sm:$0xf] }
 0x2f1   : > { %v1001_v42 = vsel %vm420_vm3, %v998_v41, -inf }
 0x2f2   : > { %1002 = vmax.xlane.f32.xlu1 %v1001_v42 }
 0x377   : > { %v617_v44 = vpop.xlane.xlu1 %616 }
 0x378   : > { %v618_v45 = vmax.f32 %v614_v43, %v617_v44 }
 0x37a   : > { %v619_v47 = vsub.f32 %v614_v43, %v618_v45  ;;  %725 = vst.msk [vmem:[#allocation2 + $0x4] sm:$0xf] %vm316_vm2, %v618_v45  ;;  %624 = vperm.xlu1 %1408, %v618_v45   ;;  %v639_v43 = vld [vmem:[#allocation4 + $0x4] sm:$0xf] }
 0x37b   : > { %v810_v48 = vpop.xlane.xlu0 %809 }
 0x37c   : > { %v811_v49 = vmax.f32 %v1598_v46, %v810_v48  ;;  %v620_v10 = vmul.f32 1.442695, %v619_v47 }
 0x37e   : > { %v812_v51 = vsub.f32 %v1598_v46, %v811_v49  ;;  %918 = vst.msk [vmem:[#allocation2 + $0x8] sm:$0xf] %vm316_vm2, %v811_v49  ;;  %817 = vperm.xlu0 %1407, %v811_v49   ;;  %v832_v46 = vld [vmem:[#allocation4 + $0x8] sm:$0xf] }
 0x37f   : > { %v1003_v52 = vpop.xlane.xlu1 %1002 }
 0x380   : > { %v1004_v53 = vmax.f32 %v1000_v50, %v1003_v52  ;;  %v813_v17 = vmul.f32 1.442695, %v812_v51  ;;  %v1025_v52 = vld [vmem:[#allocation4 + $0xc] sm:$0xf] }
 0x382   : > { %v1005_v54 = vsub.f32 %v1000_v50, %v1004_v53  ;;  %1111 = vst.msk [vmem:[#allocation2 + $0xc] sm:$0xf] %vm316_vm2, %v1004_v53  ;;  %1010 = vperm.xlu1 %1408, %v1004_v53  }
 0x386   : > { %646 = vrot.lane.b32.xlu1 %v1570_v15, %s1461_s29 }
 0x38a   : > { %839 = vrot.lane.b32.xlu1 %v1570_v15, %s1462_s30 }
 0x38e   : > { %1032 = vrot.lane.b32.xlu1 %v1570_v15, %s1463_s5  ;;  %v1006_v15 = vmul.f32 1.442695, %v1005_v54 }
 0x3b2   : > { %439 = vadd.xlane.f32.xlu1 %v438_v55 }
 0x3f9   : > { %v625_v56 = vpop.permute.xlu1 %624 }
 0x3fa   : > { %v627_v57 = vsub.f32 %v612_v31, %v625_v56  ;;  %v1017_v31 = vld [vmem:[#allocation3 + $0xc] sm:$0xf] }
 0x3fc   : > { %v628_v58 = vmul.f32 1.442695, %v627_v57 }
 0x3fd   : > { %v818_v59 = vpop.permute.xlu0 %817 }
 0x3fe   : > { %1411 = vpow2.f32 %v628_v58  ;;  %v820_v60 = vsub.f32 %v805_v36, %v818_v59 }
 0x400   : > { %v821_v61 = vmul.f32 1.442695, %v820_v60 }
 0x401   : > { %v1011_v62 = vpop.permute.xlu1 %1010 }
 0x402   : > { %1413 = vpow2.f32 %v821_v61  ;;  %v1013_v63 = vsub.f32 %v998_v41, %v1011_v62 }
 0x404   : > { %v1014_v1 = vmul.f32 1.442695, %v1013_v63 }
 0x405   : > { %v647_v2 = vpop.permute.xlu1 %646 }
 0x406   : > { %1415 = vpow2.f32 %v1014_v1  ;;  %1349 = vmatpush3.msk.msra.mxu0 %vm455_vm4, %v647_v2 }
 0x407   : > { %1358 = vmatprep.subr.mxu0 %v1457_v0  ;;  %1417 = vpow2.f32 %v620_v10 }
 0x408   : > { %v1412_v3 = vpop.eup %1411  ;;  %1419 = vpow2.f32 %v1006_v15 }
 0x409   : > { %1351 = vmatmul.mubr.msk.f32.vlgmr.msra.gmra.mrb[2].mxu0 %vm451_vm5, %v1412_v3  ;;  %v633_v4 = vsel %vm420_vm3, %v1412_v3, 0.0  ;;  %v840_v5 = vpop.permute.xlu1 %839  ;;  %1421 = vpow2.f32 %v426_v16 }
 0x40a   : > { %634 = vadd.xlane.f32.xlu0 %v633_v4  ;;  %1359 = vmatpush3.msk.msra.mxu0 %vm455_vm4, %v840_v5  ;;  %1423 = vpow2.f32 %v813_v17 }
 0x40b   : > { %1360 = vmatprep.mubr.msk.f32.mxu0 %vm1458_vm0, %v1457_v0  ;;  %1368 = vmatprep.subr.mxu0 %v1457_v0 }
 0x40c   : > { %v1414_v6 = vpop.eup %1413 }
 0x40d   : > { %1361 = vmatmul.mubr.msk.f32.vlgmr.msra.gmra.mrb[4].mxu0 %vm451_vm5, %v1414_v6  ;;  %v826_v7 = vsel %vm420_vm3, %v1414_v6, 0.0  ;;  %v1033_v8 = vpop.permute.xlu1 %1032 }
 0x40e   : > { %827 = vadd.xlane.f32.xlu1 %v826_v7  ;;  %1369 = vmatpush3.msk.msra.mxu0 %vm455_vm4, %v1033_v8 }
 0x40f   : > { %1370 = vmatprep.mubr.msk.f32.mxu0 %vm1458_vm0, %v1457_v0  ;;  %v631_v0 = vld [vmem:[#allocation3 + $0x4] sm:$0xf] }
 0x410   : > { %v1416_v9 = vpop.eup %1415 }
 0x411   : > { %1371 = vmatmul.mubr.msk.f32.vlgmr.msra.gmra.mrb[6].mxu0 %vm451_vm5, %v1416_v9  ;;  %v1019_v12 = vsel %vm420_vm3, %v1416_v9, 0.0  ;;  %v1418_v18 = vpop.eup %1417 }
 0x412   : > { %1020 = vadd.xlane.f32.xlu0 %v1019_v12  ;;  %v1420_v19 = vpop.eup %1419  ;;  %v632_v24 = vmul.f32 %v1418_v18, %v631_v0 }
 0x413   : > { %v1422_v11 = vpop.eup %1421  ;;  %v1018_v33 = vmul.f32 %v1420_v19, %v1017_v31 }
 0x414   : > { %v1424_v13 = vpop.eup %1423  ;;  %v437_v20 = vmul.f32 %v1422_v11, %v436_v14 }
 0x415   : > { %v825_v29 = vmul.f32 %v1424_v13, %v824_v27 }
 0x41f   : > { %642 = vperm.xlu1 %1408, %v1418_v18  }
 0x423   : > { %1028 = vperm.xlu1 %1408, %v1420_v19  }
 0x428   : > { %447 = vperm.xlu0 %1407, %v1422_v11  }
 0x42c   : > { %835 = vperm.xlu0 %1407, %v1424_v13  }
 0x43f   : > { %v440_v21 = vpop.xlane.xlu1 %439 }
 0x440   : > { %v441_v22 = vadd.f32 %v440_v21, %v437_v20 }
 0x442   : > { %443 = vst.msk [vmem:[#allocation3] sm:$0xf] %vm316_vm2, %v441_v22 }
 0x449   : > { %v1116_v23 = vld [vmem:[#allocation3] sm:$0xf] }
 0x44a   : > { %1119 = vperm.xlu1 %1408, %v1116_v23  }
 0x497   : > { %v635_v25 = vpop.xlane.xlu0 %634 }
 0x498   : > { %v636_v28 = vadd.f32 %v635_v25, %v632_v24 }
 0x49a   : > { %637 = vst.msk [vmem:[#allocation3 + $0x4] sm:$0xf] %vm316_vm2, %v636_v28 }
 0x49b   : > { %v828_v30 = vpop.xlane.xlu1 %827 }
 0x49c   : > { %v829_v32 = vadd.f32 %v828_v30, %v825_v29 }
 0x49e   : > { %830 = vst.msk [vmem:[#allocation3 + $0x8] sm:$0xf] %vm316_vm2, %v829_v32 }
 0x49f   : > { %v1021_v34 = vpop.xlane.xlu0 %1020  ;;  %v643_v44 = vpop.permute.xlu1 %642 }
 0x4a0   : > { %v1022_v35 = vadd.f32 %v1021_v34, %v1018_v33  ;;  %v645_v45 = vmul.f32 %v643_v44, %v639_v43 }
 0x4a1   : > { %v1125_v36 = vld [vmem:[#allocation3 + $0x4] sm:$0xf] }
 0x4a2   : > { %1023 = vst.msk [vmem:[#allocation3 + $0xc] sm:$0xf] %vm316_vm2, %v1022_v35  ;;  %1128 = vperm.xlu0 %1407, %v1125_v36  }
 0x4a3   : > { %v1029_v53 = vpop.permute.xlu1 %1028 }
 0x4a5   : > { %v1134_v37 = vld [vmem:[#allocation3 + $0x8] sm:$0xf] }
 0x4a6   : > { %1137 = vperm.xlu1 %1408, %v1134_v37  }
 0x4a7   : > { %v448_v39 = vpop.permute.xlu0 %447 }
 0x4a8   : > { %v450_v40 = vmul.f32 %v448_v39, %v444_v38 }
 0x4a9   : > { %v1143_v41 = vld [vmem:[#allocation3 + $0xc] sm:$0xf] }
 0x4aa   : > { %v529_v42 = vadd.f32 %v1590_v26, %v450_v40  ;;  %1146 = vperm.xlu0 %1407, %v1143_v41   ;;  %v1031_v26 = vmul.f32 %v1029_v53, %v1025_v52 }
 0x4ab   : > { %v836_v47 = vpop.permute.xlu0 %835 }
 0x4ac   : > { %531 = vst.msk [vmem:[#allocation4] sm:$0xf] %vm325_vm6, %v529_v42  ;;  %v838_v51 = vmul.f32 %v836_v47, %v832_v46 }
 0x4b3   : > { %v1115_v12 = vld [vmem:[#allocation4] sm:$0xf] }
 0x4c9   : > { %v1120_v60 = vpop.permute.xlu1 %1119 }
 0x4dc   : > { %v719_v48 = vpop.f32.mrb[2].mxu0 }
 0x4dd   : > { %v723_v49 = vadd.f32 %v719_v48, %v645_v45  ;;  %v1352_v50 = vpop.f32.mrb[3].mxu0 }
 0x4df   : > { %724 = vst.msk [vmem:[#allocation4 + $0x4] sm:$0xf] %vm325_vm6, %v723_v49 }
 0x4e0   : > { %v912_v54 = vpop.f32.mrb[4].mxu0 }
 0x4e1   : > { %v916_v55 = vadd.f32 %v912_v54, %v838_v51  ;;  %v1362_v56 = vpop.f32.mrb[5].mxu0 }
 0x4e3   : > { %917 = vst.msk [vmem:[#allocation4 + $0x8] sm:$0xf] %vm325_vm6, %v916_v55 }
 0x4e4   : > { %v1105_v57 = vpop.f32.mrb[6].mxu0 }
 0x4e5   : > { %v1109_v58 = vadd.f32 %v1105_v57, %v1031_v26  ;;  %v1372_v59 = vpop.f32.mrb[7].mxu0 }
 0x4e6   : > { %v1124_v2 = vld [vmem:[#allocation4 + $0x4] sm:$0xf] }
 0x4e7   : > { %1110 = vst.msk [vmem:[#allocation4 + $0xc] sm:$0xf] %vm325_vm6, %v1109_v58 }
 0x4ea   : > { %v1133_v5 = vld [vmem:[#allocation4 + $0x8] sm:$0xf] }
 0x4ee   : > { %v1142_v8 = vld [vmem:[#allocation4 + $0xc] sm:$0xf] }
 0x521   : > { %v1129_v61 = vpop.permute.xlu0 %1128 }
 0x522   : > { %1425 = vrcp.f32 %v1129_v61 }
 0x525   : > { %v1138_v62 = vpop.permute.xlu1 %1137 }
 0x526   : > { %1427 = vrcp.f32 %v1138_v62 }
 0x529   : > { %v1147_v63 = vpop.permute.xlu0 %1146 }
 0x52a   : > { %1429 = vrcp.f32 %v1147_v63 }
 0x52b   : > { %1431 = vrcp.f32 %v1120_v60 }
 0x52c   : > { %v1426_v1 = vpop.eup %1425 }
 0x52d   : > { %v1132_v3 = vmul.f32 %v1426_v1, %v1124_v2 }
 0x52f   : > { %1152 = vrot.lane.b32.xlu1 %v1132_v3, %s1464_s9 }
 0x530   : > { %v1428_v4 = vpop.eup %1427 }
 0x531   : > { %v1141_v6 = vmul.f32 %v1428_v4, %v1133_v5 }
 0x533   : > { %1156 = vrot.lane.b32.xlu0 %v1141_v6, %s1465_s10 }
 0x534   : > { %v1430_v7 = vpop.eup %1429 }
 0x535   : > { %v1150_v9 = vmul.f32 %v1430_v7, %v1142_v8  ;;  %v1432_v10 = vpop.eup %1431 }
 0x536   : > { %v1123_v16 = vmul.f32 %v1432_v10, %v1115_v12 }
 0x537   : > { %1160 = vrot.lane.b32.xlu1 %v1150_v9, %s1466_s11 }
 0x5a1   : > { %v1153_v15 = vpop.permute.xlu1 %1152 }
 0x5a2   : > { %v1163_v18 = vsel %vm334_vm1, %v1123_v16, %v1153_v15 }
 0x5a5   : > { %v1157_v17 = vpop.permute.xlu0 %1156 }
 0x5a6   : > { %v1165_v19 = vsel %vm1164_vm7, %v1163_v18, %v1157_v17 }
 0x5a9   : > { %v1161_v11 = vpop.permute.xlu1 %1160 }
 0x5aa   : > { %v1167_v13 = vsel %vm1166_vm8, %v1165_v19, %v1161_v11 }
 0x5ab   : > { %1169 = vst.msk [vmem:[%s311_s14] sm:$0xf] %vm1168_vm9, %v1167_v13 }
 0x5ac PF: > { %s14_s17 = sadd.s32 1, %s1455_s17   ;;  %s1666_s15 = smov %s1451_s16 }
 0x5ad   : > { %p11_p5 = scmp.ge.s32.totalorder %s14_s17, 4   ;;  %s1667_s16 = smov %s1669_s18 }
 0x5af   :  { %13 = sbr.rel (!%p11_p5) target bundleno = 2 (0x2), region = 92 }

// kernel: encoder_forward.27
= control target key start
LH: loop header
LB: loop body
LE: loop exit
PB: predicated region body
PF: predicated region fallthrough
CT: control target
= control target key end

     0   :  { %vm16_vm0 = vcmask 261120   ;;  %s136_s0 = inlined_call_operand.vmem [shape: f32[8,32], index: 0, kind: input, shape index: {}]   ;;  %s137_s1 = inlined_call_operand.vmem [shape: f32[1,32], index: 1, kind: input, shape index: {}]   ;;  %s138_s2 = inlined_call_operand.vmem [shape: f32[1,32], index: 2, kind: input, shape index: {}]   ;;  %s139_s3 = inlined_call_operand.hbm [shape: f32[8,32], index: 3, kind: output, shape index: {}]  }
   0x1   :  { %v15_v0 = vld [vmem:[%s136_s0] sm:$0xff] }
   0x2   :  { %8 = vsyncpa [#allocation3], 0  ;;  %v17_v1 = vsel %vm16_vm0, %v15_v0, 0.0  ;;  %v62_v11 = vld [vmem:[%s137_s1] ss:$0 sm:$0xff]  ;;  %s91_s17 = smov [#allocation2]  }
   0x3   :  { %18 = vadd.xlane.f32.xlu0 %v17_v1  ;;  %v63_v13 = vld [vmem:[%s138_s2] ss:$0 sm:$0xff]  ;;  %s54_s18 = sshll.u32 %s91_s17, 4  ;;  %s55_s18 = int_to_ptr.vmem [resolvable:$true] %s54_s18 }
   0x4   :  { %s67_s19 = scalar_lea.vmem %s55_s18, 128  ;;  %p72_p1 = scmp.lt.s32.totalorder %s55_s18, %s55_s18 }
   0x5   :  { %p68_p0 = scmp.ne.s32.totalorder %s55_s18, %s67_s19  ;;  %p73_p2 = scmp.lt.s32.totalorder %s67_s19, %s67_s19 }
   0x7   :  { %p74_p3 = por %p73_p2, %p72_p1 }
   0x9   :  { %p75_p4 = pnand %p74_p3, %p68_p0 }
  0x90   :  { %v19_v2 = vpop.xlane.xlu0 %18 }
  0x91   :  { %v21_v3 = vmul.f32 0.03125, %v19_v2 }
  0x93   :  { %v22_v4 = vsub.f32 %v15_v0, %v21_v3 }
  0x95   :  { %v23_v5 = vmul.f32 %v22_v4, %v22_v4 }
  0x97   :  { %v24_v6 = vsel %vm16_vm0, %v23_v5, 0.0 }
  0x98   :  { %25 = vadd.xlane.f32.xlu0 %v24_v6 }
 0x125   :  { %v26_v7 = vpop.xlane.xlu0 %25 }
 0x126   :  { %v27_v8 = vmul.f32 0.03125, %v26_v7 }
 0x128   :  { %v28_v9 = vadd.f32 1e-06, %v27_v8 }
 0x12a   :  { %65 = vrsqrt.f32 %v28_v9 }
 0x134   :  { %v66_v10 = vpop.eup %65 }
 0x135   :  { %v30_v12 = vmul.f32 %v66_v10, %v22_v4 }
 0x137   :  { %v38_v14 = vmul.f32 %v62_v11, %v30_v12 }
 0x139   :  { %v46_v15 = vadd.f32 %v63_v13, %v38_v14 }
 0x13b   :  { %47 = vst.msk [vmem:[#allocation2] sm:$0xff] %vm16_vm0, %v46_v15 }
 0x13c   :  { %78 = shalt.err (!%p75_p4)
}
 0x13d   :  { %s79_s21 = scalar_lea.hbm %s139_s3, 128 }
 0x13e   :  { %p80_p5 = scmp.ne.s32.totalorder %s139_s3, %s79_s21  ;;  %p83_p6 = scmp.lt.u32.totalorder %s79_s21, %s139_s3 }
 0x140   :  { %p85_p7 = pnand %p83_p6, %p80_p5 }
 0x142   :  { %88 = shalt.err (!%p85_p7)
}
 0x143   :  { %57 = dma.vmem_to_hbm [thread:$0]  %s55_s18, 128, %s139_s3, [#allocation3]  }
 0x144   :  { %89 = dma.done.wait [#allocation3], 128  }
 0x145   :  { %90 = vsyncadd [#allocation3], 4294967168 }
 0x146   :  { %61 = vsyncpa [#allocation3], 1 }

// kernel: encoder_forward.21
= control target key start
LH: loop header
LB: loop body
LE: loop exit
PB: predicated region body
PF: predicated region fallthrough
CT: control target
= control target key end

     0   :  { %vm27_vm0 = vcmask 261120   ;;  %v214_v0 = vmov 0.0|0.0   ;;  %v215_v4 = vmov 0.0   ;;  %vm216_vm1 = vmmov 0   ;;  %s299_s1 = inlined_call_operand.vmem [shape: f32[64,32], index: 1, kind: input, shape index: {}]   ;;  %s300_s0 = inlined_call_operand.vmem [shape: f32[8,64], index: 0, kind: input, shape index: {}]   ;;  %s301_s2 = inlined_call_operand.vmem [shape: f32[1,32], index: 2, kind: input, shape index: {}]   ;;  %s302_s3 = inlined_call_operand.vmem [shape: f32[8,32], index: 3, kind: input, shape index: {}]   ;;  %s303_s4 = inlined_call_operand.vmem [shape: f32[1,32], index: 4, kind: input, shape index: {}]   ;;  %s304_s5 = inlined_call_operand.vmem [shape: f32[1,32], index: 5, kind: input, shape index: {}]   ;;  %s305_s6 = inlined_call_operand.vmem [shape: f32[8,32], index: 6, kind: output, shape index: {}]  }
   0x1   :  { %197 = vmatprep.subr.bf16.mxu0 %v214_v0  ;;  %v31_v1 = vld [vmem:[%s299_s1] sm:$0xff]  ;;  %v32_v2 = vld [vmem:[%s299_s1 + $0x8] sm:$0xff]  ;;  %v33_v3 = vld [vmem:[%s299_s1 + $0x10] sm:$0xff]  ;;  %28 = vst.msk [vmem:[#allocation2] sm:$0xff] %vm27_vm0, %v215_v4  ;;  %194 = vmatprep.mubr.msk.f32.mxu0 %vm216_vm1, %v215_v4  ;;  %vm39_vm2 = vcmask 523264  }
   0x2   :  { %v198_v5 = vpack.c.bf16 %v32_v2, %v31_v1  ;;  %v34_v6 = vld [vmem:[%s299_s1 + $0x18] sm:$0xff]  ;;  %v35_v8 = vld [vmem:[%s299_s1 + $0x20] sm:$0xff]  ;;  %v36_v9 = vld [vmem:[%s299_s1 + $0x28] sm:$0xff] }
   0x3   :  { %v201_v7 = vpack.c.bf16 %v34_v6, %v33_v3  ;;  %v204_v10 = vpack.c.bf16 %v36_v9, %v35_v8  ;;  %v37_v11 = vld [vmem:[%s299_s1 + $0x30] sm:$0xff]  ;;  %v38_v12 = vld [vmem:[%s299_s1 + $0x38] sm:$0xff]  ;;  %v29_v14 = vld [vmem:[%s300_s0] sm:$0xff] }
   0x4   :  { %199 = vmatpush3.bf16.msra.mxu0 %v198_v5  ;;  %v207_v13 = vpack.c.bf16 %v38_v12, %v37_v11  ;;  %v166_v19 = vld [vmem:[%s301_s2] ss:$0 sm:$0xff] }
   0x5   :  { %200 = vmatprep.subr.bf16.mxu0 %v214_v0  ;;  %v128_v21 = vld [vmem:[%s302_s3] sm:$0xff] }
   0x6   :  { %v167_v34 = vld [vmem:[%s303_s4] ss:$0 sm:$0xff] }
   0x7   :  { %v168_v36 = vld [vmem:[%s304_s5] ss:$0 sm:$0xff] }
   0x8   :  { %202 = vmatpush3.bf16.msra.mxu0 %v201_v7  ;;  %v30_v15 = vld [vmem:[#allocation2] sm:$0xff] }
   0x9   :  { %203 = vmatprep.subr.bf16.mxu0 %v214_v0 }
   0xc   :  { %205 = vmatpush3.bf16.msra.mxu0 %v204_v10 }
   0xd   :  { %206 = vmatprep.subr.bf16.mxu0 %v214_v0 }
  0x10   :  { %208 = vmatpush3.bf16.msra.mxu0 %v207_v13 }
  0x13   :  { %195 = vmatmul.mubr.msk.f32.vlgmr.msra.gmra.mrb[0].mxu0 %vm39_vm2, %v29_v14 }
  0xe6   :  { %v109_v16 = vpop.f32.mrb[0].mxu0 }
  0xe7   :  { %v113_v17 = vadd.f32 %v109_v16, %v30_v15  ;;  %v196_v18 = vpop.f32.mrb[1].mxu0 }
  0xe9   :  { %115 = vst.msk [vmem:[#allocation2] sm:$0xff] %vm27_vm0, %v113_v17 }
  0xf0   :  { %v119_v20 = vld [vmem:[#allocation2] sm:$0xff] }
  0xf1   :  { %v127_v22 = vadd.f32 %v166_v19, %v119_v20 }
  0xf3   :  { %v129_v23 = vadd.f32 %v128_v21, %v127_v22 }
  0xf5   :  { %v130_v24 = vsel %vm27_vm0, %v129_v23, 0.0 }
  0xf6   :  { %131 = vadd.xlane.f32.xlu0 %v130_v24 }
 0x183   :  { %v132_v25 = vpop.xlane.xlu0 %131 }
 0x184   :  { %v134_v26 = vmul.f32 0.03125, %v132_v25 }
 0x186   :  { %v135_v27 = vsub.f32 %v129_v23, %v134_v26 }
 0x188   :  { %v136_v28 = vmul.f32 %v135_v27, %v135_v27 }
 0x18a   :  { %v137_v29 = vsel %vm27_vm0, %v136_v28, 0.0 }
 0x18b   :  { %138 = vadd.xlane.f32.xlu0 %v137_v29 }
 0x218   :  { %v139_v30 = vpop.xlane.xlu0 %138 }
 0x219   :  { %v140_v31 = vmul.f32 0.03125, %v139_v30 }
 0x21b   :  { %v141_v32 = vadd.f32 1e-06, %v140_v31 }
 0x21d   :  { %212 = vrsqrt.f32 %v141_v32 }
 0x227   :  { %v213_v33 = vpop.eup %212 }
 0x228   :  { %v143_v35 = vmul.f32 %v213_v33, %v135_v27 }
 0x22a   :  { %v151_v37 = vmul.f32 %v167_v34, %v143_v35 }
 0x22c   :  { %v159_v38 = vadd.f32 %v168_v36, %v151_v37 }
 0x22e   :  { %160 = vst.msk [vmem:[%s305_s6] sm:$0xff] %vm27_vm0, %v159_v38 }

</bundles_post_ra>
